<compile_context>
chip_gen: v5e
topology: v5e:2x2
jax: 0.10.0
libtpu: 0.0.40
codegen_flags: <defaults>
</compile_context>

<pallas_src>
import functools
from typing import NamedTuple, Optional

import numpy as np
import jax
import jax.numpy as jnp
from jax.experimental import pallas as pl
from jax.experimental.pallas import tpu as pltpu


def _round_up(x: int, m: int) -> int:
    return (x + m - 1) // m * m


def _vmem_capacity_bytes() -> int:
    try:
        return int(pltpu.get_tpu_info().vmem_capacity_bytes)
    except Exception:
        return 64 * 2**20  # conservative (v7x-sized) default


# ----------------------------- Pallas kernels -------------------------------

def _epilogue_store(o, out_ref, var_off, var_pad):
    """std transform on the (128-aligned) var block only; 3 dense stores."""
    ov = o[:, var_off:var_off + var_pad]
    # torch-style softplus (beta=1, threshold=20), then sqrt(.+1e-8), clamp.
    sp = jnp.where(ov > 20.0, ov, jnp.log1p(jnp.exp(jnp.minimum(ov, 20.0))))
    std = jnp.clip(jnp.sqrt(sp + 1e-8), 1e-5, 1e5)
    out_ref[:, :var_off] = o[:, :var_off].astype(out_ref.dtype)
    out_ref[:, var_off:var_off + var_pad] = std.astype(out_ref.dtype)
    out_ref[:, var_off + var_pad:] = o[:, var_off + var_pad:].astype(out_ref.dtype)


def _mog_encoder_kernel(x_ref, w1_ref, b1_ref, w2_ref, b2_ref, out_ref, *,
                        var_off, var_pad, compute_dtype):
    # Resident-weight path: Linear -> ReLU -> Linear, f32 accumulation.
    x = x_ref[...].astype(compute_dtype)
    h = jnp.dot(x, w1_ref[...], preferred_element_type=jnp.float32)
    h = jnp.maximum(h + b1_ref[...], 0.0)
    o = jnp.dot(h.astype(w2_ref.dtype), w2_ref[...],
                preferred_element_type=jnp.float32) + b2_ref[...]
    _epilogue_store(o, out_ref, var_off, var_pad)


def _mog_encoder_kernel_ktiled(x_ref, w1_ref, b1_ref, w2_ref, b2_ref, out_ref,
                               h_acc, *, var_off, var_pad, compute_dtype):
    # K-tiled path: split the first matmul's contraction (F) axis over the
    # inner grid dimension; accumulate h in f32 VMEM scratch.
    k = pl.program_id(1)

    @pl.when(k == 0)
    def _init():
        h_acc[...] = jnp.zeros_like(h_acc)

    x = x_ref[...].astype(compute_dtype)
    h_acc[...] += jnp.dot(x, w1_ref[...], preferred_element_type=jnp.float32)

    @pl.when(k == pl.num_programs(1) - 1)
    def _finalize():
        h = jnp.maximum(h_acc[...] + b1_ref[...], 0.0)
        o = jnp.dot(h.astype(w2_ref.dtype), w2_ref[...],
                    preferred_element_type=jnp.float32) + b2_ref[...]
        _epilogue_store(o, out_ref, var_off, var_pad)


# ------------------------------- Wrappers ------------------------------------

class MoGParams(NamedTuple):
    """Parameters of the MixtureOfGaussians distribution (kernel output)."""
    mixture_logits: jax.Array  # (batch, n_comp)
    means: jax.Array           # (batch, n_comp, d_z)
    stds: jax.Array            # (batch, n_comp, d_z)


class PreparedMoGEncoder(NamedTuple):
    """One-time-prepared (permuted / padded / cast) encoder weights."""
    w1: jax.Array              # (F_pad, H_pad)    compute dtype
    b1: jax.Array              # (1, H_pad)        f32
    w2: jax.Array              # (H_pad, OUT_PAD)  compute dtype, columns permuted
    b2: jax.Array              # (1, OUT_PAD)      f32
    n_comp: int
    d_z: int
    in_features: int           # F (unpadded)
    var_off: int               # start of the var/std column block (128-aligned)
    var_pad: int               # padded width of the var block (multiple of 128)
    pi_off: int                # start of the mixture-logit column block


def prepare_mog_encoder(w1, b1, w2, b2, *, n_comp: int, d_z: int,
                        compute_dtype=jnp.bfloat16) -> PreparedMoGEncoder:
    """One-time layout work (hoisted out of the forward hot path, cacheable):
    permute W2/b2 columns from interleaved (mu_k, var_k, pi_k) to
    [ means | vars | pis ] with each block padded to a 128-lane boundary, and
    zero-pad / cast all weights to MXU-friendly shapes."""
    F, H = w1.shape
    chunk = 2 * d_z + 1
    out_dim = n_comp * chunk
    assert w2.shape == (H, out_dim)
    n_mu = n_comp * d_z

    F_pad = _round_up(F, 128)
    H_pad = _round_up(H, 128)
    mu_pad = _round_up(n_mu, 128)
    var_pad = _round_up(n_mu, 128)
    pi_pad = _round_up(n_comp, 128)
    out_pad = mu_pad + var_pad + pi_pad
    var_off = mu_pad
    pi_off = mu_pad + var_pad

    base = np.arange(n_comp)[:, None] * chunk
    mu_cols = (base + np.arange(d_z)[None, :]).reshape(-1)
    var_cols = (base + d_z + np.arange(d_z)[None, :]).reshape(-1)
    pi_cols = np.arange(n_comp) * chunk + 2 * d_z

    w1_p = jnp.zeros((F_pad, H_pad), compute_dtype).at[:F, :H].set(
        w1.astype(compute_dtype))
    b1_p = jnp.zeros((1, H_pad), jnp.float32).at[0, :H].set(
        b1.astype(jnp.float32))

    w2c = w2.astype(compute_dtype)
    b2c = b2.astype(jnp.float32)
    w2_p = jnp.zeros((H_pad, out_pad), compute_dtype)
    w2_p = w2_p.at[:H, 0:n_mu].set(w2c[:, mu_cols])
    w2_p = w2_p.at[:H, var_off:var_off + n_mu].set(w2c[:, var_cols])
    w2_p = w2_p.at[:H, pi_off:pi_off + n_comp].set(w2c[:, pi_cols])
    b2_p = jnp.zeros((1, out_pad), jnp.float32)
    b2_p = b2_p.at[0, 0:n_mu].set(b2c[mu_cols])
    b2_p = b2_p.at[0, var_off:var_off + n_mu].set(b2c[var_cols])
    b2_p = b2_p.at[0, pi_off:pi_off + n_comp].set(b2c[pi_cols])

    return PreparedMoGEncoder(w1_p, b1_p, w2_p, b2_p, n_comp, d_z, F,
                              var_off, var_pad, pi_off)


def mog_encoder_forward(x, enc: PreparedMoGEncoder, *,
                        batch_tile: Optional[int] = None,
                        k_tile: Optional[int] = None,
                        out_dtype=jnp.float32) -> MoGParams:
    B, F = x.shape
    assert F == enc.in_features
    F_pad, H_pad = enc.w1.shape
    out_pad = enc.w2.shape[1]
    n_mu = enc.n_comp * enc.d_z
    compute_dtype = enc.w1.dtype

    # ---- generation-aware budgets ----
    vmem_cap = _vmem_capacity_bytes()
    vmem_limit = int(min(100 * 2**20, max(32 * 2**20, (vmem_cap * 3) // 4)))
    if batch_tile is None:
        # Bigger tiles on 128-MiB-VMEM parts (v5e/v6e); 256 on v7x.
        batch_tile = 512 if vmem_cap >= 96 * 2**20 else 256

    # ---- batch tiling; keep >= 2 grid steps so v7x can use both TCs ----
    B8 = _round_up(B, 8)
    bt = _round_up(min(batch_tile, B8), 8)
    if B8 // bt < 2 and B8 >= 16:
        bt = _round_up(max(8, -(-B8 // 2)), 8)
    B_pad = _round_up(B, bt)
    n_bt = B_pad // bt

    # ---- resident-weight vs K-tiled decision ----
    w_itemsize = jnp.dtype(compute_dtype).itemsize
    x_itemsize = jnp.dtype(x.dtype).itemsize
    o_itemsize = jnp.dtype(out_dtype).itemsize
    resident_bytes = ((F_pad * H_pad + H_pad * out_pad) * w_itemsize
                      + (H_pad + out_pad) * 4
                      + 2 * bt * F_pad * x_itemsize
                      + 2 * bt * out_pad * o_itemsize)
    use_resident = (k_tile is None) and (resident_bytes <= int(0.6 * vmem_limit))

    # ---- avoid the extra x pad/cast pass when shapes are already aligned ----
    if B_pad == B and F_pad == F:
        x_p = x
    else:
        x_p = jnp.zeros((B_pad, F_pad), x.dtype).at[:B, :F].set(x)

    compiler_params = pltpu.CompilerParams(
        dimension_semantics=("parallel",) if use_resident
        else ("parallel", "arbitrary"),
        vmem_limit_bytes=vmem_limit)
    out_shape = jax.ShapeDtypeStruct((B_pad, out_pad), out_dtype)

    def run(single_buffer_weights: bool):
        def const_spec(shape, index_map):
            # Grid-invariant operands: single-buffer them (halves weight VMEM).
            if single_buffer_weights:
                return pl.BlockSpec(shape, index_map,
                                    pipeline_mode=pl.Buffered(1))
            return pl.BlockSpec(shape, index_map)

        if use_resident:
            kernel = functools.partial(
                _mog_encoder_kernel, var_off=enc.var_off, var_pad=enc.var_pad,
                compute_dtype=compute_dtype)
            return pl.pallas_call(
                kernel,
                out_shape=out_shape,
                grid=(n_bt,),
                in_specs=[
                    pl.BlockSpec((bt, F_pad), lambda i: (i, 0)),        # x tile
                    const_spec((F_pad, H_pad), lambda i: (0, 0)),       # W1
                    const_spec((1, H_pad), lambda i: (0, 0)),           # b1
                    const_spec((H_pad, out_pad), lambda i: (0, 0)),     # W2
                    const_spec((1, out_pad), lambda i: (0, 0)),         # b2
                ],
                out_specs=pl.BlockSpec((bt, out_pad), lambda i: (i, 0)),
                compiler_params=compiler_params,
            )(x_p, enc.w1, enc.b1, enc.w2, enc.b2)

        # K-tiled path (big weights / small-VMEM v7x): split F across the grid.
        fk = k_tile if k_tile is not None else 512
        fk = max(128, _round_up(min(fk, F_pad), 128))
        while F_pad % fk != 0:
            fk -= 128
        n_k = F_pad // fk
        kernel = functools.partial(
            _mog_encoder_kernel_ktiled, var_off=enc.var_off,
            var_pad=enc.var_pad, compute_dtype=compute_dtype)
        return pl.pallas_call(
            kernel,
            out_shape=out_shape,
            grid=(n_bt, n_k),
            in_specs=[
                pl.BlockSpec((bt, fk), lambda i, k: (i, k)),            # x tile
                pl.BlockSpec((fk, H_pad), lambda i, k: (k, 0)),         # W1 tile
                const_spec((1, H_pad), lambda i, k: (0, 0)),            # b1
                const_spec((H_pad, out_pad), lambda i, k: (0, 0)),      # W2
                const_spec((1, out_pad), lambda i, k: (0, 0)),          # b2
            ],
            out_specs=pl.BlockSpec((bt, out_pad), lambda i, k: (i, 0)),
            scratch_shapes=[pltpu.VMEM((bt, H_pad), jnp.float32)],
            compiler_params=compiler_params,
        )(x_p, enc.w1, enc.b1, enc.w2, enc.b2)

    try:
        out = run(True)
    except Exception:
        # Older jax versions may reject pl.Buffered(1): fall back to default
        # double-buffering of the invariant weights.
        out = run(False)

    means = out[:B, :n_mu].astype(jnp.float32).reshape(B, enc.n_comp, enc.d_z)
    stds = out[:B, enc.var_off:enc.var_off + n_mu].astype(jnp.float32).reshape(
        B, enc.n_comp, enc.d_z)
    pis = out[:B, enc.pi_off:enc.pi_off + enc.n_comp].astype(jnp.float32)
    return MoGParams(mixture_logits=pis, means=means, stds=stds)


# --------------------------- Pure-JAX reference ------------------------------

def mog_encoder_reference(x, w1, b1, w2, b2, *, n_comp: int, d_z: int):
    h = jnp.maximum(x @ w1 + b1, 0.0)
    o = h @ w2 + b2
    comps = jnp.split(o, n_comp, axis=-1)
    mus = [c[:, :d_z] for c in comps]
    var = [c[:, d_z:2 * d_z] for c in comps]
    pis = [c[:, -1] for c in comps]
    means = jnp.stack(mus, axis=1)
    stds = jnp.sqrt(jax.nn.softplus(jnp.stack(var, axis=1)) + 1e-8)
    stds = jnp.clip(stds, 1e-5, 1e5)
    return jnp.stack(pis, axis=1), means, stds


if __name__ == "__main__":
    key = jax.random.PRNGKey(0)

    # ----- config 1: resident-weight path (f32 exact + bf16 fast) -----
    B, F, H = 512, 64, 96
    n_comp, d_z = 4, 8
    out_dim = n_comp * (2 * d_z + 1)
    kx, k1, k2, k3, k4, key = jax.random.split(key, 6)
    x = jax.random.normal(kx, (B, F), dtype=jnp.float32)
    w1 = 0.1 * jax.random.normal(k1, (F, H), dtype=jnp.float32)
    b1 = 0.1 * jax.random.normal(k2, (H,), dtype=jnp.float32)
    w2 = 0.1 * jax.random.normal(k3, (H, out_dim), dtype=jnp.float32)
    b2 = 0.1 * jax.random.normal(k4, (out_dim,), dtype=jnp.float32)

    ref_pis, ref_means, ref_stds = mog_encoder_reference(
        x, w1, b1, w2, b2, n_comp=n_comp, d_z=d_z)

    # f32 MXU operands, tight tolerance.
    enc32 = prepare_mog_encoder(w1, b1, w2, b2, n_comp=n_comp, d_z=d_z,
                                compute_dtype=jnp.float32)
    p32 = mog_encoder_forward(x, enc32)
    jax.block_until_ready(p32)
    assert jnp.allclose(p32.mixture_logits, ref_pis, atol=1e-5, rtol=1e-5)
    assert jnp.allclose(p32.means, ref_means, atol=1e-5, rtol=1e-5)
    assert jnp.allclose(p32.stds, ref_stds, atol=1e-5, rtol=1e-5)

    # bf16 MXU operands (inputs/weights rounded to bf16, f32 accumulation).
    enc16 = prepare_mog_encoder(w1, b1, w2, b2, n_comp=n_comp, d_z=d_z)
    p16 = mog_encoder_forward(x, enc16)
    jax.block_until_ready(p16)
    assert jnp.allclose(p16.mixture_logits, ref_pis, atol=5e-2, rtol=5e-2)
    assert jnp.allclose(p16.means, ref_means, atol=5e-2, rtol=5e-2)
    assert jnp.allclose(p16.stds, ref_stds, atol=5e-2, rtol=5e-2)

    # ----- config 2: force the K-tiled (contraction-split) fallback path -----
    B2, F2, H2 = 256, 256, 128
    n_comp2, d_z2 = 3, 5
    out_dim2 = n_comp2 * (2 * d_z2 + 1)
    kx, k1, k2, k3, k4, key = jax.random.split(key, 6)
    x2 = jax.random.normal(kx, (B2, F2), dtype=jnp.float32)
    w1_2 = 0.1 * jax.random.normal(k1, (F2, H2), dtype=jnp.float32)
    b1_2 = 0.1 * jax.random.normal(k2, (H2,), dtype=jnp.float32)
    w2_2 = 0.1 * jax.random.normal(k3, (H2, out_dim2), dtype=jnp.float32)
    b2_2 = 0.1 * jax.random.normal(k4, (out_dim2,), dtype=jnp.float32)
    ref2 = mog_encoder_reference(x2, w1_2, b1_2, w2_2, b2_2,
                                 n_comp=n_comp2, d_z=d_z2)
    enc2 = prepare_mog_encoder(w1_2, b1_2, w2_2, b2_2, n_comp=n_comp2,
                               d_z=d_z2, compute_dtype=jnp.float32)
    pk = mog_encoder_forward(x2, enc2, k_tile=128)
    jax.block_until_ready(pk)
    assert jnp.allclose(pk.mixture_logits, ref2[0], atol=1e-5, rtol=1e-5)
    assert jnp.allclose(pk.means, ref2[1], atol=1e-5, rtol=1e-5)
    assert jnp.allclose(pk.stds, ref2[2], atol=1e-5, rtol=1e-5)

    print("KERNEL_OK")
</pallas_src>

<mosaic_0001>
module attributes {stable_mosaic.version = 11 : i64} {
  func.func @_mog_encoder_kernel(%arg0: i32, %arg1: memref<256x128xf32, #tpu.memory_space<vmem>>, %arg2: memref<128x128xf32, #tpu.memory_space<vmem>>, %arg3: memref<1x128xf32, #tpu.memory_space<vmem>>, %arg4: memref<128x384xf32, #tpu.memory_space<vmem>>, %arg5: memref<1x384xf32, #tpu.memory_space<vmem>>, %arg6: memref<256x384xf32, #tpu.memory_space<vmem>>) attributes {dimension_semantics = [#tpu.dimension_semantics<parallel>], iteration_bounds = array<i64: 2>, scalar_prefetch = 0 : i64, scratch_operands = 0 : i64, tpu.core_type = #tpu.core_type<tc>, window_params = [{transform_indices = @transform_0, window_bounds = array<i64: 256, 128>}, {pipeline_mode = #tpu.pipeline_mode<synchronous>, transform_indices = @transform_1, window_bounds = array<i64: 128, 128>}, {pipeline_mode = #tpu.pipeline_mode<synchronous>, transform_indices = @transform_2, window_bounds = array<i64: 1, 128>}, {pipeline_mode = #tpu.pipeline_mode<synchronous>, transform_indices = @transform_3, window_bounds = array<i64: 128, 384>}, {pipeline_mode = #tpu.pipeline_mode<synchronous>, transform_indices = @transform_4, window_bounds = array<i64: 1, 384>}, {transform_indices = @transform_5, window_bounds = array<i64: 256, 384>}]} {
    %c0 = arith.constant 0 : index
    %c0_0 = arith.constant 0 : index
    %0 = vector.load %arg1[%c0, %c0_0] : memref<256x128xf32, #tpu.memory_space<vmem>>, vector<256x128xf32>
    %c0_1 = arith.constant 0 : index
    %c0_2 = arith.constant 0 : index
    %1 = vector.load %arg2[%c0_1, %c0_2] : memref<128x128xf32, #tpu.memory_space<vmem>>, vector<128x128xf32>
    %cst = arith.constant dense<0.000000e+00> : vector<256x128xf32>
    %2 = tpu.matmul %0, %1, %cst {dimension_numbers = #tpu.dot_dimension_numbers<[1], [0], [0], [1], [0, 0, 1, 1], [], []>} : vector<256x128xf32>, vector<128x128xf32>, vector<256x128xf32> -> vector<256x128xf32>
    %c0_3 = arith.constant 0 : index
    %c0_4 = arith.constant 0 : index
    %3 = vector.load %arg3[%c0_3, %c0_4] : memref<1x128xf32, #tpu.memory_space<vmem>>, vector<1x128xf32>
    %4 = vector.broadcast %3 : vector<1x128xf32> to vector<256x128xf32>
    %5 = arith.addf %2, %4 : vector<256x128xf32>
    %cst_5 = arith.constant 0.000000e+00 : f32
    %6 = vector.broadcast %cst_5 : f32 to vector<256x128xf32>
    %7 = arith.maximumf %5, %6 : vector<256x128xf32>
    %c0_6 = arith.constant 0 : index
    %c0_7 = arith.constant 0 : index
    %8 = vector.load %arg4[%c0_6, %c0_7] : memref<128x384xf32, #tpu.memory_space<vmem>>, vector<128x384xf32>
    %cst_8 = arith.constant dense<0.000000e+00> : vector<256x384xf32>
    %9 = tpu.matmul %7, %8, %cst_8 {dimension_numbers = #tpu.dot_dimension_numbers<[1], [0], [0], [1], [0, 0, 1, 1], [], []>} : vector<256x128xf32>, vector<128x384xf32>, vector<256x384xf32> -> vector<256x384xf32>
    %c0_9 = arith.constant 0 : index
    %c0_10 = arith.constant 0 : index
    %10 = vector.load %arg5[%c0_9, %c0_10] : memref<1x384xf32, #tpu.memory_space<vmem>>, vector<1x384xf32>
    %11 = vector.broadcast %10 : vector<1x384xf32> to vector<256x384xf32>
    %12 = arith.addf %9, %11 : vector<256x384xf32>
    %13 = vector.extract_strided_slice %12 {offsets = [0, 128], sizes = [256, 128], strides = [1, 1]} : vector<256x384xf32> to vector<256x128xf32>
    %cst_11 = arith.constant 2.000000e+01 : f32
    %14 = vector.broadcast %cst_11 : f32 to vector<256x128xf32>
    %15 = arith.cmpf ogt, %13, %14 : vector<256x128xf32>
    %cst_12 = arith.constant 2.000000e+01 : f32
    %16 = vector.broadcast %cst_12 : f32 to vector<256x128xf32>
    %17 = arith.minimumf %13, %16 : vector<256x128xf32>
    %18 = math.exp %17 : vector<256x128xf32>
    %19 = math.log1p %18 : vector<256x128xf32>
    %20 = arith.select %15, %13, %19 : vector<256x128xi1>, vector<256x128xf32>
    %cst_13 = arith.constant 9.99999993E-9 : f32
    %21 = vector.broadcast %cst_13 : f32 to vector<256x128xf32>
    %22 = arith.addf %20, %21 : vector<256x128xf32>
    %23 = math.sqrt %22 : vector<256x128xf32>
    %cst_14 = arith.constant 9.99999974E-6 : f32
    %cst_15 = arith.constant 1.000000e+05 : f32
    %24 = vector.broadcast %cst_14 : f32 to vector<256x128xf32>
    %25 = arith.maximumf %24, %23 : vector<256x128xf32>
    %26 = vector.broadcast %cst_15 : f32 to vector<256x128xf32>
    %27 = arith.minimumf %26, %25 : vector<256x128xf32>
    %28 = vector.extract_strided_slice %12 {offsets = [0, 0], sizes = [256, 128], strides = [1, 1]} : vector<256x384xf32> to vector<256x128xf32>
    %c0_16 = arith.constant 0 : index
    %c0_17 = arith.constant 0 : index
    %29 = vector.load %arg6[%c0_16, %c0_17] : memref<256x384xf32, #tpu.memory_space<vmem>>, vector<256x128xf32>
    tpu.vector_store %arg6[%c0_16, %c0_17], %28 {strides = array<i32>} : memref<256x384xf32, #tpu.memory_space<vmem>>, vector<256x128xf32>,
    %c0_18 = arith.constant 0 : index
    %c128 = arith.constant 128 : index
    %30 = vector.load %arg6[%c0_18, %c128] : memref<256x384xf32, #tpu.memory_space<vmem>>, vector<256x128xf32>
    tpu.vector_store %arg6[%c0_18, %c128], %27 {strides = array<i32>} : memref<256x384xf32, #tpu.memory_space<vmem>>, vector<256x128xf32>,
    %31 = vector.extract_strided_slice %12 {offsets = [0, 256], sizes = [256, 128], strides = [1, 1]} : vector<256x384xf32> to vector<256x128xf32>
    %c0_19 = arith.constant 0 : index
    %c256 = arith.constant 256 : index
    %32 = vector.load %arg6[%c0_19, %c256] : memref<256x384xf32, #tpu.memory_space<vmem>>, vector<256x128xf32>
    tpu.vector_store %arg6[%c0_19, %c256], %31 {strides = array<i32>} : memref<256x384xf32, #tpu.memory_space<vmem>>, vector<256x128xf32>,
    return
  }
  func.func @transform_0(%arg0: i32) -> (i32, i32) {
    %c0_i32 = arith.constant 0 : i32
    %c0_i32_0 = arith.constant 0 : i32
    return %arg0, %c0_i32 : i32, i32
  }
  func.func @transform_1(%arg0: i32) -> (i32, i32) {
    %c0_i32 = arith.constant 0 : i32
    %c0_i32_0 = arith.constant 0 : i32
    %c0_i32_1 = arith.constant 0 : i32
    return %c0_i32, %c0_i32_0 : i32, i32
  }
  func.func @transform_2(%arg0: i32) -> (i32, i32) {
    %c0_i32 = arith.constant 0 : i32
    %c0_i32_0 = arith.constant 0 : i32
    %c0_i32_1 = arith.constant 0 : i32
    return %c0_i32, %c0_i32_0 : i32, i32
  }
  func.func @transform_3(%arg0: i32) -> (i32, i32) {
    %c0_i32 = arith.constant 0 : i32
    %c0_i32_0 = arith.constant 0 : i32
    %c0_i32_1 = arith.constant 0 : i32
    return %c0_i32, %c0_i32_0 : i32, i32
  }
  func.func @transform_4(%arg0: i32) -> (i32, i32) {
    %c0_i32 = arith.constant 0 : i32
    %c0_i32_0 = arith.constant 0 : i32
    %c0_i32_1 = arith.constant 0 : i32
    return %c0_i32, %c0_i32_0 : i32, i32
  }
  func.func @transform_5(%arg0: i32) -> (i32, i32) {
    %c0_i32 = arith.constant 0 : i32
    %c0_i32_0 = arith.constant 0 : i32
    return %arg0, %c0_i32 : i32, i32
  }
}

module attributes {stable_mosaic.version = 11 : i64} {
  func.func @_mog_encoder_kernel(%arg0: i32, %arg1: memref<256x128xf32, #tpu.memory_space<vmem>>, %arg2: memref<128x128xf32, #tpu.memory_space<vmem>>, %arg3: memref<1x128xf32, #tpu.memory_space<vmem>>, %arg4: memref<128x384xf32, #tpu.memory_space<vmem>>, %arg5: memref<1x384xf32, #tpu.memory_space<vmem>>, %arg6: memref<256x384xf32, #tpu.memory_space<vmem>>) attributes {dimension_semantics = [#tpu.dimension_semantics<parallel>], iteration_bounds = array<i64: 2>, scalar_prefetch = 0 : i64, scratch_operands = 0 : i64, tpu.core_type = #tpu.core_type<tc>, window_params = [{transform_indices = @transform_0, window_bounds = array<i64: 256, 128>}, {pipeline_mode = #tpu.pipeline_mode<synchronous>, transform_indices = @transform_1, window_bounds = array<i64: 128, 128>}, {pipeline_mode = #tpu.pipeline_mode<synchronous>, transform_indices = @transform_2, window_bounds = array<i64: 1, 128>}, {pipeline_mode = #tpu.pipeline_mode<synchronous>, transform_indices = @transform_3, window_bounds = array<i64: 128, 384>}, {pipeline_mode = #tpu.pipeline_mode<synchronous>, transform_indices = @transform_4, window_bounds = array<i64: 1, 384>}, {transform_indices = @transform_5, window_bounds = array<i64: 256, 384>}]} {
    %c0 = arith.constant 0 : index
    %c0_0 = arith.constant 0 : index
    %0 = vector.load %arg1[%c0, %c0_0] : memref<256x128xf32, #tpu.memory_space<vmem>>, vector<256x128xf32>
    %c0_1 = arith.constant 0 : index
    %c0_2 = arith.constant 0 : index
    %1 = vector.load %arg2[%c0_1, %c0_2] : memref<128x128xf32, #tpu.memory_space<vmem>>, vector<128x128xf32>
    %cst = arith.constant dense<0.000000e+00> : vector<256x128xf32>
    %2 = tpu.matmul %0, %1, %cst {dimension_numbers = #tpu.dot_dimension_numbers<[1], [0], [0], [1], [0, 0, 1, 1], [], []>} : vector<256x128xf32>, vector<128x128xf32>, vector<256x128xf32> -> vector<256x128xf32>
    %c0_3 = arith.constant 0 : index
    %c0_4 = arith.constant 0 : index
    %3 = vector.load %arg3[%c0_3, %c0_4] : memref<1x128xf32, #tpu.memory_space<vmem>>, vector<1x128xf32>
    %4 = vector.broadcast %3 : vector<1x128xf32> to vector<256x128xf32>
    %5 = arith.addf %2, %4 : vector<256x128xf32>
    %cst_5 = arith.constant 0.000000e+00 : f32
    %6 = vector.broadcast %cst_5 : f32 to vector<256x128xf32>
    %7 = arith.maximumf %5, %6 : vector<256x128xf32>
    %c0_6 = arith.constant 0 : index
    %c0_7 = arith.constant 0 : index
    %8 = vector.load %arg4[%c0_6, %c0_7] : memref<128x384xf32, #tpu.memory_space<vmem>>, vector<128x384xf32>
    %cst_8 = arith.constant dense<0.000000e+00> : vector<256x384xf32>
    %9 = tpu.matmul %7, %8, %cst_8 {dimension_numbers = #tpu.dot_dimension_numbers<[1], [0], [0], [1], [0, 0, 1, 1], [], []>} : vector<256x128xf32>, vector<128x384xf32>, vector<256x384xf32> -> vector<256x384xf32>
    %c0_9 = arith.constant 0 : index
    %c0_10 = arith.constant 0 : index
    %10 = vector.load %arg5[%c0_9, %c0_10] : memref<1x384xf32, #tpu.memory_space<vmem>>, vector<1x384xf32>
    %11 = vector.broadcast %10 : vector<1x384xf32> to vector<256x384xf32>
    %12 = arith.addf %9, %11 : vector<256x384xf32>
    %13 = vector.extract_strided_slice %12 {offsets = [0, 128], sizes = [256, 128], strides = [1, 1]} : vector<256x384xf32> to vector<256x128xf32>
    %cst_11 = arith.constant 2.000000e+01 : f32
    %14 = vector.broadcast %cst_11 : f32 to vector<256x128xf32>
    %15 = arith.cmpf ogt, %13, %14 : vector<256x128xf32>
    %cst_12 = arith.constant 2.000000e+01 : f32
    %16 = vector.broadcast %cst_12 : f32 to vector<256x128xf32>
    %17 = arith.minimumf %13, %16 : vector<256x128xf32>
    %18 = math.exp %17 : vector<256x128xf32>
    %19 = math.log1p %18 : vector<256x128xf32>
    %20 = arith.select %15, %13, %19 : vector<256x128xi1>, vector<256x128xf32>
    %cst_13 = arith.constant 9.99999993E-9 : f32
    %21 = vector.broadcast %cst_13 : f32 to vector<256x128xf32>
    %22 = arith.addf %20, %21 : vector<256x128xf32>
    %23 = math.sqrt %22 : vector<256x128xf32>
    %cst_14 = arith.constant 9.99999974E-6 : f32
    %cst_15 = arith.constant 1.000000e+05 : f32
    %24 = vector.broadcast %cst_14 : f32 to vector<256x128xf32>
    %25 = arith.maximumf %24, %23 : vector<256x128xf32>
    %26 = vector.broadcast %cst_15 : f32 to vector<256x128xf32>
    %27 = arith.minimumf %26, %25 : vector<256x128xf32>
    %28 = vector.extract_strided_slice %12 {offsets = [0, 0], sizes = [256, 128], strides = [1, 1]} : vector<256x384xf32> to vector<256x128xf32>
    %c0_16 = arith.constant 0 : index
    %c0_17 = arith.constant 0 : index
    %29 = vector.load %arg6[%c0_16, %c0_17] : memref<256x384xf32, #tpu.memory_space<vmem>>, vector<256x128xf32>
    tpu.vector_store %arg6[%c0_16, %c0_17], %28 {strides = array<i32>} : memref<256x384xf32, #tpu.memory_space<vmem>>, vector<256x128xf32>,
    %c0_18 = arith.constant 0 : index
    %c128 = arith.constant 128 : index
    %30 = vector.load %arg6[%c0_18, %c128] : memref<256x384xf32, #tpu.memory_space<vmem>>, vector<256x128xf32>
    tpu.vector_store %arg6[%c0_18, %c128], %27 {strides = array<i32>} : memref<256x384xf32, #tpu.memory_space<vmem>>, vector<256x128xf32>,
    %31 = vector.extract_strided_slice %12 {offsets = [0, 256], sizes = [256, 128], strides = [1, 1]} : vector<256x384xf32> to vector<256x128xf32>
    %c0_19 = arith.constant 0 : index
    %c256 = arith.constant 256 : index
    %32 = vector.load %arg6[%c0_19, %c256] : memref<256x384xf32, #tpu.memory_space<vmem>>, vector<256x128xf32>
    tpu.vector_store %arg6[%c0_19, %c256], %31 {strides = array<i32>} : memref<256x384xf32, #tpu.memory_space<vmem>>, vector<256x128xf32>,
    return
  }
  func.func @transform_0(%arg0: i32) -> (i32, i32) {
    %c0_i32 = arith.constant 0 : i32
    %c0_i32_0 = arith.constant 0 : i32
    return %arg0, %c0_i32 : i32, i32
  }
  func.func @transform_1(%arg0: i32) -> (i32, i32) {
    %c0_i32 = arith.constant 0 : i32
    %c0_i32_0 = arith.constant 0 : i32
    %c0_i32_1 = arith.constant 0 : i32
    return %c0_i32, %c0_i32_0 : i32, i32
  }
  func.func @transform_2(%arg0: i32) -> (i32, i32) {
    %c0_i32 = arith.constant 0 : i32
    %c0_i32_0 = arith.constant 0 : i32
    %c0_i32_1 = arith.constant 0 : i32
    return %c0_i32, %c0_i32_0 : i32, i32
  }
  func.func @transform_3(%arg0: i32) -> (i32, i32) {
    %c0_i32 = arith.constant 0 : i32
    %c0_i32_0 = arith.constant 0 : i32
    %c0_i32_1 = arith.constant 0 : i32
    return %c0_i32, %c0_i32_0 : i32, i32
  }
  func.func @transform_4(%arg0: i32) -> (i32, i32) {
    %c0_i32 = arith.constant 0 : i32
    %c0_i32_0 = arith.constant 0 : i32
    %c0_i32_1 = arith.constant 0 : i32
    return %c0_i32, %c0_i32_0 : i32, i32
  }
  func.func @transform_5(%arg0: i32) -> (i32, i32) {
    %c0_i32 = arith.constant 0 : i32
    %c0_i32_0 = arith.constant 0 : i32
    return %arg0, %c0_i32 : i32, i32
  }
}

</mosaic_0001>

<bundles_post_ra>
// kernel: tpu_custom_call.1
= control target key start
LH: loop header
LB: loop body
LE: loop exit
PB: predicated region body
PF: predicated region fallthrough
CT: control target
= control target key end

     0   :  { %10 = vsyncpa [#allocation3], 0  ;;  %s3624_s0 = inlined_call_operand.hbm [shape: f32[512,128], index: 0, kind: input, shape index: {}]   ;;  %s3625_s1 = inlined_call_operand.hbm [shape: f32[128,128], index: 1, kind: input, shape index: {}]   ;;  %s3626_s2 = inlined_call_operand.hbm [shape: f32[1,128], index: 2, kind: input, shape index: {}]   ;;  %s3627_s3 = inlined_call_operand.hbm [shape: f32[128,384], index: 3, kind: input, shape index: {}]   ;;  %s3628_s4 = inlined_call_operand.vmem [shape: f32[1,384], index: 4, kind: input, shape index: {}]   ;;  %s3629_s5 = inlined_call_operand.hbm [shape: f32[512,384], index: 5, kind: output, shape index: {}]  }
   0x1   :  { %12 = vsyncpa [#allocation3 + $0x1], 0 }
   0x2   :  { %13 = vsyncpa [#allocation6], 0 }
   0x3   :  { %14 = vsyncpa [#allocation9], 0 }
   0x4   :  { %15 = vsyncpa [#allocation4], 0 }
   0x5   :  { %17 = vsyncpa [#allocation4 + $0x1], 0  ;;  %s2564_s18 = smov 0   ;;  %s2566_s19 = smov 0  }
   0x6   :  { %s2568_s20 = smov 0   ;;  %s2570_s21 = smov 0  }
   0x7 LB: > { %s2585_s22 = sadd.s32 4294967295, %s2523_s21   ;;  %s2030_s23 = sadd.s32 4294967294, %s2523_s21   ;;  %s2523_s21 = sphi %s2570_s21, %s3660_s21   ;;  %s2519_s20 = sphi %s2568_s20, %s3659_s20   ;;  %s2515_s19 = sphi %s2566_s19, %s3658_s19   ;;  %s2511_s18 = sphi %s2564_s18, %s3657_s18  }
   0x8   : > { %p43_p0 = scmp.ne.s32.totalorder %s2515_s19, %s2511_s18  ;;  %p44_p1 = scmp.eq.s32.totalorder %s2585_s22, 0 }
   0x9   : > { %p151_p2 = scmp.eq.s32.totalorder %s2585_s22, 1  ;;  %p157_p3 = scmp.eq.s32.totalorder %s2030_s23, 1 }
   0xa   : > { %p2594_p4 = por %p44_p1, %p43_p0  ;;  %p2031_p5 = scmp.ge.s32.totalorder %s2523_s21, 1 }
   0xb   : > { %p2599_p6 = por %p157_p3, %p43_p0  ;;  %p164_p7 = scmp.lt.s32.totalorder %s2523_s21, 3 }
   0xc   : > { %s175_s28 = sshll.u32 %s3625_s1, 4  ;;  %s2525_s30 = smov [#allocation5]   ;;  %s176_s28 = int_to_ptr.hbm [resolvable:$true] %s175_s28 }
   0xd   : > { %p2607_p8 = pnand %p2031_p5, %p164_p7  ;;  %s177_s6 = sshll.u32 %s2525_s30, 4  ;;  %s178_s6 = int_to_ptr.vmem [resolvable:$true] %s177_s6 }
   0xe   : > { %s190_s10 = sshll.u32 %s3626_s2, 4  ;;  %s3630_s11 = smov 128   ;;  %s191_s10 = int_to_ptr.hbm [resolvable:$true] %s190_s10 }
   0xf   : > { %p2068_p9 = pneg %p2607_p8  ;;  %s2527_s12 = smov 8  }
  0x10   : > { %s2528_s13 = smov [#allocation7]   ;;  %s201_s17 = sshll.u32 %s3627_s3, 4  ;;  %s202_s17 = int_to_ptr.hbm [resolvable:$true] %s201_s17 }
  0x11   : > { %p2615_p10 = pnand %p2068_p9, %p44_p1  ;;  %s192_s14 = sshll.u32 %s2528_s13, 4  ;;  %s193_s14 = int_to_ptr.vmem [resolvable:$true] %s192_s14 }
  0x12   : > { %s2529_s23 = smov [#allocation8]   ;;  %s2530_s27 = smov 384  }
  0x13   : > { %2071 = dma.hbm_to_vmem [thread:$0]  (!%p2615_p10), %s176_s28, 2048, %s178_s6, [#allocation6], %s3630_s11, %s3630_s11, %s2527_s12  }
  0x14   : > { %2074 = dma.hbm_to_vmem [thread:$0]  (!%p2615_p10), %s191_s10, 16, %s193_s14, [#allocation6]  }
  0x15   : > { %s203_s26 = sshll.u32 %s2529_s23, 4  ;;  %s2531_s28 = smov 24   ;;  %s204_s26 = int_to_ptr.vmem [resolvable:$true] %s203_s26 }
  0x16   : > { %2077 = dma.hbm_to_vmem [thread:$0]  (!%p2615_p10), %s202_s17, 6144, %s204_s26, [#allocation9], %s2530_s27, %s2530_s27, %s2531_s28  }
  0x17   : > { %s2636_s30 = sadd.s32 1, %s2523_s21   ;;  %s30_s8 = sadd.s32 1, %s2519_s20 }
  0x18   : > { %s27_s6 = ssub.s32 %s2523_s21, %s2636_s30  ;;  %p37_p13 = scmp.ne.s32.totalorder %s2519_s20, %s2515_s19 }
  0x19   : > { %p28_p12 = scmp.eq.s32.totalorder %s27_s6, 0  ;;  %p38_p0 = scmp.eq.s32.totalorder %s2523_s21, 0 }
  0x1a   : > { %p2649_p3 = por %p151_p2, %p37_p13  ;;  %p2089_p5 = scmp.lt.s32.totalorder %s2523_s21, 2 }
  0x1b   : > { %s2645_s9 = scalar_select %p28_p12, %s2519_s20, %s30_s8  }
  0x1c   : > { %s220_s13 = sand.u32 1, %s2519_s20   ;;  %s2049_s14 = sshll.u32 %s2523_s21, 8 }
  0x1d   : > { %p39_p7 = por %p38_p0, %p37_p13  ;;  %s2036_s7 = sshll.u32 %s220_s13, 8 }
  0x1e   : > { %s229_s17 = scalar_lea.hbm %s3624_s0, %s2049_s14  ;;  %s224_s26 = scalar_lea.vmem [#allocation2], %s2036_s7 }
  0x1f   : > { %s230_s23 = sshll.u32 %s229_s17, 4  ;;  %s232_s27 = sshll.u32 %s224_s26, 4  ;;  %s231_s23 = int_to_ptr.hbm [resolvable:$true] %s230_s23  ;;  %s233_s27 = int_to_ptr.vmem [resolvable:$true] %s232_s27 }
  0x20   : > { %p2659_p9 = pnand %p2089_p5, %p39_p7  ;;  %s221_s6 = scalar_lea.sflag [#allocation3], %s220_s13 }
  0x21   : > { %s2419_s8 = sshra.s32 %s231_s23, 4  ;;  %s2426_s7 = scalar_lea.hbm %s3624_s0, 512  ;;  %s2420_s8 = int_to_ptr.hbm [resolvable:$true] %s2419_s8 }
  0x22   : > { %s2421_s11 = scalar_lea.hbm %s2420_s8, 256  ;;  %p2423_p10 = pneg %p2659_p9 }
  0x23   : > { %p2422_p2 = scmp.ne.s32.totalorder %s2420_s8, %s2421_s11  ;;  %p2427_p0 = scmp.lt.s32.totalorder %s2420_s8, %s3624_s0 }
  0x24   : > { %p2428_p5 = scmp.lt.s32.totalorder %s2426_s7, %s2421_s11 }
  0x25   : > { %p2424_p12 = pnand %p2423_p10, %p2422_p2 }
  0x26   : > { %p2429_p7 = por %p2428_p5, %p2427_p0 }
  0x27   : > { %p2425_p13 = pneg %p2424_p12 }
  0x29   : > { %p2430_p11 = pnand %p2429_p7, %p2425_p13 }
  0x2b   : > { %2433 = shalt.err (!%p2430_p11)
}
  0x2c   : > { %s3637_s13 = smov 128   ;;  %244 = sbr.rel (%p2607_p8) target bundleno = 655 (0x28f), region = 40 }
  0x2d   : > { %2081 = dma.hbm_to_vmem [thread:$0]  (!%p2659_p9), %s231_s23, 4096, %s233_s27, %s221_s6, %s3637_s13, %s3637_s13, %s2527_s12  }
  0x2e   : > { %s2679_s26 = sand.u32 (!%p2607_p8), 1, %s2515_s19  }
  0x2f   : > { %s2040_s8 = sshll.u32 (!%p2607_p8), %s2679_s26, 8  ;;  %s247_s11 = scalar_lea.sflag (!%p2607_p8), [#allocation3], %s2679_s26 }
  0x30   : > { %s2683_s14 = scalar_lea.vmem (!%p2607_p8), [#allocation2], %s2040_s8 }
  0x31   : > { %2494 = dma.done.wait (%p2594_p4), %s247_s11, 4096  }
  0x32   : > { %2496 = vsyncadd (%p2594_p4), %s247_s11, 4294963200 }
  0x33   : > { %2498 = dma.done.wait (%p44_p1), [#allocation6], 2064  }
  0x34   : > { %2500 = vsyncadd (%p44_p1), [#allocation6], 4294965232 }
  0x35   : > { %2502 = dma.done.wait (%p44_p1), [#allocation9], 6144  }
  0x36   : > { %2504 = vsyncadd (%p44_p1), [#allocation9], 4294961152  ;;  %v342_v0 = vld [vmem:[#allocation5 + $0x78] sm:$0xff]  ;;  %v341_v1 = vld [vmem:[#allocation5 + $0x70] sm:$0xff]  ;;  %s2050_s12 = smul.u32 768, %s2679_s26  ;;  %s1912_s16 = scalar_lea.sflag [#allocation4], %s2679_s26 }
  0x37   : > { %347 = vmatpush.msra.mxu0 %v342_v0  ;;  %v340_v2 = vld [vmem:[#allocation5 + $0x68] sm:$0xff]  ;;  %v339_v3 = vld [vmem:[#allocation5 + $0x60] sm:$0xff]  ;;  %v338_v4 = vld [vmem:[#allocation5 + $0x58] sm:$0xff]  ;;  %s2051_s27 = smul.u32 768, %s2585_s22 }
  0x38   : > { %v337_v5 = vld [vmem:[#allocation5 + $0x50] sm:$0xff]  ;;  %v336_v6 = vld [vmem:[#allocation5 + $0x48] sm:$0xff]  ;;  %v335_v7 = vld [vmem:[#allocation5 + $0x40] sm:$0xff]  ;;  %s2755_s23 = scalar_lea.vmem [#allocation10], %s2050_s12 }
  0x39   : > { %348 = vmatpush.msra.mxu0 %v341_v1  ;;  %v334_v8 = vld [vmem:[#allocation5 + $0x38] sm:$0xff]  ;;  %v333_v9 = vld [vmem:[#allocation5 + $0x30] sm:$0xff]  ;;  %v332_v10 = vld [vmem:[#allocation5 + $0x28] sm:$0xff]  ;;  %s1924_s15 = scalar_lea.hbm %s3629_s5, %s2051_s27  ;;  %s1925_s7 = sshll.u32 %s2755_s23, 4  ;;  %s1926_s7 = int_to_ptr.vmem [resolvable:$true] %s1925_s7 }
  0x3a   : > { %v331_v11 = vld [vmem:[#allocation5 + $0x20] sm:$0xff]  ;;  %v330_v12 = vld [vmem:[#allocation5 + $0x18] sm:$0xff]  ;;  %v329_v13 = vld [vmem:[#allocation5 + $0x10] sm:$0xff]  ;;  %s1927_s22 = sshll.u32 %s1924_s15, 4  ;;  %s1928_s22 = int_to_ptr.hbm [resolvable:$true] %s1927_s22 }
  0x3b   : > { %349 = vmatpush.msra.mxu0 %v340_v2  ;;  %v328_v14 = vld [vmem:[#allocation5 + $0x8] sm:$0xff]  ;;  %v327_v15 = vld [vmem:[#allocation5] sm:$0xff]  ;;  %v297_v18 = vld [vmem:[%s2683_s14 + $0x10] sm:$0xff]  ;;  %s2463_s17 = sshra.s32 %s1928_s22, 4  ;;  %s2464_s17 = int_to_ptr.hbm [resolvable:$true] %s2463_s17 }
  0x3c   : > { %v295_v16 = vld [vmem:[%s2683_s14] sm:$0xff]  ;;  %v296_v17 = vld [vmem:[%s2683_s14 + $0x8] sm:$0xff]  ;;  %v298_v19 = vld [vmem:[%s2683_s14 + $0x18] sm:$0xff]  ;;  %s2465_s13 = scalar_lea.hbm %s2464_s17, 768  ;;  %p2470_p11 = scmp.lt.s32.totalorder %s2464_s17, %s3629_s5 }
  0x3d   : > { %350 = vmatpush.msra.mxu0 %v339_v3  ;;  %v299_v20 = vld [vmem:[%s2683_s14 + $0x20] sm:$0xff]  ;;  %v300_v21 = vld [vmem:[%s2683_s14 + $0x28] sm:$0xff]  ;;  %v301_v22 = vld [vmem:[%s2683_s14 + $0x30] sm:$0xff]  ;;  %p2466_p1 = scmp.ne.s32.totalorder %s2464_s17, %s2465_s13 }
  0x3e   : > { %v302_v23 = vld [vmem:[%s2683_s14 + $0x38] sm:$0xff]  ;;  %v303_v24 = vld [vmem:[%s2683_s14 + $0x40] sm:$0xff]  ;;  %v537_v25 = vld [vmem:[#allocation8 + $0x168] sm:$0xff] }
  0x3f   : > { %351 = vmatpush.msra.mxu0 %v338_v4  ;;  %v538_v26 = vld [vmem:[#allocation8 + $0x170] sm:$0xff]  ;;  %v539_v27 = vld [vmem:[#allocation8 + $0x178] sm:$0xff]  ;;  %548 = vmatpush.msra.mxu1 %v537_v25  ;;  %v536_v30 = vld [vmem:[#allocation8 + $0x160] sm:$0xff]  ;;  %p2467_p4 = pnand %p2466_p1, %p2649_p3 }
  0x40   : > { %661 = vmatpush.msra.mxu2 %v538_v26  ;;  %v534_v28 = vld [vmem:[#allocation8 + $0x150] sm:$0xff]  ;;  %v535_v29 = vld [vmem:[#allocation8 + $0x158] sm:$0xff]  ;;  %774 = vmatpush.msra.mxu3 %v539_v27  ;;  %v532_v32 = vld [vmem:[#allocation8 + $0x140] sm:$0xff] }
  0x41   : > { %352 = vmatpush.msra.mxu0 %v337_v5  ;;  %v531_v31 = vld [vmem:[#allocation8 + $0x138] sm:$0xff]  ;;  %549 = vmatpush.msra.mxu1 %v534_v28  ;;  %v533_v33 = vld [vmem:[#allocation8 + $0x148] sm:$0xff]  ;;  %v528_v35 = vld [vmem:[#allocation8 + $0x120] sm:$0xff]  ;;  %p2468_p8 = pneg %p2467_p4 }
  0x42   : > { %662 = vmatpush.msra.mxu2 %v535_v29  ;;  %775 = vmatpush.msra.mxu3 %v536_v30  ;;  %v304_v34 = vld [vmem:[%s2683_s14 + $0x48] sm:$0xff]  ;;  %v530_v37 = vld [vmem:[#allocation8 + $0x130] sm:$0xff]  ;;  %v527_v40 = vld [vmem:[#allocation8 + $0x118] sm:$0xff] }
  0x43   : > { %353 = vmatpush.msra.mxu0 %v336_v6  ;;  %550 = vmatpush.msra.mxu1 %v531_v31  ;;  %v529_v36 = vld [vmem:[#allocation8 + $0x128] sm:$0xff]  ;;  %v526_v39 = vld [vmem:[#allocation8 + $0x110] sm:$0xff]  ;;  %v523_v42 = vld [vmem:[#allocation8 + $0xf8] sm:$0xff] }
  0x44   : > { %663 = vmatpush.msra.mxu2 %v532_v32  ;;  %776 = vmatpush.msra.mxu3 %v533_v33  ;;  %v525_v38 = vld [vmem:[#allocation8 + $0x108] sm:$0xff]  ;;  %v522_v41 = vld [vmem:[#allocation8 + $0xf0] sm:$0xff]  ;;  %v524_v43 = vld [vmem:[#allocation8 + $0x100] sm:$0xff] }
  0x45   : > { %354 = vmatpush.msra.mxu0 %v335_v7  ;;  %551 = vmatpush.msra.mxu1 %v528_v35  ;;  %v519_v44 = vld [vmem:[#allocation8 + $0xd8] sm:$0xff]  ;;  %v520_v45 = vld [vmem:[#allocation8 + $0xe0] sm:$0xff]  ;;  %v305_v46 = vld [vmem:[%s2683_s14 + $0x50] sm:$0xff] }
  0x46   : > { %664 = vmatpush.msra.mxu2 %v529_v36  ;;  %777 = vmatpush.msra.mxu3 %v530_v37  ;;  %v521_v47 = vld [vmem:[#allocation8 + $0xe8] sm:$0xff]  ;;  %v516_v48 = vld [vmem:[#allocation8 + $0xc0] sm:$0xff]  ;;  %v518_v50 = vld [vmem:[#allocation8 + $0xd0] sm:$0xff] }
  0x47   : > { %355 = vmatpush.msra.mxu0 %v334_v8  ;;  %552 = vmatpush.msra.mxu1 %v525_v38  ;;  %v517_v49 = vld [vmem:[#allocation8 + $0xc8] sm:$0xff]  ;;  %v514_v52 = vld [vmem:[#allocation8 + $0xb0] sm:$0xff]  ;;  %v515_v53 = vld [vmem:[#allocation8 + $0xb8] sm:$0xff] }
  0x48   : > { %665 = vmatpush.msra.mxu2 %v526_v39  ;;  %778 = vmatpush.msra.mxu3 %v527_v40  ;;  %v513_v51 = vld [vmem:[#allocation8 + $0xa8] sm:$0xff]  ;;  %v510_v54 = vld [vmem:[#allocation8 + $0x90] sm:$0xff]  ;;  %v511_v55 = vld [vmem:[#allocation8 + $0x98] sm:$0xff] }
  0x49   : > { %356 = vmatpush.msra.mxu0 %v333_v9  ;;  %553 = vmatpush.msra.mxu1 %v522_v41  ;;  %v512_v56 = vld [vmem:[#allocation8 + $0xa0] sm:$0xff]  ;;  %v507_v57 = vld [vmem:[#allocation8 + $0x78] sm:$0xff]  ;;  %v509_v60 = vld [vmem:[#allocation8 + $0x88] sm:$0xff] }
  0x4a   : > { %666 = vmatpush.msra.mxu2 %v523_v42  ;;  %779 = vmatpush.msra.mxu3 %v524_v43  ;;  %v508_v58 = vld [vmem:[#allocation8 + $0x80] sm:$0xff]  ;;  %v306_v59 = vld [vmem:[%s2683_s14 + $0x58] sm:$0xff]  ;;  %v505_v62 = vld [vmem:[#allocation8 + $0x68] sm:$0xff] }
  0x4b   : > { %357 = vmatpush.msra.mxu0 %v332_v10  ;;  %554 = vmatpush.msra.mxu1 %v519_v44  ;;  %v504_v61 = vld [vmem:[#allocation8 + $0x60] sm:$0xff]  ;;  %v506_v63 = vld [vmem:[#allocation8 + $0x70] sm:$0xff]  ;;  %v501_v0 = vld [vmem:[#allocation8 + $0x48] sm:$0xff] }
  0x4c   : > { %667 = vmatpush.msra.mxu2 %v520_v45  ;;  %780 = vmatpush.msra.mxu3 %v521_v47  ;;  %v502_v1 = vld [vmem:[#allocation8 + $0x50] sm:$0xff]  ;;  %v503_v2 = vld [vmem:[#allocation8 + $0x58] sm:$0xff]  ;;  %v500_v5 = vld [vmem:[#allocation8 + $0x40] sm:$0xff] }
  0x4d   : > { %358 = vmatpush.msra.mxu0 %v331_v11  ;;  %555 = vmatpush.msra.mxu1 %v516_v48  ;;  %v498_v3 = vld [vmem:[#allocation8 + $0x30] sm:$0xff]  ;;  %v499_v4 = vld [vmem:[#allocation8 + $0x38] sm:$0xff]  ;;  %v496_v8 = vld [vmem:[#allocation8 + $0x20] sm:$0xff] }
  0x4e   : > { %668 = vmatpush.msra.mxu2 %v517_v49  ;;  %781 = vmatpush.msra.mxu3 %v518_v50  ;;  %v307_v6 = vld [vmem:[%s2683_s14 + $0x60] sm:$0xff]  ;;  %v497_v9 = vld [vmem:[#allocation8 + $0x28] sm:$0xff]  ;;  %v314_v30 = vld [vmem:[%s2683_s14 + $0x98] sm:$0xff] }
  0x4f   : > { %359 = vmatpush.msra.mxu0 %v330_v12  ;;  %556 = vmatpush.msra.mxu1 %v513_v51  ;;  %v495_v7 = vld [vmem:[#allocation8 + $0x18] sm:$0xff]  ;;  %v492_v10 = vld [vmem:[#allocation8] sm:$0xff]  ;;  %v493_v11 = vld [vmem:[#allocation8 + $0x8] sm:$0xff] }
  0x50   : > { %669 = vmatpush.msra.mxu2 %v514_v52  ;;  %782 = vmatpush.msra.mxu3 %v515_v53  ;;  %v494_v12 = vld [vmem:[#allocation8 + $0x10] sm:$0xff]  ;;  %v316_v38 = vld [vmem:[%s2683_s14 + $0xa8] sm:$0xff]  ;;  %v319_v50 = vld [vmem:[%s2683_s14 + $0xc0] sm:$0xff] }
  0x51   : > { %360 = vmatpush.msra.mxu0 %v329_v13  ;;  %557 = vmatpush.msra.mxu1 %v510_v54  ;;  %v308_v13 = vld [vmem:[%s2683_s14 + $0x68] sm:$0xff]  ;;  %v313_v26 = vld [vmem:[%s2683_s14 + $0x90] sm:$0xff] }
  0x52   : > { %670 = vmatpush.msra.mxu2 %v511_v55  ;;  %783 = vmatpush.msra.mxu3 %v512_v56  ;;  %v317_v42 = vld [vmem:[%s2683_s14 + $0xb0] sm:$0xff]  ;;  %v320_v54 = vld [vmem:[%s2683_s14 + $0xc8] sm:$0xff] }
  0x53   : > { %361 = vmatpush.msra.mxu0 %v328_v14  ;;  %558 = vmatpush.msra.mxu1 %v507_v57  ;;  %v309_v14 = vld [vmem:[%s2683_s14 + $0x70] sm:$0xff] }
  0x54   : > { %671 = vmatpush.msra.mxu2 %v508_v58  ;;  %784 = vmatpush.msra.mxu3 %v509_v60  ;;  %v321_v58 = vld [vmem:[%s2683_s14 + $0xd0] sm:$0xff] }
  0x55   : > { %362 = vmatpush.msra.mxu0 %v327_v15  ;;  %559 = vmatpush.msra.mxu1 %v504_v61  ;;  %v310_v15 = vld [vmem:[%s2683_s14 + $0x78] sm:$0xff] }
  0x56   : > { %363 = vmatmul.f32.vlgmr.msra.gmra.mxu0 %v295_v16  ;;  %672 = vmatpush.msra.mxu2 %v505_v62  ;;  %v2713_v16 = vld [vmem:[#allocation7] ss:$0 sm:$0xff]  ;;  %v322_v62 = vld [vmem:[%s2683_s14 + $0xd8] sm:$0xff] }
  0x57   : > { %785 = vmatpush.msra.mxu3 %v506_v63  ;;  %560 = vmatpush.msra.mxu1 %v501_v0 }
  0x58   : > { %673 = vmatpush.msra.mxu2 %v502_v1 }
  0x59   : > { %786 = vmatpush.msra.mxu3 %v503_v2  ;;  %561 = vmatpush.msra.mxu1 %v498_v3  ;;  %v323_v2 = vld [vmem:[%s2683_s14 + $0xe0] sm:$0xff] }
  0x5a   : > { %674 = vmatpush.msra.mxu2 %v499_v4 }
  0x5b   : > { %787 = vmatpush.msra.mxu3 %v500_v5  ;;  %562 = vmatpush.msra.mxu1 %v495_v7 }
  0x5c   : > { %675 = vmatpush.msra.mxu2 %v496_v8 }
  0x5d   : > { %788 = vmatpush.msra.mxu3 %v497_v9  ;;  %563 = vmatpush.msra.mxu1 %v492_v10  ;;  %v325_v10 = vld [vmem:[%s2683_s14 + $0xf0] sm:$0xff] }
  0x5e   : > { %366 = vmatmul.f32.gmra.mxu0 %v296_v17  ;;  %676 = vmatpush.msra.mxu2 %v493_v11 }
  0x5f   : > { %789 = vmatpush.msra.mxu3 %v494_v12 }
  0x66   : > { %369 = vmatmul.f32.gmra.mxu0 %v297_v18  ;;  %v311_v18 = vld [vmem:[%s2683_s14 + $0x80] sm:$0xff] }
  0x6e   : > { %372 = vmatmul.f32.gmra.mxu0 %v298_v19 }
  0x76   : > { %375 = vmatmul.f32.gmra.mxu0 %v299_v20 }
  0x7e   : > { %378 = vmatmul.f32.gmra.mxu0 %v300_v21 }
  0x86   : > { %381 = vmatmul.f32.gmra.mxu0 %v301_v22  ;;  %v312_v22 = vld [vmem:[%s2683_s14 + $0x88] sm:$0xff] }
  0x8e   : > { %384 = vmatmul.f32.gmra.mxu0 %v302_v23 }
  0x96   : > { %387 = vmatmul.f32.gmra.mxu0 %v303_v24 }
  0x9e   : > { %390 = vmatmul.f32.gmra.mxu0 %v304_v34  ;;  %v315_v34 = vld [vmem:[%s2683_s14 + $0xa0] sm:$0xff] }
  0xa6   : > { %393 = vmatmul.f32.gmra.mxu0 %v305_v46  ;;  %v318_v46 = vld [vmem:[%s2683_s14 + $0xb8] sm:$0xff] }
  0xae   : > { %396 = vmatmul.f32.gmra.mxu0 %v306_v59 }
  0xb6   : > { %399 = vmatmul.f32.gmra.mxu0 %v307_v6  ;;  %v324_v6 = vld [vmem:[%s2683_s14 + $0xe8] sm:$0xff] }
  0xbe   : > { %402 = vmatmul.f32.gmra.mxu0 %v308_v13 }
  0xc6   : > { %405 = vmatmul.f32.gmra.mxu0 %v309_v14  ;;  %v326_v14 = vld [vmem:[%s2683_s14 + $0xf8] sm:$0xff]  ;;  %s2469_s14 = scalar_lea.hbm %s3629_s5, 1536 }
  0xc7   : > { %p2471_p9 = scmp.lt.s32.totalorder %s2469_s14, %s2465_s13 }
  0xc9   : > { %p2472_p2 = por %p2471_p9, %p2470_p11 }
  0xcb   : > { %p2473_p10 = pnand %p2472_p2, %p2468_p8 }
  0xce   : > { %408 = vmatmul.f32.gmra.mxu0 %v310_v15 }
  0xd3   : > { %v364_v17 = vpop.f32.mrf.mxu0 }
  0xd4   : > { %v365_v19 = vadd.f32 %v2713_v16, %v364_v17 }
  0xd6   : > { %v460_v20 = vmax.f32 %v365_v19, 0.0  ;;  %411 = vmatmul.f32.gmra.mxu0 %v311_v18  ;;  %v540_v18 = vld [vmem:[%s3628_s4] sm:$0x7] }
  0xd7   : > { %v2751_v19 = vperm.slane %v540_v18, 0 }
  0xd8   : > { %564 = vmatmul.f32.vlgmr.msra.gmra.mxu1 %v460_v20  ;;  %677 = vmatmul.f32.vlgmr.msra.gmra.mxu2 %v460_v20 }
  0xd9   : > { %790 = vmatmul.f32.vlgmr.msra.gmra.mxu3 %v460_v20 }
  0xdb   : > { %v367_v21 = vpop.f32.mrf.mxu0 }
  0xdc   : > { %v368_v23 = vadd.f32 %v2713_v16, %v367_v21 }
  0xde   : > { %v461_v24 = vmax.f32 %v368_v23, 0.0  ;;  %414 = vmatmul.f32.gmra.mxu0 %v312_v22 }
  0xe0   : > { %567 = vmatmul.f32.gmra.mxu1 %v461_v24  ;;  %680 = vmatmul.f32.gmra.mxu2 %v461_v24 }
  0xe1   : > { %793 = vmatmul.f32.gmra.mxu3 %v461_v24 }
  0xe3   : > { %v370_v25 = vpop.f32.mrf.mxu0 }
  0xe4   : > { %v371_v27 = vadd.f32 %v2713_v16, %v370_v25  ;;  %v2758_v25 = vperm.slane %v540_v18, 1 }
  0xe6   : > { %v462_v28 = vmax.f32 %v371_v27, 0.0  ;;  %417 = vmatmul.f32.gmra.mxu0 %v313_v26  ;;  %v2760_v26 = vperm.slane %v540_v18, 2 }
  0xe8   : > { %570 = vmatmul.f32.gmra.mxu1 %v462_v28  ;;  %683 = vmatmul.f32.gmra.mxu2 %v462_v28 }
  0xe9   : > { %796 = vmatmul.f32.gmra.mxu3 %v462_v28 }
  0xeb   : > { %v373_v29 = vpop.f32.mrf.mxu0 }
  0xec   : > { %v374_v31 = vadd.f32 %v2713_v16, %v373_v29 }
  0xee   : > { %v463_v32 = vmax.f32 %v374_v31, 0.0  ;;  %420 = vmatmul.f32.gmra.mxu0 %v314_v30 }
  0xf0   : > { %573 = vmatmul.f32.gmra.mxu1 %v463_v32  ;;  %686 = vmatmul.f32.gmra.mxu2 %v463_v32 }
  0xf1   : > { %799 = vmatmul.f32.gmra.mxu3 %v463_v32 }
  0xf3   : > { %v376_v33 = vpop.f32.mrf.mxu0 }
  0xf4   : > { %v377_v35 = vadd.f32 %v2713_v16, %v376_v33 }
  0xf6   : > { %v464_v36 = vmax.f32 %v377_v35, 0.0  ;;  %423 = vmatmul.f32.gmra.mxu0 %v315_v34 }
  0xf8   : > { %576 = vmatmul.f32.gmra.mxu1 %v464_v36  ;;  %689 = vmatmul.f32.gmra.mxu2 %v464_v36 }
  0xf9   : > { %802 = vmatmul.f32.gmra.mxu3 %v464_v36 }
  0xfb   : > { %v379_v37 = vpop.f32.mrf.mxu0 }
  0xfc   : > { %v380_v39 = vadd.f32 %v2713_v16, %v379_v37 }
  0xfe   : > { %v465_v40 = vmax.f32 %v380_v39, 0.0  ;;  %426 = vmatmul.f32.gmra.mxu0 %v316_v38 }
 0x100   : > { %579 = vmatmul.f32.gmra.mxu1 %v465_v40  ;;  %692 = vmatmul.f32.gmra.mxu2 %v465_v40 }
 0x101   : > { %805 = vmatmul.f32.gmra.mxu3 %v465_v40 }
 0x103   : > { %v382_v41 = vpop.f32.mrf.mxu0 }
 0x104   : > { %v383_v43 = vadd.f32 %v2713_v16, %v382_v41 }
 0x106   : > { %v466_v44 = vmax.f32 %v383_v43, 0.0  ;;  %429 = vmatmul.f32.gmra.mxu0 %v317_v42 }
 0x108   : > { %582 = vmatmul.f32.gmra.mxu1 %v466_v44  ;;  %695 = vmatmul.f32.gmra.mxu2 %v466_v44 }
 0x109   : > { %808 = vmatmul.f32.gmra.mxu3 %v466_v44 }
 0x10b   : > { %v385_v45 = vpop.f32.mrf.mxu0 }
 0x10c   : > { %v386_v47 = vadd.f32 %v2713_v16, %v385_v45 }
 0x10e   : > { %v467_v48 = vmax.f32 %v386_v47, 0.0  ;;  %432 = vmatmul.f32.gmra.mxu0 %v318_v46 }
 0x110   : > { %585 = vmatmul.f32.gmra.mxu1 %v467_v48  ;;  %698 = vmatmul.f32.gmra.mxu2 %v467_v48 }
 0x111   : > { %811 = vmatmul.f32.gmra.mxu3 %v467_v48 }
 0x113   : > { %v388_v49 = vpop.f32.mrf.mxu0 }
 0x114   : > { %v389_v51 = vadd.f32 %v2713_v16, %v388_v49 }
 0x116   : > { %v468_v52 = vmax.f32 %v389_v51, 0.0  ;;  %435 = vmatmul.f32.gmra.mxu0 %v319_v50 }
 0x118   : > { %588 = vmatmul.f32.gmra.mxu1 %v468_v52  ;;  %701 = vmatmul.f32.gmra.mxu2 %v468_v52 }
 0x119   : > { %814 = vmatmul.f32.gmra.mxu3 %v468_v52 }
 0x11b   : > { %v391_v53 = vpop.f32.mrf.mxu0 }
 0x11c   : > { %v392_v55 = vadd.f32 %v2713_v16, %v391_v53 }
 0x11e   : > { %v469_v56 = vmax.f32 %v392_v55, 0.0  ;;  %438 = vmatmul.f32.gmra.mxu0 %v320_v54 }
 0x120   : > { %591 = vmatmul.f32.gmra.mxu1 %v469_v56  ;;  %704 = vmatmul.f32.gmra.mxu2 %v469_v56 }
 0x121   : > { %817 = vmatmul.f32.gmra.mxu3 %v469_v56 }
 0x123   : > { %v394_v57 = vpop.f32.mrf.mxu0 }
 0x124   : > { %v395_v59 = vadd.f32 %v2713_v16, %v394_v57 }
 0x126   : > { %v470_v60 = vmax.f32 %v395_v59, 0.0  ;;  %441 = vmatmul.f32.gmra.mxu0 %v321_v58 }
 0x128   : > { %594 = vmatmul.f32.gmra.mxu1 %v470_v60  ;;  %707 = vmatmul.f32.gmra.mxu2 %v470_v60 }
 0x129   : > { %820 = vmatmul.f32.gmra.mxu3 %v470_v60 }
 0x12b   : > { %v397_v61 = vpop.f32.mrf.mxu0 }
 0x12c   : > { %v398_v63 = vadd.f32 %v2713_v16, %v397_v61 }
 0x12e   : > { %v471_v0 = vmax.f32 %v398_v63, 0.0  ;;  %444 = vmatmul.f32.gmra.mxu0 %v322_v62 }
 0x130   : > { %597 = vmatmul.f32.gmra.mxu1 %v471_v0  ;;  %710 = vmatmul.f32.gmra.mxu2 %v471_v0 }
 0x131   : > { %823 = vmatmul.f32.gmra.mxu3 %v471_v0 }
 0x133   : > { %v400_v1 = vpop.f32.mrf.mxu0 }
 0x134   : > { %v401_v3 = vadd.f32 %v2713_v16, %v400_v1 }
 0x136   : > { %v472_v4 = vmax.f32 %v401_v3, 0.0  ;;  %447 = vmatmul.f32.gmra.mxu0 %v323_v2 }
 0x138   : > { %600 = vmatmul.f32.gmra.mxu1 %v472_v4  ;;  %713 = vmatmul.f32.gmra.mxu2 %v472_v4 }
 0x139   : > { %826 = vmatmul.f32.gmra.mxu3 %v472_v4 }
 0x13b   : > { %v403_v5 = vpop.f32.mrf.mxu0 }
 0x13c   : > { %v404_v7 = vadd.f32 %v2713_v16, %v403_v5 }
 0x13e   : > { %v473_v8 = vmax.f32 %v404_v7, 0.0  ;;  %450 = vmatmul.f32.gmra.mxu0 %v324_v6 }
 0x140   : > { %603 = vmatmul.f32.gmra.mxu1 %v473_v8  ;;  %716 = vmatmul.f32.gmra.mxu2 %v473_v8 }
 0x141   : > { %829 = vmatmul.f32.gmra.mxu3 %v473_v8 }
 0x143   : > { %v406_v9 = vpop.f32.mrf.mxu0 }
 0x144   : > { %v407_v11 = vadd.f32 %v2713_v16, %v406_v9 }
 0x146   : > { %v474_v12 = vmax.f32 %v407_v11, 0.0  ;;  %453 = vmatmul.f32.gmra.mxu0 %v325_v10 }
 0x148   : > { %606 = vmatmul.f32.gmra.mxu1 %v474_v12  ;;  %719 = vmatmul.f32.gmra.mxu2 %v474_v12 }
 0x149   : > { %832 = vmatmul.f32.gmra.mxu3 %v474_v12 }
 0x14b   : > { %v409_v13 = vpop.f32.mrf.mxu0 }
 0x14c   : > { %v410_v15 = vadd.f32 %v2713_v16, %v409_v13 }
 0x14e   : > { %v475_v17 = vmax.f32 %v410_v15, 0.0  ;;  %456 = vmatmul.f32.gmra.mxu0 %v326_v14 }
 0x150   : > { %609 = vmatmul.f32.gmra.mxu1 %v475_v17  ;;  %722 = vmatmul.f32.gmra.mxu2 %v475_v17 }
 0x151   : > { %835 = vmatmul.f32.gmra.mxu3 %v475_v17 }
 0x153   : > { %v412_v20 = vpop.f32.mrf.mxu0 }
 0x154   : > { %v413_v21 = vadd.f32 %v2713_v16, %v412_v20 }
 0x155   : > { %v565_v22 = vpop.f32.mrf.mxu1 }
 0x156   : > { %v476_v23 = vmax.f32 %v413_v21, 0.0  ;;  %v566_v24 = vadd.f32 %v565_v22, %v2751_v19 }
 0x158   : > { %1815 = vst [vmem:[%s2755_s23] sm:$0xff] %v566_v24  ;;  %612 = vmatmul.f32.gmra.mxu1 %v476_v23  ;;  %725 = vmatmul.f32.gmra.mxu2 %v476_v23 }
 0x159   : > { %838 = vmatmul.f32.gmra.mxu3 %v476_v23 }
 0x15b   : > { %v415_v27 = vpop.f32.mrf.mxu0  ;;  %v678_v28 = vpop.f32.mrf.mxu2 }
 0x15c   : > { %v416_v29 = vadd.f32 %v2713_v16, %v415_v27  ;;  %v2764_v30 = vadd.f32 %v678_v28, %v2758_v25  ;;  %v791_v31 = vpop.f32.mrf.mxu3 }
 0x15d   : > { %v792_v32 = vadd.f32 %v791_v31, %v2760_v26  ;;  %v568_v33 = vpop.f32.mrf.mxu1 }
 0x15e   : > { %v477_v34 = vmax.f32 %v416_v29, 0.0  ;;  %v919_v35 = vmin.f32 %v2764_v30, 20.0  ;;  %v569_v36 = vadd.f32 %v568_v33, %v2751_v19  ;;  %vm887_vm1 = vcmp.gt.f32.partialorder %v2764_v30, 20.0 }
 0x15f   : > { %1879 = vst [vmem:[%s2755_s23 + $0x10] sm:$0xff] %v792_v32 }
 0x160   : > { %v951_v37 = vmul.f32 1.442695, %v919_v35  ;;  %1816 = vst [vmem:[%s2755_s23 + $0x18] sm:$0xff] %v569_v36  ;;  %615 = vmatmul.f32.gmra.mxu1 %v477_v34  ;;  %728 = vmatmul.f32.gmra.mxu2 %v477_v34 }
 0x161   : > { %841 = vmatmul.f32.gmra.mxu3 %v477_v34 }
 0x162   : > { %2136 = vpow2.f32 %v951_v37 }
 0x163   : > { %v418_v38 = vpop.f32.mrf.mxu0  ;;  %v681_v39 = vpop.f32.mrf.mxu2 }
 0x164   : > { %v419_v40 = vadd.f32 %v2713_v16, %v418_v38  ;;  %v2773_v41 = vadd.f32 %v681_v39, %v2758_v25  ;;  %v794_v42 = vpop.f32.mrf.mxu3 }
 0x165   : > { %v795_v43 = vadd.f32 %v794_v42, %v2760_v26  ;;  %v571_v44 = vpop.f32.mrf.mxu1 }
 0x166   : > { %v478_v45 = vmax.f32 %v419_v40, 0.0  ;;  %v920_v46 = vmin.f32 %v2773_v41, 20.0  ;;  %v572_v47 = vadd.f32 %v571_v44, %v2751_v19  ;;  %vm888_vm2 = vcmp.gt.f32.partialorder %v2773_v41, 20.0 }
 0x167   : > { %1880 = vst [vmem:[%s2755_s23 + $0x28] sm:$0xff] %v795_v43 }
 0x168   : > { %v2137_v48 = vpop.eup %2136  ;;  %v953_v49 = vmul.f32 1.442695, %v920_v46  ;;  %1817 = vst [vmem:[%s2755_s23 + $0x30] sm:$0xff] %v572_v47  ;;  %618 = vmatmul.f32.gmra.mxu1 %v478_v45  ;;  %731 = vmatmul.f32.gmra.mxu2 %v478_v45 }
 0x169   : > { %v1015_v50 = vadd.f32 1.0, %v2137_v48  ;;  %844 = vmatmul.f32.gmra.mxu3 %v478_v45  ;;  %v1018_v51 = vmul.f32 -0.5, %v2137_v48  ;;  %v1021_v63 = vand.u32 2147483647, %v2137_v48 }
 0x16a   : > { %2138 = vpow2.f32 %v953_v49 }
 0x16b   : > { %2140 = vlog2.f32 %v1015_v50  ;;  %v421_v52 = vpop.f32.mrf.mxu0  ;;  %v684_v53 = vpop.f32.mrf.mxu2  ;;  %v1019_v59 = vadd.f32 1.0, %v1018_v51  ;;  %vm1022_vm0 = vcmp.lt.f32.partialorder %v1021_v63, 0.0004427343 }
 0x16c   : > { %v422_v54 = vadd.f32 %v2713_v16, %v421_v52  ;;  %v2782_v55 = vadd.f32 %v684_v53, %v2758_v25  ;;  %v797_v56 = vpop.f32.mrf.mxu3 }
 0x16d   : > { %v798_v57 = vadd.f32 %v797_v56, %v2760_v26  ;;  %v574_v58 = vpop.f32.mrf.mxu1  ;;  %v1020_v5 = vmul.f32 %v2137_v48, %v1019_v59 }
 0x16e   : > { %v479_v60 = vmax.f32 %v422_v54, 0.0  ;;  %v921_v61 = vmin.f32 %v2782_v55, 20.0  ;;  %v575_v62 = vadd.f32 %v574_v58, %v2751_v19  ;;  %vm889_vm4 = vcmp.gt.f32.partialorder %v2782_v55, 20.0 }
 0x16f   : > { %1881 = vst [vmem:[%s2755_s23 + $0x40] sm:$0xff] %v798_v57 }
 0x170   : > { %v2139_v0 = vpop.eup %2138  ;;  %v955_v1 = vmul.f32 1.442695, %v921_v61  ;;  %1818 = vst [vmem:[%s2755_s23 + $0x48] sm:$0xff] %v575_v62  ;;  %621 = vmatmul.f32.gmra.mxu1 %v479_v60  ;;  %734 = vmatmul.f32.gmra.mxu2 %v479_v60 }
 0x171   : > { %v2141_v2 = vpop.eup %2140  ;;  %v1024_v3 = vadd.f32 1.0, %v2139_v0  ;;  %847 = vmatmul.f32.gmra.mxu3 %v479_v60  ;;  %v1027_v6 = vmul.f32 -0.5, %v2139_v0  ;;  %v1030_v22 = vand.u32 2147483647, %v2139_v0 }
 0x172   : > { %v1017_v4 = vmul.f32 0.6931472, %v2141_v2  ;;  %2142 = vpow2.f32 %v955_v1 }
 0x173   : > { %2144 = vlog2.f32 %v1024_v3  ;;  %v424_v7 = vpop.f32.mrf.mxu0  ;;  %v687_v8 = vpop.f32.mrf.mxu2  ;;  %v1028_v18 = vadd.f32 1.0, %v1027_v6  ;;  %vm1031_vm3 = vcmp.lt.f32.partialorder %v1030_v22, 0.0004427343 }
 0x174   : > { %v1023_v9 = vsel %vm1022_vm0, %v1020_v5, %v1017_v4  ;;  %v425_v10 = vadd.f32 %v2713_v16, %v424_v7  ;;  %v2792_v11 = vadd.f32 %v687_v8, %v2758_v25  ;;  %v800_v12 = vpop.f32.mrf.mxu3 }
 0x175   : > { %v1303_v13 = vsel %vm887_vm1, %v2764_v30, %v1023_v9  ;;  %v801_v14 = vadd.f32 %v800_v12, %v2760_v26  ;;  %v577_v15 = vpop.f32.mrf.mxu1  ;;  %v1029_v31 = vmul.f32 %v2139_v0, %v1028_v18 }
 0x176   : > { %v2796_v17 = vadd.f32 1e-08, %v1303_v13  ;;  %v480_v20 = vmax.f32 %v425_v10, 0.0  ;;  %v922_v21 = vmin.f32 %v2792_v11, 20.0  ;;  %v578_v23 = vadd.f32 %v577_v15, %v2751_v19 }
 0x177   : > { %1882 = vst [vmem:[%s2755_s23 + $0x58] sm:$0xff] %v801_v14  ;;  %vm890_vm9 = vcmp.gt.f32.partialorder %v2792_v11, 20.0 }
 0x178   : > { %v2143_v24 = vpop.eup %2142  ;;  %2146 = vrsqrt.f32 %v2796_v17  ;;  %624 = vmatmul.f32.gmra.mxu1 %v480_v20  ;;  %737 = vmatmul.f32.gmra.mxu2 %v480_v20  ;;  %v957_v29 = vmul.f32 1.442695, %v922_v21  ;;  %1819 = vst [vmem:[%s2755_s23 + $0x60] sm:$0xff] %v578_v23  ;;  %vm1374_vm6 = vcmp.eq.f32.partialorder %v2796_v17, inf  ;;  %vm1376_vm7 = vcmp.eq.f32.partialorder %v2796_v17, 0.0 }
 0x179   : > { %v2145_v27 = vpop.eup %2144  ;;  %v1033_v28 = vadd.f32 1.0, %v2143_v24  ;;  %850 = vmatmul.f32.gmra.mxu3 %v480_v20  ;;  %v1036_v32 = vmul.f32 -0.5, %v2143_v24  ;;  %v1039_v49 = vand.u32 2147483647, %v2143_v24  ;;  %v1377_v21 = vand.u32 2147483648, %v2796_v17 }
 0x17a   : > { %v1026_v30 = vmul.f32 0.6931472, %v2145_v27 }
 0x17b   : > { %2148 = vlog2.f32 %v1033_v28  ;;  %v427_v33 = vpop.f32.mrf.mxu0  ;;  %v690_v34 = vpop.f32.mrf.mxu2  ;;  %v1037_v45 = vadd.f32 1.0, %v1036_v32  ;;  %vm1040_vm5 = vcmp.lt.f32.partialorder %v1039_v49, 0.0004427343 }
 0x17c   : > { %v1032_v35 = vsel %vm1031_vm3, %v1029_v31, %v1026_v30  ;;  %2150 = vpow2.f32 %v957_v29  ;;  %v428_v36 = vadd.f32 %v2713_v16, %v427_v33  ;;  %v2806_v37 = vadd.f32 %v690_v34, %v2758_v25  ;;  %v803_v38 = vpop.f32.mrf.mxu3 }
 0x17d   : > { %v1304_v39 = vsel %vm888_vm2, %v2773_v41, %v1032_v35  ;;  %v804_v40 = vadd.f32 %v803_v38, %v2760_v26  ;;  %v580_v42 = vpop.f32.mrf.mxu1  ;;  %v1038_v56 = vmul.f32 %v2143_v24, %v1037_v45 }
 0x17e   : > { %v2147_v43 = vpop.eup %2146  ;;  %v2810_v44 = vadd.f32 1e-08, %v1304_v39  ;;  %v481_v46 = vmax.f32 %v428_v36, 0.0  ;;  %v923_v47 = vmin.f32 %v2806_v37, 20.0  ;;  %v581_v50 = vadd.f32 %v580_v42, %v2751_v19 }
 0x17f   : > { %v1368_v48 = vmul.f32 %v2147_v43, %v2796_v17  ;;  %1883 = vst [vmem:[%s2755_s23 + $0x70] sm:$0xff] %v804_v40  ;;  %vm891_vm13 = vcmp.gt.f32.partialorder %v2806_v37, 20.0 }
 0x180   : > { %2152 = vrsqrt.f32 %v2810_v44  ;;  %627 = vmatmul.f32.gmra.mxu1 %v481_v46  ;;  %740 = vmatmul.f32.gmra.mxu2 %v481_v46  ;;  %v959_v52 = vmul.f32 1.442695, %v923_v47  ;;  %1820 = vst [vmem:[%s2755_s23 + $0x78] sm:$0xff] %v581_v50  ;;  %vm1386_vm10 = vcmp.eq.f32.partialorder %v2810_v44, inf  ;;  %vm1388_vm11 = vcmp.eq.f32.partialorder %v2810_v44, 0.0 }
 0x181   : > { %v2149_v41 = vpop.eup %2148  ;;  %v1369_v51 = vmul.f32 %v2147_v43, %v1368_v48  ;;  %853 = vmatmul.f32.gmra.mxu3 %v481_v46 }
 0x182   : > { %v2151_v53 = vpop.eup %2150  ;;  %v1035_v54 = vmul.f32 0.6931472, %v2149_v41  ;;  %2154 = vpow2.f32 %v959_v52 }
 0x183   : > { %v1370_v57 = vmul.f32 0.5, %v1369_v51  ;;  %v1042_v58 = vadd.f32 1.0, %v2151_v53  ;;  %v1045_v59 = vmul.f32 -0.5, %v2151_v53  ;;  %v430_v60 = vpop.f32.mrf.mxu0  ;;  %v693_v61 = vpop.f32.mrf.mxu2  ;;  %v1048_v13 = vand.u32 2147483647, %v2151_v53 }
 0x184   : > { %v1041_v62 = vsel %vm1040_vm5, %v1038_v56, %v1035_v54  ;;  %v431_v63 = vadd.f32 %v2713_v16, %v430_v60  ;;  %v2821_v0 = vadd.f32 %v693_v61, %v2758_v25  ;;  %v806_v1 = vpop.f32.mrf.mxu3 }
 0x185   : > { %v1371_v2 = vsub.f32 1.5, %v1370_v57  ;;  %v1305_v3 = vsel %vm889_vm4, %v2782_v55, %v1041_v62  ;;  %2156 = vlog2.f32 %v1042_v58  ;;  %v583_v4 = vpop.f32.mrf.mxu1  ;;  %v1046_v10 = vadd.f32 1.0, %v1045_v59 }
 0x186   : > { %v2153_v5 = vpop.eup %2152  ;;  %v2824_v6 = vadd.f32 1e-08, %v1305_v3  ;;  %v482_v7 = vmax.f32 %v431_v63, 0.0  ;;  %v924_v12 = vmin.f32 %v2821_v0, 20.0  ;;  %v807_v18 = vadd.f32 %v806_v1, %v2760_v26 }
 0x187   : > { %v1372_v8 = vmul.f32 %v2147_v43, %v1371_v2  ;;  %v1380_v9 = vmul.f32 %v2153_v5, %v2810_v44  ;;  %v584_v22 = vadd.f32 %v583_v4, %v2751_v19  ;;  %v1047_v28 = vmul.f32 %v2151_v53, %v1046_v10 }
 0x188   : > { %2158 = vrsqrt.f32 %v2824_v6  ;;  %630 = vmatmul.f32.gmra.mxu1 %v482_v7  ;;  %743 = vmatmul.f32.gmra.mxu2 %v482_v7  ;;  %v961_v15 = vmul.f32 1.442695, %v924_v12  ;;  %v2831_v20 = vpop.eup %2154  ;;  %1884 = vst [vmem:[%s2755_s23 + $0x88] sm:$0xff] %v807_v18  ;;  %vm1049_vm8 = vcmp.lt.f32.partialorder %v1048_v13, 0.0004427343  ;;  %vm1398_vm14 = vcmp.eq.f32.partialorder %v2824_v6, inf }
 0x189   : > { %v1373_v55 = vmul.f32 %v1372_v8, %v2796_v17  ;;  %v1381_v14 = vmul.f32 %v2153_v5, %v1380_v9  ;;  %856 = vmatmul.f32.gmra.mxu3 %v482_v7  ;;  %v1051_v29 = vadd.f32 1.0, %v2831_v20  ;;  %v1054_v34 = vmul.f32 -0.5, %v2831_v20  ;;  %1821 = vst [vmem:[%s2755_s23 + $0x90] sm:$0xff] %v584_v22 }
 0x18a   : > { %2160 = vpow2.f32 %v961_v15  ;;  %v1057_v41 = vand.u32 2147483647, %v2831_v20  ;;  %vm1400_vm15 = vcmp.eq.f32.partialorder %v2824_v6, 0.0  ;;  %vm892_vm1 = vcmp.gt.f32.partialorder %v2821_v0, 20.0 }
 0x18b   : > { %v2157_v23 = vpop.eup %2156  ;;  %v1375_v24 = vsel %vm1374_vm6, %v2796_v17, %v1373_v55  ;;  %v1382_v27 = vmul.f32 0.5, %v1381_v14  ;;  %v433_v30 = vpop.f32.mrf.mxu0  ;;  %2162 = vlog2.f32 %v1051_v29  ;;  %v1055_v50 = vadd.f32 1.0, %v1054_v34 }
 0x18c   : > { %v696_v31 = vpop.f32.mrf.mxu2  ;;  %v1378_v32 = vsel %vm1376_vm7, %v1377_v21, %v1375_v24  ;;  %v1044_v33 = vmul.f32 0.6931472, %v2157_v23  ;;  %v809_v35 = vpop.f32.mrf.mxu3  ;;  %v434_v42 = vadd.f32 %v2713_v16, %v433_v30  ;;  %vm1058_vm12 = vcmp.lt.f32.partialorder %v1057_v41, 0.0004427343 }
 0x18d   : > { %v1751_v36 = vmax.f32 %v1378_v32, 1e-05  ;;  %v1383_v38 = vsub.f32 1.5, %v1382_v27  ;;  %v586_v17 = vpop.f32.mrf.mxu1  ;;  %v2845_v43 = vadd.f32 %v696_v31, %v2758_v25  ;;  %v810_v56 = vadd.f32 %v809_v35, %v2760_v26 }
 0x18e   : > { %v2159_v39 = vpop.eup %2158  ;;  %v1050_v40 = vsel %vm1049_vm8, %v1047_v28, %v1044_v33  ;;  %v483_v51 = vmax.f32 %v434_v42, 0.0  ;;  %v1056_v4 = vmul.f32 %v2831_v20, %v1055_v50  ;;  %v587_v12 = vadd.f32 %v586_v17, %v2751_v19 }
 0x18f   : > { %v1783_v45 = vmin.f32 %v1751_v36, 100000.0  ;;  %v1384_v46 = vmul.f32 %v2153_v5, %v1383_v38  ;;  %v1392_v47 = vmul.f32 %v2159_v39, %v2824_v6  ;;  %v1306_v48 = vsel %vm890_vm9, %v2792_v11, %v1050_v40  ;;  %1885 = vst [vmem:[%s2755_s23 + $0xa0] sm:$0xff] %v810_v56 }
 0x190   : > { %v2849_v49 = vadd.f32 1e-08, %v1306_v48  ;;  %v925_v54 = vmin.f32 %v2845_v43, 20.0  ;;  %v2856_v57 = vpop.eup %2160  ;;  %v1389_v11 = vand.u32 2147483648, %v2810_v44  ;;  %633 = vmatmul.f32.gmra.mxu1 %v483_v51  ;;  %746 = vmatmul.f32.gmra.mxu2 %v483_v51  ;;  %1822 = vst [vmem:[%s2755_s23 + $0xa8] sm:$0xff] %v587_v12  ;;  %v1401_v29 = vand.u32 2147483648, %v2824_v6 }
 0x191   : > { %1847 = vst [vmem:[%s2755_s23 + $0x8] sm:$0xff] %v1783_v45  ;;  %v1385_v52 = vmul.f32 %v1384_v46, %v2810_v44  ;;  %v1393_v53 = vmul.f32 %v2159_v39, %v1392_v47  ;;  %v2163_v58 = vpop.eup %2162  ;;  %v1060_v61 = vadd.f32 1.0, %v2856_v57  ;;  %v1063_v62 = vmul.f32 -0.5, %v2856_v57  ;;  %859 = vmatmul.f32.gmra.mxu3 %v483_v51 }
 0x192   : > { %2164 = vrsqrt.f32 %v2849_v49  ;;  %v1053_v3 = vmul.f32 0.6931472, %v2163_v58  ;;  %v963_v5 = vmul.f32 1.442695, %v925_v54  ;;  %vm893_vm2 = vcmp.gt.f32.partialorder %v2845_v43, 20.0 }
 0x193   : > { %v1387_v59 = vsel %vm1386_vm10, %v2810_v44, %v1385_v52  ;;  %v1394_v60 = vmul.f32 0.5, %v1393_v53  ;;  %v436_v63 = vpop.f32.mrf.mxu0  ;;  %2166 = vlog2.f32 %v1060_v61  ;;  %v1064_v15 = vadd.f32 1.0, %v1063_v62 }
 0x194   : > { %v699_v1 = vpop.f32.mrf.mxu2  ;;  %v1390_v2 = vsel %vm1388_vm11, %v1389_v11, %v1387_v59  ;;  %v812_v7 = vpop.f32.mrf.mxu3  ;;  %v1059_v10 = vsel %vm1058_vm12, %v1056_v4, %v1053_v3  ;;  %2168 = vpow2.f32 %v963_v5  ;;  %v437_v21 = vadd.f32 %v2713_v16, %v436_v63 }
 0x195   : > { %v1752_v8 = vmax.f32 %v1390_v2, 1e-05  ;;  %v1395_v9 = vsub.f32 1.5, %v1394_v60  ;;  %v589_v44 = vpop.f32.mrf.mxu1  ;;  %v1307_v14 = vsel %vm891_vm13, %v2806_v37, %v1059_v10  ;;  %v2875_v22 = vadd.f32 %v699_v1, %v2758_v25 }
 0x196   : > { %v2870_v20 = vadd.f32 1e-08, %v1307_v14  ;;  %v813_v23 = vadd.f32 %v812_v7, %v2760_v26  ;;  %v1066_v37 = vand.u32 2147483647, %v2856_v57  ;;  %v590_v28 = vadd.f32 %v589_v44, %v2751_v19 }
 0x197   : > { %v1784_v13 = vmin.f32 %v1752_v8, 100000.0  ;;  %v1396_v55 = vmul.f32 %v2159_v39, %v1395_v9  ;;  %v1065_v33 = vmul.f32 %v2856_v57, %v1064_v15  ;;  %v484_v34 = vmax.f32 %v437_v21, 0.0 }
 0x198   : > { %v2165_v18 = vpop.eup %2164  ;;  %2170 = vrsqrt.f32 %v2870_v20  ;;  %1886 = vst [vmem:[%s2755_s23 + $0xb8] sm:$0xff] %v813_v23  ;;  %v926_v40 = vmin.f32 %v2875_v22, 20.0  ;;  %vm1067_vm0 = vcmp.lt.f32.partialorder %v1066_v37, 0.0004427343  ;;  %vm1410_vm3 = vcmp.eq.f32.partialorder %v2849_v49, inf }
 0x199   : > { %1848 = vst [vmem:[%s2755_s23 + $0x20] sm:$0xff] %v1784_v13  ;;  %v1397_v24 = vmul.f32 %v1396_v55, %v2824_v6  ;;  %v1404_v27 = vmul.f32 %v2165_v18, %v2849_v49  ;;  %v2167_v30 = vpop.eup %2166  ;;  %636 = vmatmul.f32.gmra.mxu1 %v484_v34  ;;  %749 = vmatmul.f32.gmra.mxu2 %v484_v34  ;;  %vm1412_vm4 = vcmp.eq.f32.partialorder %v2849_v49, 0.0  ;;  %v1413_v4 = vand.u32 2147483648, %v2849_v49 }
 0x19a   : > { %1823 = vst [vmem:[%s2755_s23 + $0xc0] sm:$0xff] %v590_v28  ;;  %v2169_v38 = vpop.eup %2168  ;;  %v1062_v39 = vmul.f32 0.6931472, %v2167_v30  ;;  %v965_v51 = vmul.f32 1.442695, %v926_v40  ;;  %862 = vmatmul.f32.gmra.mxu3 %v484_v34  ;;  %vm1422_vm6 = vcmp.eq.f32.partialorder %v2870_v20, inf }
 0x19b   : > { %v1399_v31 = vsel %vm1398_vm14, %v2824_v6, %v1397_v24  ;;  %v1405_v32 = vmul.f32 %v2165_v18, %v1404_v27  ;;  %v439_v35 = vpop.f32.mrf.mxu0  ;;  %v1069_v48 = vadd.f32 1.0, %v2169_v38  ;;  %v1072_v41 = vmul.f32 -0.5, %v2169_v38 }
 0x19c   : > { %v702_v36 = vpop.f32.mrf.mxu2  ;;  %v1402_v17 = vsel %vm1400_vm15, %v1401_v29, %v1399_v31  ;;  %v440_v42 = vadd.f32 %v2713_v16, %v439_v35  ;;  %v815_v45 = vpop.f32.mrf.mxu3  ;;  %v1068_v50 = vsel %vm1067_vm0, %v1065_v33, %v1062_v39  ;;  %v1075_v11 = vand.u32 2147483647, %v2169_v38 }
 0x19d   : > { %v1753_v46 = vmax.f32 %v1402_v17, 1e-05  ;;  %v1406_v47 = vmul.f32 0.5, %v1405_v32  ;;  %v592_v6 = vpop.f32.mrf.mxu1  ;;  %v1308_v54 = vsel %vm892_vm1, %v2821_v0, %v1068_v50  ;;  %2172 = vlog2.f32 %v1069_v48 }
 0x19e   : > { %v2171_v56 = vpop.eup %2170  ;;  %v2895_v57 = vadd.f32 1e-08, %v1308_v54  ;;  %2174 = vpow2.f32 %v965_v51  ;;  %v485_v58 = vmax.f32 %v440_v42, 0.0  ;;  %v2900_v61 = vadd.f32 %v702_v36, %v2758_v25 }
 0x19f   : > { %v1785_v52 = vmin.f32 %v1753_v46, 100000.0  ;;  %v1407_v53 = vsub.f32 1.5, %v1406_v47  ;;  %v1416_v60 = vmul.f32 %v2171_v56, %v2870_v20  ;;  %v816_v62 = vadd.f32 %v815_v45, %v2760_v26 }
 0x1a0   : > { %2176 = vrsqrt.f32 %v2895_v57  ;;  %v1073_v0 = vadd.f32 1.0, %v1072_v41  ;;  %v927_v5 = vmin.f32 %v2900_v61, 20.0  ;;  %v593_v7 = vadd.f32 %v592_v6, %v2751_v19 }
 0x1a1   : > { %1849 = vst [vmem:[%s2755_s23 + $0x38] sm:$0xff] %v1785_v52  ;;  %v1408_v59 = vmul.f32 %v2165_v18, %v1407_v53  ;;  %v1417_v1 = vmul.f32 %v2171_v56, %v1416_v60  ;;  %vm2914_vm5 = vcmp.lt.f32.partialorder %v1075_v11, 0.0004427343  ;;  %639 = vmatmul.f32.gmra.mxu1 %v485_v58  ;;  %752 = vmatmul.f32.gmra.mxu2 %v485_v58  ;;  %vm1424_vm7 = vcmp.eq.f32.partialorder %v2870_v20, 0.0 }
 0x1a2   : > { %1887 = vst [vmem:[%s2755_s23 + $0xd0] sm:$0xff] %v816_v62  ;;  %v1074_v23 = vmul.f32 %v2169_v38, %v1073_v0  ;;  %v967_v24 = vmul.f32 1.442695, %v927_v5  ;;  %865 = vmatmul.f32.gmra.mxu3 %v485_v58  ;;  %vm894_vm8 = vcmp.gt.f32.partialorder %v2875_v22, 20.0  ;;  %vm1434_vm9 = vcmp.eq.f32.partialorder %v2895_v57, inf }
 0x1a3   : > { %v1409_v63 = vmul.f32 %v1408_v59, %v2849_v49  ;;  %v442_v2 = vpop.f32.mrf.mxu0  ;;  %v2173_v44 = vpop.eup %2172  ;;  %v1418_v12 = vmul.f32 0.5, %v1417_v1  ;;  %1824 = vst [vmem:[%s2755_s23 + $0xd8] sm:$0xff] %v593_v7  ;;  %vm1436_vm10 = vcmp.eq.f32.partialorder %v2895_v57, 0.0  ;;  %vm895_vm13 = vcmp.gt.f32.partialorder %v2900_v61, 20.0 }
 0x1a4   : > { %v705_v3 = vpop.f32.mrf.mxu2  ;;  %v443_v8 = vadd.f32 %v2713_v16, %v442_v2  ;;  %v818_v9 = vpop.f32.mrf.mxu3  ;;  %v1071_v21 = vmul.f32 0.6931472, %v2173_v44  ;;  %2178 = vpow2.f32 %v967_v24 }
 0x1a5   : > { %v1411_v10 = vsel %vm1410_vm3, %v2849_v49, %v1409_v63  ;;  %v819_v55 = vadd.f32 %v818_v9, %v2760_v26  ;;  %v595_v14 = vpop.f32.mrf.mxu1  ;;  %v2919_v15 = vpop.eup %2174  ;;  %v1419_v37 = vsub.f32 1.5, %v1418_v12  ;;  %v2926_v29 = vadd.f32 %v705_v3, %v2758_v25 }
 0x1a6   : > { %v1414_v18 = vsel %vm1412_vm4, %v1413_v4, %v1411_v10  ;;  %v1078_v28 = vadd.f32 1.0, %v2919_v15  ;;  %v2177_v30 = vpop.eup %2176  ;;  %v1077_v31 = vsel %vm2914_vm5, %v1074_v23, %v1071_v21  ;;  %v1081_v49 = vmul.f32 -0.5, %v2919_v15 }
 0x1a7   : > { %v1754_v27 = vmax.f32 %v1414_v18, 1e-05  ;;  %1888 = vst [vmem:[%s2755_s23 + $0xe8] sm:$0xff] %v819_v55  ;;  %v486_v32 = vmax.f32 %v443_v8, 0.0  ;;  %v1420_v34 = vmul.f32 %v2171_v56, %v1419_v37  ;;  %v1428_v35 = vmul.f32 %v2177_v30, %v2895_v57  ;;  %v2978_v37 = vld [vmem:[#allocation7] ss:$0 sm:$0xff] }
 0x1a8   : > { %v1309_v36 = vsel %vm893_vm2, %v2845_v43, %v1077_v31  ;;  %2180 = vlog2.f32 %v1078_v28  ;;  %v928_v40 = vmin.f32 %v2926_v29, 20.0  ;;  %v596_v42 = vadd.f32 %v595_v14, %v2751_v19 }
 0x1a9   : > { %v1786_v33 = vmin.f32 %v1754_v27, 100000.0  ;;  %v2938_v38 = vadd.f32 1e-08, %v1309_v36  ;;  %v1421_v17 = vmul.f32 %v1420_v34, %v2870_v20  ;;  %v1429_v39 = vmul.f32 %v2177_v30, %v1428_v35  ;;  %642 = vmatmul.f32.gmra.mxu1 %v486_v32  ;;  %755 = vmatmul.f32.gmra.mxu2 %v486_v32 }
 0x1aa   : > { %v1425_v43 = vand.u32 2147483648, %v2870_v20  ;;  %v1082_v47 = vadd.f32 1.0, %v1081_v49  ;;  %v1084_v41 = vand.u32 2147483647, %v2919_v15  ;;  %v969_v51 = vmul.f32 1.442695, %v928_v40  ;;  %v2179_v53 = vpop.eup %2178  ;;  %868 = vmatmul.f32.gmra.mxu3 %v486_v32 }
 0x1ab   : > { %1850 = vst [vmem:[%s2755_s23 + $0x50] sm:$0xff] %v1786_v33  ;;  %v445_v45 = vpop.f32.mrf.mxu0  ;;  %2182 = vrsqrt.f32 %v2938_v38  ;;  %v1423_v6 = vsel %vm1422_vm6, %v2870_v20, %v1421_v17  ;;  %v1430_v50 = vmul.f32 0.5, %v1429_v39  ;;  %v1087_v62 = vadd.f32 1.0, %v2179_v53 }
 0x1ac   : > { %v708_v46 = vpop.f32.mrf.mxu2  ;;  %v821_v48 = vpop.f32.mrf.mxu3  ;;  %1825 = vst [vmem:[%s2755_s23 + $0xf0] sm:$0xff] %v596_v42  ;;  %v1426_v54 = vsel %vm1424_vm7, %v1425_v43, %v1423_v6  ;;  %v446_v56 = vadd.f32 %v2713_v16, %v445_v45  ;;  %v1083_v63 = vmul.f32 %v2919_v15, %v1082_v47  ;;  %v1090_v1 = vmul.f32 -0.5, %v2179_v53 }
 0x1ad   : > { %v598_v52 = vpop.f32.mrf.mxu1  ;;  %v2956_v11 = vadd.f32 %v708_v46, %v2758_v25  ;;  %v822_v58 = vadd.f32 %v821_v48, %v2760_v26  ;;  %v1755_v59 = vmax.f32 %v1426_v54, 1e-05  ;;  %v1431_v60 = vsub.f32 1.5, %v1430_v50 }
 0x1ae   : > { %v2181_v0 = vpop.eup %2180  ;;  %2184 = vpow2.f32 %v969_v51  ;;  %v487_v20 = vmax.f32 %v446_v56, 0.0  ;;  %vm1085_vm11 = vcmp.lt.f32.partialorder %v1084_v41, 0.0004427343  ;;  %v599_v7 = vadd.f32 %v598_v52, %v2751_v19 }
 0x1af   : > { %1889 = vst [vmem:[%s2755_s23 + $0x100] sm:$0xff] %v822_v58  ;;  %v1787_v2 = vmin.f32 %v1755_v59, 100000.0  ;;  %v1432_v16 = vmul.f32 %v2177_v30, %v1431_v60  ;;  %v1080_v3 = vmul.f32 0.6931472, %v2181_v0  ;;  %2186 = vlog2.f32 %v1087_v62 }
 0x1b0   : > { %v929_v5 = vmin.f32 %v2956_v11, 20.0  ;;  %v1437_v9 = vand.u32 2147483648, %v2895_v57  ;;  %v1091_v14 = vadd.f32 1.0, %v1090_v1  ;;  %v1093_v15 = vand.u32 2147483647, %v2179_v53  ;;  %1826 = vst [vmem:[%s2755_s23 + $0x108] sm:$0xff] %v599_v7 }
 0x1b1   : > { %v2183_v4 = vpop.eup %2182  ;;  %1851 = vst [vmem:[%s2755_s23 + $0x68] sm:$0xff] %v1787_v2  ;;  %v1433_v8 = vmul.f32 %v1432_v16, %v2895_v57  ;;  %v1086_v10 = vsel %vm1085_vm11, %v1083_v63, %v1080_v3  ;;  %645 = vmatmul.f32.gmra.mxu1 %v487_v20  ;;  %758 = vmatmul.f32.gmra.mxu2 %v487_v20  ;;  %vm1446_vm14 = vcmp.eq.f32.partialorder %v2938_v38, inf  ;;  %v1449_v63 = vand.u32 2147483648, %v2938_v38 }
 0x1b2   : > { %v1440_v44 = vmul.f32 %v2183_v4, %v2938_v38  ;;  %v1310_v55 = vsel %vm894_vm8, %v2875_v22, %v1086_v10  ;;  %v971_v18 = vmul.f32 1.442695, %v929_v5  ;;  %871 = vmatmul.f32.gmra.mxu3 %v487_v20  ;;  %v1092_v17 = vmul.f32 %v2179_v53, %v1091_v14 }
 0x1b3   : > { %v448_v12 = vpop.f32.mrf.mxu0  ;;  %v1435_v23 = vsel %vm1434_vm9, %v2895_v57, %v1433_v8  ;;  %v2976_v27 = vadd.f32 1e-08, %v1310_v55  ;;  %vm1094_vm12 = vcmp.lt.f32.partialorder %v1093_v15, 0.0004427343  ;;  %vm1448_vm15 = vcmp.eq.f32.partialorder %v2938_v38, 0.0 }
 0x1b4   : > { %v711_v13 = vpop.f32.mrf.mxu2  ;;  %v824_v21 = vpop.f32.mrf.mxu3  ;;  %v1441_v24 = vmul.f32 %v2183_v4, %v1440_v44  ;;  %v449_v28 = vadd.f32 %v2978_v37, %v448_v12  ;;  %v1438_v31 = vsel %vm1436_vm10, %v1437_v9, %v1435_v23  ;;  %2188 = vpow2.f32 %v971_v18 }
 0x1b5   : > { %v601_v22 = vpop.f32.mrf.mxu1  ;;  %v2185_v30 = vpop.eup %2184  ;;  %v2984_v49 = vadd.f32 %v711_v13, %v2758_v25  ;;  %v825_v32 = vadd.f32 %v824_v21, %v2760_v26  ;;  %v1756_v34 = vmax.f32 %v1438_v31, 1e-05  ;;  %2190 = vrsqrt.f32 %v2976_v27 }
 0x1b6   : > { %v2187_v33 = vpop.eup %2186  ;;  %v1442_v35 = vmul.f32 0.5, %v1441_v24  ;;  %v1096_v39 = vadd.f32 1.0, %v2185_v30  ;;  %v1099_v42 = vmul.f32 -0.5, %v2185_v30  ;;  %v488_v45 = vmax.f32 %v449_v28, 0.0 }
 0x1b7   : > { %v1089_v36 = vmul.f32 0.6931472, %v2187_v33  ;;  %1890 = vst [vmem:[%s2755_s23 + $0x118] sm:$0xff] %v825_v32  ;;  %v1788_v57 = vmin.f32 %v1756_v34, 100000.0  ;;  %v930_v43 = vmin.f32 %v2984_v49, 20.0  ;;  %v602_v54 = vadd.f32 %v601_v22, %v2751_v19 }
 0x1b8   : > { %v1443_v40 = vsub.f32 1.5, %v1442_v35  ;;  %2192 = vlog2.f32 %v1096_v39  ;;  %v1102_v52 = vand.u32 2147483647, %v2185_v30  ;;  %v1100_v60 = vadd.f32 1.0, %v1099_v42 }
 0x1b9   : > { %v1095_v46 = vsel %vm1094_vm12, %v1092_v17, %v1089_v36  ;;  %1852 = vst [vmem:[%s2755_s23 + $0x80] sm:$0xff] %v1788_v57  ;;  %v973_v53 = vmul.f32 1.442695, %v930_v43  ;;  %648 = vmatmul.f32.gmra.mxu1 %v488_v45  ;;  %761 = vmatmul.f32.gmra.mxu2 %v488_v45  ;;  %vm896_vm0 = vcmp.gt.f32.partialorder %v2926_v29, 20.0  ;;  %vm897_vm2 = vcmp.gt.f32.partialorder %v2956_v11, 20.0 }
 0x1ba   : > { %v1444_v47 = vmul.f32 %v2183_v4, %v1443_v40  ;;  %v1311_v48 = vsel %vm895_vm13, %v2900_v61, %v1095_v46  ;;  %v2994_v41 = vpop.eup %2188  ;;  %1827 = vst [vmem:[%s2755_s23 + $0x120] sm:$0xff] %v602_v54  ;;  %874 = vmatmul.f32.gmra.mxu3 %v488_v45  ;;  %vm3012_vm1 = vcmp.lt.f32.partialorder %v1102_v52, 0.0004427343  ;;  %v1101_v9 = vmul.f32 %v2185_v30, %v1100_v60 }
 0x1bb   : > { %v451_v6 = vpop.f32.mrf.mxu0  ;;  %v2996_v51 = vadd.f32 1e-08, %v1311_v48  ;;  %v2191_v58 = vpop.eup %2190  ;;  %v1105_v62 = vadd.f32 1.0, %v2994_v41  ;;  %v1108_v20 = vmul.f32 -0.5, %v2994_v41  ;;  %v1111_v15 = vand.u32 2147483647, %v2994_v41 }
 0x1bc   : > { %v714_v50 = vpop.f32.mrf.mxu2  ;;  %v827_v56 = vpop.f32.mrf.mxu3  ;;  %v1445_v59 = vmul.f32 %v1444_v47, %v2938_v38  ;;  %v452_v61 = vadd.f32 %v2978_v37, %v451_v6  ;;  %v1452_v1 = vmul.f32 %v2191_v58, %v2976_v27  ;;  %vm1458_vm3 = vcmp.eq.f32.partialorder %v2976_v27, inf }
 0x1bd   : > { %v604_v0 = vpop.f32.mrf.mxu1  ;;  %2194 = vrsqrt.f32 %v2996_v51  ;;  %v1109_v12 = vadd.f32 1.0, %v1108_v20  ;;  %v828_v13 = vadd.f32 %v827_v56, %v2760_v26  ;;  %vm1460_vm4 = vcmp.eq.f32.partialorder %v2976_v27, 0.0 }
 0x1be   : > { %v1447_v2 = vsel %vm1446_vm14, %v2938_v38, %v1445_v59  ;;  %2196 = vlog2.f32 %v1105_v62  ;;  %v2193_v16 = vpop.eup %2192  ;;  %v1453_v4 = vmul.f32 %v2191_v58, %v1452_v1  ;;  %v489_v44 = vmax.f32 %v452_v61, 0.0 }
 0x1bf   : > { %v1450_v3 = vsel %vm1448_vm15, %v1449_v63, %v1447_v2  ;;  %2198 = vpow2.f32 %v973_v53  ;;  %v1098_v8 = vmul.f32 0.6931472, %v2193_v16  ;;  %v3017_v38 = vadd.f32 %v714_v50, %v2758_v25  ;;  %1891 = vst [vmem:[%s2755_s23 + $0x130] sm:$0xff] %v828_v13 }
 0x1c0   : > { %v1757_v7 = vmax.f32 %v1450_v3, 1e-05  ;;  %v1454_v10 = vmul.f32 0.5, %v1453_v4  ;;  %v605_v18 = vadd.f32 %v604_v0, %v2751_v19  ;;  %v1110_v39 = vmul.f32 %v2994_v41, %v1109_v12 }
 0x1c1   : > { %v1104_v14 = vsel %vm3012_vm1, %v1101_v9, %v1098_v8  ;;  %v931_v30 = vmin.f32 %v3017_v38, 20.0  ;;  %651 = vmatmul.f32.gmra.mxu1 %v489_v44  ;;  %764 = vmatmul.f32.gmra.mxu2 %v489_v44  ;;  %v1461_v40 = vand.u32 2147483648, %v2976_v27  ;;  %vm1112_vm5 = vcmp.lt.f32.partialorder %v1111_v15, 0.0004427343 }
 0x1c2   : > { %v1789_v55 = vmin.f32 %v1757_v7, 100000.0  ;;  %v1455_v28 = vsub.f32 1.5, %v1454_v10  ;;  %v1312_v22 = vsel %vm896_vm0, %v2926_v29, %v1104_v14  ;;  %1828 = vst [vmem:[%s2755_s23 + $0x138] sm:$0xff] %v605_v18  ;;  %877 = vmatmul.f32.gmra.mxu3 %v489_v44  ;;  %vm898_vm6 = vcmp.gt.f32.partialorder %v2984_v49, 20.0 }
 0x1c3   : > { %v454_v21 = vpop.f32.mrf.mxu0  ;;  %v2195_v24 = vpop.eup %2194  ;;  %v3034_v34 = vadd.f32 1e-08, %v1312_v22  ;;  %v975_v47 = vmul.f32 1.442695, %v931_v30  ;;  %vm1470_vm7 = vcmp.eq.f32.partialorder %v2996_v51, inf  ;;  %vm1472_vm8 = vcmp.eq.f32.partialorder %v2996_v51, 0.0 }
 0x1c4   : > { %v717_v23 = vpop.f32.mrf.mxu2  ;;  %v830_v31 = vpop.f32.mrf.mxu3  ;;  %1853 = vst [vmem:[%s2755_s23 + $0x98] sm:$0xff] %v1789_v55  ;;  %v1464_v33 = vmul.f32 %v2195_v24, %v2996_v51  ;;  %v1456_v36 = vmul.f32 %v2191_v58, %v1455_v28  ;;  %v455_v57 = vadd.f32 %v2978_v37, %v454_v21  ;;  %v1473_v1 = vand.u32 2147483648, %v2996_v51 }
 0x1c5   : > { %v2197_v32 = vpop.eup %2196  ;;  %v607_v29 = vpop.f32.mrf.mxu1  ;;  %2200 = vrsqrt.f32 %v3034_v34  ;;  %v3050_v41 = vadd.f32 %v717_v23, %v2758_v25  ;;  %v831_v7 = vadd.f32 %v830_v31, %v2760_v26  ;;  %vm1482_vm10 = vcmp.eq.f32.partialorder %v3034_v34, inf }
 0x1c6   : > { %v3036_v35 = vpop.eup %2198  ;;  %v1107_v17 = vmul.f32 0.6931472, %v2197_v32  ;;  %v1465_v42 = vmul.f32 %v2195_v24, %v1464_v33  ;;  %v1457_v45 = vmul.f32 %v1456_v36, %v2976_v27  ;;  %v490_v54 = vmax.f32 %v455_v57, 0.0 }
 0x1c7   : > { %v1114_v43 = vadd.f32 1.0, %v3036_v35  ;;  %v1117_v50 = vmul.f32 -0.5, %v3036_v35  ;;  %v932_v4 = vmin.f32 %v3050_v41, 20.0  ;;  %v608_v8 = vadd.f32 %v607_v29, %v2751_v19  ;;  %1892 = vst [vmem:[%s2755_s23 + $0x148] sm:$0xff] %v831_v7 }
 0x1c8   : > { %v1113_v46 = vsel %vm1112_vm5, %v1110_v39, %v1107_v17  ;;  %v1466_v48 = vmul.f32 0.5, %v1465_v42  ;;  %v1459_v52 = vsel %vm1458_vm3, %v2976_v27, %v1457_v45  ;;  %v1120_v27 = vand.u32 2147483647, %v3036_v35 }
 0x1c9   : > { %v1313_v6 = vsel %vm897_vm2, %v2956_v11, %v1113_v46  ;;  %2202 = vlog2.f32 %v1114_v43  ;;  %v1462_v56 = vsel %vm1460_vm4, %v1461_v40, %v1459_v52  ;;  %v1118_v11 = vadd.f32 1.0, %v1117_v50  ;;  %654 = vmatmul.f32.gmra.mxu1 %v490_v54  ;;  %767 = vmatmul.f32.gmra.mxu2 %v490_v54  ;;  %1829 = vst [vmem:[%s2755_s23 + $0x150] sm:$0xff] %v608_v8 }
 0x1ca   : > { %v3055_v53 = vadd.f32 1e-08, %v1313_v6  ;;  %v1467_v58 = vsub.f32 1.5, %v1466_v48  ;;  %v1758_v60 = vmax.f32 %v1462_v56, 1e-05  ;;  %880 = vmatmul.f32.gmra.mxu3 %v490_v54  ;;  %vm1484_vm11 = vcmp.eq.f32.partialorder %v3034_v34, 0.0 }
 0x1cb   : > { %v457_v62 = vpop.f32.mrf.mxu0  ;;  %v2201_v0 = vpop.eup %2200  ;;  %v1119_v3 = vmul.f32 %v3036_v35, %v1118_v11  ;;  %v977_v12 = vmul.f32 1.442695, %v932_v4  ;;  %vm1121_vm9 = vcmp.lt.f32.partialorder %v1120_v27, 0.0004427343  ;;  %vm899_vm12 = vcmp.gt.f32.partialorder %v3017_v38, 20.0 }
 0x1cc   : > { %v720_v59 = vpop.f32.mrf.mxu2  ;;  %2204 = vrsqrt.f32 %v3055_v53  ;;  %v833_v61 = vpop.f32.mrf.mxu3  ;;  %v1468_v63 = vmul.f32 %v2195_v24, %v1467_v58  ;;  %v1790_v2 = vmin.f32 %v1758_v60, 100000.0  ;;  %v1476_v16 = vmul.f32 %v2201_v0, %v3034_v34 }
 0x1cd   : > { %2206 = vpow2.f32 %v975_v47  ;;  %v610_v20 = vpop.f32.mrf.mxu1  ;;  %v458_v9 = vadd.f32 %v2978_v37, %v457_v62  ;;  %v3074_v13 = vadd.f32 %v720_v59, %v2758_v25  ;;  %v834_v55 = vadd.f32 %v833_v61, %v2760_v26 }
 0x1ce   : > { %v1469_v5 = vmul.f32 %v1468_v63, %v2996_v51  ;;  %1854 = vst [vmem:[%s2755_s23 + $0xb0] sm:$0xff] %v1790_v2  ;;  %v1477_v10 = vmul.f32 %v2201_v0, %v1476_v16  ;;  %v611_v37 = vadd.f32 %v610_v20, %v2751_v19  ;;  %2208 = vpow2.f32 %v977_v12 }
 0x1cf   : > { %v2203_v44 = vpop.eup %2202  ;;  %v491_v18 = vmax.f32 %v458_v9, 0.0  ;;  %v933_v32 = vmin.f32 %v3074_v13, 20.0  ;;  %1893 = vst [vmem:[%s2755_s23 + $0x160] sm:$0xff] %v834_v55  ;;  %vm1494_vm13 = vcmp.eq.f32.partialorder %v3055_v53, inf  ;;  %vm1496_vm14 = vcmp.eq.f32.partialorder %v3055_v53, 0.0 }
 0x1d0   : > { %v1471_v14 = vsel %vm1470_vm7, %v2996_v51, %v1469_v5  ;;  %v1116_v15 = vmul.f32 0.6931472, %v2203_v44  ;;  %v1478_v24 = vmul.f32 0.5, %v1477_v10  ;;  %1830 = vst [vmem:[%s2755_s23 + $0x168] sm:$0xff] %v611_v37  ;;  %v1497_v61 = vand.u32 2147483648, %v3055_v53 }
 0x1d1   : > { %v1474_v23 = vsel %vm1472_vm8, %v1473_v1, %v1471_v14  ;;  %657 = vmatmul.f32.gmra.mxu1 %v491_v18  ;;  %770 = vmatmul.f32.gmra.mxu2 %v491_v18  ;;  %v979_v46 = vmul.f32 1.442695, %v933_v32  ;;  %vm900_vm1 = vcmp.gt.f32.partialorder %v3050_v41, 20.0  ;;  %vm901_vm2 = vcmp.gt.f32.partialorder %v3074_v13, 20.0 }
 0x1d2   : > { %v2205_v21 = vpop.eup %2204  ;;  %v1759_v22 = vmax.f32 %v1474_v23, 1e-05  ;;  %v1122_v31 = vsel %vm1121_vm9, %v1119_v3, %v1116_v15  ;;  %v1479_v29 = vsub.f32 1.5, %v1478_v24  ;;  %883 = vmatmul.f32.gmra.mxu3 %v491_v18 }
 0x1d3   : > { %v2207_v28 = vpop.eup %2206  ;;  %v1488_v30 = vmul.f32 %v2205_v21, %v3055_v53  ;;  %v1314_v51 = vsel %vm898_vm6, %v2984_v49, %v1122_v31  ;;  %v1485_v49 = vand.u32 2147483648, %v3034_v34 }
 0x1d4   : > { %v723_v33 = vpop.f32.mrf.mxu2  ;;  %v1123_v35 = vadd.f32 1.0, %v2207_v28  ;;  %v1126_v36 = vmul.f32 -0.5, %v2207_v28  ;;  %v836_v17 = vpop.f32.mrf.mxu3  ;;  %v1791_v39 = vmin.f32 %v1759_v22, 100000.0  ;;  %v3092_v40 = vadd.f32 1e-08, %v1314_v51 }
 0x1d5   : > { %v1489_v57 = vmul.f32 %v2205_v21, %v1488_v30  ;;  %v613_v42 = vpop.f32.mrf.mxu1  ;;  %v1480_v45 = vmul.f32 %v2201_v0, %v1479_v29  ;;  %v2209_v47 = vpop.eup %2208  ;;  %v1129_v50 = vand.u32 2147483647, %v2207_v28  ;;  %v3107_v11 = vadd.f32 %v723_v33, %v2758_v25 }
 0x1d6   : > { %2210 = vlog2.f32 %v1123_v35  ;;  %1855 = vst [vmem:[%s2755_s23 + $0xc8] sm:$0xff] %v1791_v39  ;;  %v1127_v6 = vadd.f32 1.0, %v1126_v36  ;;  %v1132_v54 = vadd.f32 1.0, %v2209_v47  ;;  %v1135_v56 = vmul.f32 -0.5, %v2209_v47 }
 0x1d7   : > { %v1490_v43 = vmul.f32 0.5, %v1489_v57  ;;  %2212 = vrsqrt.f32 %v3092_v40  ;;  %v1481_v48 = vmul.f32 %v1480_v45, %v3034_v34  ;;  %v837_v59 = vadd.f32 %v836_v17, %v2760_v26 }
 0x1d8   : > { %2214 = vpow2.f32 %v979_v46  ;;  %v1128_v27 = vmul.f32 %v2207_v28, %v1127_v6  ;;  %vm3113_vm15 = vcmp.lt.f32.partialorder %v1129_v50, 0.0004427343  ;;  %v934_v2 = vmin.f32 %v3107_v11, 20.0 }
 0x1d9   : > { %v1491_v52 = vsub.f32 1.5, %v1490_v43  ;;  %v1483_v58 = vsel %vm1482_vm10, %v3034_v34, %v1481_v48  ;;  %2216 = vlog2.f32 %v1132_v54  ;;  %v1138_v5 = vand.u32 2147483647, %v2209_v47  ;;  %1894 = vst [vmem:[%s2755_s23 + $0x178] sm:$0xff] %v837_v59 }
 0x1da   : > { %v1486_v60 = vsel %vm1484_vm11, %v1485_v49, %v1483_v58  ;;  %v614_v7 = vadd.f32 %v613_v42, %v2751_v19  ;;  %v1136_v10 = vadd.f32 1.0, %v1135_v56  ;;  %v981_v12 = vmul.f32 1.442695, %v934_v2 }
 0x1db   : > { %v1492_v62 = vmul.f32 %v2205_v21, %v1491_v52  ;;  %v1760_v1 = vmax.f32 %v1486_v60, 1e-05  ;;  %vm1139_vm0 = vcmp.lt.f32.partialorder %v1138_v5, 0.0004427343  ;;  %vm1506_vm3 = vcmp.eq.f32.partialorder %v3092_v40, inf }
 0x1dc   : > { %v726_v0 = vpop.f32.mrf.mxu2  ;;  %v2211_v63 = vpop.eup %2210  ;;  %1831 = vst [vmem:[%s2755_s23 + $0x180] sm:$0xff] %v614_v7  ;;  %2218 = vpow2.f32 %v981_v12  ;;  %v1137_v51 = vmul.f32 %v2209_v47, %v1136_v10  ;;  %vm1508_vm4 = vcmp.eq.f32.partialorder %v3092_v40, 0.0  ;;  %v1509_v58 = vand.u32 2147483648, %v3092_v40 }
 0x1dd   : > { %v839_v16 = vpop.f32.mrf.mxu3  ;;  %v2213_v3 = vpop.eup %2212  ;;  %v1493_v34 = vmul.f32 %v1492_v62, %v3055_v53  ;;  %v1125_v4 = vmul.f32 0.6931472, %v2211_v63  ;;  %v1792_v9 = vmin.f32 %v1760_v1, 100000.0  ;;  %vm902_vm7 = vcmp.gt.f32.partialorder %v3107_v11, 20.0 }
 0x1de   : > { %v616_v8 = vpop.f32.mrf.mxu1  ;;  %v1500_v44 = vmul.f32 %v2213_v3, %v3092_v40  ;;  %v840_v15 = vadd.f32 %v839_v16, %v2760_v26  ;;  %v2215_v37 = vpop.eup %2214 }
 0x1df   : > { %v1495_v55 = vsel %vm1494_vm13, %v3055_v53, %v1493_v34  ;;  %v1131_v14 = vsel %vm3113_vm15, %v1128_v27, %v1125_v4  ;;  %v617_v18 = vadd.f32 %v616_v8, %v2751_v19  ;;  %1856 = vst [vmem:[%s2755_s23 + $0xe0] sm:$0xff] %v1792_v9  ;;  %v2217_v28 = vpop.eup %2216  ;;  %v1141_v31 = vadd.f32 1.0, %v2215_v37 }
 0x1e0   : > { %v1498_v21 = vsel %vm1496_vm14, %v1497_v61, %v1495_v55  ;;  %v1501_v23 = vmul.f32 %v2213_v3, %v1500_v44  ;;  %v1315_v24 = vsel %vm899_vm12, %v3017_v38, %v1131_v14  ;;  %v1144_v32 = vmul.f32 -0.5, %v2215_v37  ;;  %1895 = vst [vmem:[%s2755_s23 + $0x190] sm:$0xff] %v840_v15 }
 0x1e1   : > { %v1761_v22 = vmax.f32 %v1498_v21, 1e-05  ;;  %v3136_v30 = vadd.f32 1e-08, %v1315_v24  ;;  %v1134_v29 = vmul.f32 0.6931472, %v2217_v28  ;;  %v3139_v53 = vadd.f32 %v726_v0, %v2758_v25 }
 0x1e2   : > { %v1502_v33 = vmul.f32 0.5, %v1501_v23  ;;  %1832 = vst [vmem:[%s2755_s23 + $0x198] sm:$0xff] %v617_v18  ;;  %v1145_v42 = vadd.f32 1.0, %v1144_v32  ;;  %v1147_v45 = vand.u32 2147483647, %v2215_v37  ;;  %v2219_v49 = vpop.eup %2218 }
 0x1e3   : > { %v1793_v35 = vmin.f32 %v1761_v22, 100000.0  ;;  %2220 = vrsqrt.f32 %v3136_v30  ;;  %v1140_v17 = vsel %vm1139_vm0, %v1137_v51, %v1134_v29  ;;  %v935_v48 = vmin.f32 %v3139_v53, 20.0 }
 0x1e4   : > { %v729_v38 = vpop.f32.mrf.mxu2  ;;  %v1503_v36 = vsub.f32 1.5, %v1502_v33  ;;  %2222 = vlog2.f32 %v1141_v31  ;;  %v1316_v57 = vsel %vm900_vm1, %v3050_v41, %v1140_v17  ;;  %v1150_v50 = vadd.f32 1.0, %v2219_v49 }
 0x1e5   : > { %v842_v39 = vpop.f32.mrf.mxu3  ;;  %1857 = vst [vmem:[%s2755_s23 + $0xf8] sm:$0xff] %v1793_v35  ;;  %v3147_v47 = vadd.f32 1e-08, %v1316_v57  ;;  %v1153_v52 = vmul.f32 -0.5, %v2219_v49  ;;  %v3153_v54 = vadd.f32 %v729_v38, %v2758_v25  ;;  %v1146_v59 = vmul.f32 %v2215_v37, %v1145_v42 }
 0x1e6   : > { %v619_v46 = vpop.f32.mrf.mxu1  ;;  %v1504_v43 = vmul.f32 %v2213_v3, %v1503_v36  ;;  %v843_v6 = vadd.f32 %v842_v39, %v2760_v26  ;;  %vm3161_vm5 = vcmp.lt.f32.partialorder %v1147_v45, 0.0004427343  ;;  %v1156_v63 = vand.u32 2147483647, %v2219_v49 }
 0x1e7   : > { %2224 = vrsqrt.f32 %v3147_v47  ;;  %v983_v1 = vmul.f32 1.442695, %v935_v48  ;;  %v1154_v2 = vadd.f32 1.0, %v1153_v52  ;;  %v936_v16 = vmin.f32 %v3153_v54, 20.0 }
 0x1e8   : > { %v1505_v41 = vmul.f32 %v1504_v43, %v3092_v40  ;;  %1896 = vst [vmem:[%s2755_s23 + $0x1a8] sm:$0xff] %v843_v6  ;;  %2226 = vlog2.f32 %v1150_v50  ;;  %v620_v5 = vadd.f32 %v619_v46, %v2751_v19  ;;  %vm1157_vm6 = vcmp.lt.f32.partialorder %v1156_v63, 0.0004427343 }
 0x1e9   : > { %v2221_v56 = vpop.eup %2220  ;;  %2228 = vpow2.f32 %v983_v1  ;;  %v985_v8 = vmul.f32 1.442695, %v936_v16  ;;  %v1155_v22 = vmul.f32 %v2219_v49, %v1154_v2  ;;  %vm1518_vm8 = vcmp.eq.f32.partialorder %v3136_v30, inf }
 0x1ea   : > { %v2223_v62 = vpop.eup %2222  ;;  %v1507_v61 = vsel %vm1506_vm3, %v3092_v40, %v1505_v41  ;;  %v1512_v0 = vmul.f32 %v2221_v56, %v3136_v30  ;;  %1833 = vst [vmem:[%s2755_s23 + $0x1b0] sm:$0xff] %v620_v5  ;;  %v1521_v49 = vand.u32 2147483648, %v3136_v30  ;;  %vm1520_vm9 = vcmp.eq.f32.partialorder %v3136_v30, 0.0 }
 0x1eb   : > { %v1510_v27 = vsel %vm1508_vm4, %v1509_v58, %v1507_v61  ;;  %v1143_v20 = vmul.f32 0.6931472, %v2223_v62  ;;  %2230 = vpow2.f32 %v985_v8  ;;  %vm903_vm10 = vcmp.gt.f32.partialorder %v3139_v53, 20.0 }
 0x1ec   : > { %v732_v3 = vpop.f32.mrf.mxu2  ;;  %v1762_v34 = vmax.f32 %v1510_v27, 1e-05  ;;  %v1513_v4 = vmul.f32 %v2221_v56, %v1512_v0  ;;  %vm1530_vm11 = vcmp.eq.f32.partialorder %v3147_v47, inf  ;;  %vm1532_vm12 = vcmp.eq.f32.partialorder %v3147_v47, 0.0 }
 0x1ed   : > { %v845_v7 = vpop.f32.mrf.mxu3  ;;  %v1149_v40 = vsel %vm3161_vm5, %v1146_v59, %v1143_v20  ;;  %v3172_v9 = vadd.f32 %v732_v3, %v2758_v25  ;;  %v2225_v12 = vpop.eup %2224  ;;  %v1533_v61 = vand.u32 2147483648, %v3147_v47  ;;  %vm904_vm15 = vcmp.gt.f32.partialorder %v3153_v54, 20.0 }
 0x1ee   : > { %v846_v44 = vadd.f32 %v845_v7, %v2760_v26  ;;  %v622_v10 = vpop.f32.mrf.mxu1  ;;  %v1794_v55 = vmin.f32 %v1762_v34, 100000.0  ;;  %v1514_v14 = vmul.f32 0.5, %v1513_v4  ;;  %v1317_v15 = vsel %vm901_vm2, %v3074_v13, %v1149_v40  ;;  %v2227_v37 = vpop.eup %2226 }
 0x1ef   : > { %v623_v18 = vadd.f32 %v622_v10, %v2751_v19  ;;  %v1524_v21 = vmul.f32 %v2225_v12, %v3147_v47  ;;  %v3181_v23 = vadd.f32 1e-08, %v1317_v15  ;;  %v1152_v28 = vmul.f32 0.6931472, %v2227_v37  ;;  %v2229_v13 = vpop.eup %2228 }
 0x1f0   : > { %1897 = vst [vmem:[%s2755_s23 + $0x1c0] sm:$0xff] %v846_v44  ;;  %v1515_v24 = vsub.f32 1.5, %v1514_v14  ;;  %v937_v31 = vmin.f32 %v3172_v9, 20.0  ;;  %v1159_v36 = vadd.f32 1.0, %v2229_v13  ;;  %v1162_v17 = vmul.f32 -0.5, %v2229_v13 }
 0x1f1   : > { %1858 = vst [vmem:[%s2755_s23 + $0x110] sm:$0xff] %v1794_v55  ;;  %v1525_v32 = vmul.f32 %v2225_v12, %v1524_v21  ;;  %2232 = vrsqrt.f32 %v3181_v23  ;;  %v1158_v29 = vsel %vm1157_vm6, %v1155_v22, %v1152_v28  ;;  %v3196_v46 = vpop.eup %2230  ;;  %v1165_v50 = vand.u32 2147483647, %v2229_v13 }
 0x1f2   : > { %1834 = vst [vmem:[%s2755_s23 + $0x1c8] sm:$0xff] %v623_v18  ;;  %v1516_v33 = vmul.f32 %v2221_v56, %v1515_v24  ;;  %v987_v51 = vmul.f32 1.442695, %v937_v31  ;;  %v1318_v38 = vsel %vm902_vm7, %v3107_v11, %v1158_v29  ;;  %v1163_v48 = vadd.f32 1.0, %v1162_v17 }
 0x1f3   : > { %v1526_v35 = vmul.f32 0.5, %v1525_v32  ;;  %v3192_v42 = vadd.f32 1e-08, %v1318_v38  ;;  %v1171_v63 = vmul.f32 -0.5, %v3196_v46  ;;  %vm3215_vm13 = vcmp.lt.f32.partialorder %v1165_v50, 0.0004427343 }
 0x1f4   : > { %v735_v39 = vpop.f32.mrf.mxu2  ;;  %v1517_v57 = vmul.f32 %v1516_v33, %v3136_v30  ;;  %2234 = vpow2.f32 %v987_v51  ;;  %v1164_v0 = vmul.f32 %v2229_v13, %v1163_v48  ;;  %vm1542_vm14 = vcmp.eq.f32.partialorder %v3181_v23, inf }
 0x1f5   : > { %v3194_v45 = vpop.f32.mrf.mxu3  ;;  %v1527_v43 = vsub.f32 1.5, %v1526_v35  ;;  %2236 = vlog2.f32 %v1159_v36  ;;  %v3207_v58 = vadd.f32 %v735_v39, %v2758_v25  ;;  %v1172_v34 = vadd.f32 1.0, %v1171_v63 }
 0x1f6   : > { %v3199_v11 = vpop.f32.mrf.mxu1  ;;  %v1519_v6 = vsel %vm1518_vm8, %v3136_v30, %v1517_v57  ;;  %2238 = vrsqrt.f32 %v3192_v42  ;;  %v1168_v30 = vadd.f32 1.0, %v3196_v46  ;;  %vm1544_vm0 = vcmp.eq.f32.partialorder %v3181_v23, 0.0 }
 0x1f7   : > { %v2233_v52 = vpop.eup %2232  ;;  %v1522_v41 = vsel %vm1520_vm9, %v1521_v49, %v1519_v6  ;;  %v1528_v56 = vmul.f32 %v2225_v12, %v1527_v43  ;;  %v938_v5 = vmin.f32 %v3207_v58, 20.0  ;;  %v1174_v18 = vand.u32 2147483647, %v3196_v46 }
 0x1f8   : > { %v1763_v59 = vmax.f32 %v1522_v41, 1e-05  ;;  %v1536_v60 = vmul.f32 %v2233_v52, %v3181_v23  ;;  %2240 = vlog2.f32 %v1168_v30  ;;  %v1545_v51 = vand.u32 2147483648, %v3181_v23 }
 0x1f9   : > { %v1529_v62 = vmul.f32 %v1528_v56, %v3147_v47  ;;  %v989_v13 = vmul.f32 1.442695, %v938_v5  ;;  %v1173_v38 = vmul.f32 %v3196_v46, %v1172_v34  ;;  %v849_v39 = vadd.f32 %v3194_v45, %v2760_v26 }
 0x1fa   : > { %v2235_v1 = vpop.eup %2234  ;;  %v1795_v27 = vmin.f32 %v1763_v59, 100000.0  ;;  %v1537_v20 = vmul.f32 %v2233_v52, %v1536_v60  ;;  %vm1175_vm1 = vcmp.lt.f32.partialorder %v1174_v18, 0.0004427343  ;;  %v626_v46 = vadd.f32 %v3199_v11, %v2751_v19 }
 0x1fb   : > { %v2237_v16 = vpop.eup %2236  ;;  %v1531_v3 = vsel %vm1530_vm11, %v3147_v47, %v1529_v62  ;;  %v1177_v4 = vadd.f32 1.0, %v2235_v1  ;;  %v1180_v12 = vmul.f32 -0.5, %v2235_v1  ;;  %v1183_v28 = vand.u32 2147483647, %v2235_v1  ;;  %1898 = vst [vmem:[%s2755_s23 + $0x1d8] sm:$0xff] %v849_v39 }
 0x1fc   : > { %v738_v7 = vpop.f32.mrf.mxu2  ;;  %v2239_v40 = vpop.eup %2238  ;;  %1859 = vst [vmem:[%s2755_s23 + $0x128] sm:$0xff] %v1795_v27  ;;  %v1534_v8 = vsel %vm1532_vm12, %v1533_v61, %v1531_v3  ;;  %v1538_v44 = vmul.f32 0.5, %v1537_v20  ;;  %v1161_v10 = vmul.f32 0.6931472, %v2237_v16  ;;  %vm905_vm3 = vcmp.gt.f32.partialorder %v3172_v9, 20.0 }
 0x1fd   : > { %v851_v55 = vpop.f32.mrf.mxu3  ;;  %v1764_v14 = vmax.f32 %v1534_v8, 1e-05  ;;  %v1548_v15 = vmul.f32 %v2239_v40, %v3192_v42  ;;  %2242 = vlog2.f32 %v1177_v4  ;;  %v1181_v24 = vadd.f32 1.0, %v1180_v12  ;;  %1835 = vst [vmem:[%s2755_s23 + $0x1e0] sm:$0xff] %v626_v46 }
 0x1fe   : > { %v3231_v37 = vpop.f32.mrf.mxu1  ;;  %v1539_v21 = vsub.f32 1.5, %v1538_v44  ;;  %v1167_v47 = vsel %vm3215_vm13, %v1164_v0, %v1161_v10  ;;  %v2241_v33 = vpop.eup %2240  ;;  %2244 = vpow2.f32 %v989_v13  ;;  %vm3247_vm2 = vcmp.lt.f32.partialorder %v1183_v28, 0.0004427343 }
 0x1ff   : > { %v1796_v22 = vmin.f32 %v1764_v14, 100000.0  ;;  %v1549_v31 = vmul.f32 %v2239_v40, %v1548_v15  ;;  %v1319_v32 = vsel %vm903_vm10, %v3139_v53, %v1167_v47  ;;  %v1170_v17 = vmul.f32 0.6931472, %v2241_v33 }
 0x200   : > { %v1540_v29 = vmul.f32 %v2233_v52, %v1539_v21  ;;  %v3239_v35 = vadd.f32 1e-08, %v1319_v32  ;;  %v1182_v53 = vmul.f32 %v2235_v1, %v1181_v24  ;;  %v3261_v56 = vadd.f32 %v738_v7, %v2758_v25 }
 0x201   : > { %1860 = vst [vmem:[%s2755_s23 + $0x140] sm:$0xff] %v1796_v22  ;;  %v1550_v36 = vmul.f32 0.5, %v1549_v31  ;;  %v1176_v48 = vsel %vm1175_vm1, %v1173_v38, %v1170_v17  ;;  %v852_v62 = vadd.f32 %v851_v55, %v2760_v26  ;;  %vm1554_vm4 = vcmp.eq.f32.partialorder %v3192_v42, inf }
 0x202   : > { %v1541_v57 = vmul.f32 %v1540_v29, %v3181_v23  ;;  %2246 = vrsqrt.f32 %v3239_v35  ;;  %v1320_v52 = vsel %vm904_vm15, %v3153_v54, %v1176_v48  ;;  %v939_v63 = vmin.f32 %v3261_v56, 20.0 }
 0x203   : > { %v2243_v49 = vpop.eup %2242  ;;  %v1551_v43 = vsub.f32 1.5, %v1550_v36  ;;  %v3265_v11 = vadd.f32 1e-08, %v1320_v52  ;;  %vm1556_vm5 = vcmp.eq.f32.partialorder %v3192_v42, 0.0  ;;  %1899 = vst [vmem:[%s2755_s23 + $0x1f0] sm:$0xff] %v852_v62  ;;  %v1557_v2 = vand.u32 2147483648, %v3192_v42 }
 0x204   : > { %v741_v50 = vpop.f32.mrf.mxu2  ;;  %v1543_v45 = vsel %vm1542_vm14, %v3181_v23, %v1541_v57  ;;  %v1179_v41 = vmul.f32 0.6931472, %v2243_v49  ;;  %v2245_v1 = vpop.eup %2244  ;;  %v991_v8 = vmul.f32 1.442695, %v939_v63  ;;  %vm906_vm6 = vcmp.gt.f32.partialorder %v3207_v58, 20.0 }
 0x205   : > { %v854_v59 = vpop.f32.mrf.mxu3  ;;  %v1546_v60 = vsel %vm1544_vm0, %v1545_v51, %v1543_v45  ;;  %v1552_v30 = vmul.f32 %v2239_v40, %v1551_v43  ;;  %2248 = vrsqrt.f32 %v3265_v11  ;;  %v1186_v3 = vadd.f32 1.0, %v2245_v1 }
 0x206   : > { %v631_v61 = vpop.f32.mrf.mxu1  ;;  %v1765_v0 = vmax.f32 %v1546_v60, 1e-05  ;;  %v1185_v54 = vsel %vm3247_vm2, %v1182_v53, %v1179_v41  ;;  %v1189_v7 = vmul.f32 -0.5, %v2245_v1  ;;  %v629_v18 = vadd.f32 %v3231_v37, %v2751_v19 }
 0x207   : > { %v1553_v23 = vmul.f32 %v1552_v30, %v3192_v42  ;;  %v1321_v16 = vsel %vm905_vm3, %v3172_v9, %v1185_v54  ;;  %2250 = vlog2.f32 %v1186_v3  ;;  %v1192_v47 = vand.u32 2147483647, %v2245_v1 }
 0x208   : > { %v2247_v27 = vpop.eup %2246  ;;  %v1797_v20 = vmin.f32 %v1765_v0, 100000.0  ;;  %v3282_v5 = vadd.f32 1e-08, %v1321_v16  ;;  %v1190_v9 = vadd.f32 1.0, %v1189_v7  ;;  %v3291_v24 = vadd.f32 %v741_v50, %v2758_v25  ;;  %1836 = vst [vmem:[%s2755_s23 + $0x1f8] sm:$0xff] %v629_v18 }
 0x209   : > { %v1555_v34 = vsel %vm1554_vm4, %v3192_v42, %v1553_v23  ;;  %v1560_v4 = vmul.f32 %v2247_v27, %v3239_v35  ;;  %v855_v28 = vadd.f32 %v854_v59, %v2760_v26  ;;  %v632_v31 = vadd.f32 %v631_v61, %v2751_v19 }
 0x20a   : > { %1861 = vst [vmem:[%s2755_s23 + $0x158] sm:$0xff] %v1797_v20  ;;  %v1558_v40 = vsel %vm1556_vm5, %v1557_v2, %v1555_v34  ;;  %2252 = vrsqrt.f32 %v3282_v5  ;;  %vm1566_vm7 = vcmp.eq.f32.partialorder %v3239_v35, inf  ;;  %v940_v51 = vmin.f32 %v3291_v24, 20.0 }
 0x20b   : > { %v1766_v44 = vmax.f32 %v1558_v40, 1e-05  ;;  %v1561_v10 = vmul.f32 %v2247_v27, %v1560_v4  ;;  %v2249_v42 = vpop.eup %2248  ;;  %2254 = vpow2.f32 %v991_v8  ;;  %v1191_v57 = vmul.f32 %v2245_v1, %v1190_v9  ;;  %1900 = vst [vmem:[%s2755_s23 + $0x208] sm:$0xff] %v855_v28 }
 0x20c   : > { %v744_v12 = vpop.f32.mrf.mxu2  ;;  %v1572_v21 = vmul.f32 %v2249_v42, %v3265_v11  ;;  %vm1568_vm8 = vcmp.eq.f32.partialorder %v3239_v35, 0.0  ;;  %vm1193_vm9 = vcmp.lt.f32.partialorder %v1192_v47, 0.0004427343  ;;  %1837 = vst [vmem:[%s2755_s23 + $0x210] sm:$0xff] %v632_v31  ;;  %v1569_v46 = vand.u32 2147483648, %v3239_v35 }
 0x20d   : > { %v857_v55 = vpop.f32.mrf.mxu3  ;;  %v1798_v14 = vmin.f32 %v1766_v44, 100000.0  ;;  %v1562_v15 = vmul.f32 0.5, %v1561_v10  ;;  %v3297_v32 = vadd.f32 %v744_v12, %v2758_v25  ;;  %v2251_v37 = vpop.eup %2250  ;;  %v993_v45 = vmul.f32 1.442695, %v940_v51 }
 0x20e   : > { %v858_v13 = vadd.f32 %v857_v55, %v2760_v26  ;;  %v634_v33 = vpop.f32.mrf.mxu1  ;;  %v1573_v29 = vmul.f32 %v2249_v42, %v1572_v21  ;;  %v1188_v39 = vmul.f32 0.6931472, %v2251_v37  ;;  %vm1578_vm10 = vcmp.eq.f32.partialorder %v3265_v11, inf }
 0x20f   : > { %1862 = vst [vmem:[%s2755_s23 + $0x170] sm:$0xff] %v1798_v14  ;;  %v1563_v22 = vsub.f32 1.5, %v1562_v15  ;;  %v635_v38 = vadd.f32 %v634_v33, %v2751_v19  ;;  %v941_v53 = vmin.f32 %v3297_v32, 20.0  ;;  %vm1580_vm11 = vcmp.eq.f32.partialorder %v3265_v11, 0.0 }
 0x210   : > { %v2253_v36 = vpop.eup %2252  ;;  %v1574_v49 = vmul.f32 0.5, %v1573_v29  ;;  %v1194_v50 = vsel %vm1193_vm9, %v1191_v57, %v1188_v39  ;;  %1901 = vst [vmem:[%s2755_s23 + $0x220] sm:$0xff] %v858_v13  ;;  %v1581_v2 = vand.u32 2147483648, %v3265_v11  ;;  %vm1590_vm12 = vcmp.eq.f32.partialorder %v3282_v5, inf }
 0x211   : > { %v1564_v17 = vmul.f32 %v2247_v27, %v1563_v22  ;;  %v1584_v43 = vmul.f32 %v2253_v36, %v3282_v5  ;;  %v2255_v48 = vpop.eup %2254  ;;  %v1322_v59 = vsel %vm906_vm6, %v3207_v58, %v1194_v50  ;;  %1838 = vst [vmem:[%s2755_s23 + $0x228] sm:$0xff] %v635_v38  ;;  %v995_v0 = vmul.f32 1.442695, %v941_v53 }
 0x212   : > { %v1575_v52 = vsub.f32 1.5, %v1574_v49  ;;  %v1195_v60 = vadd.f32 1.0, %v2255_v48  ;;  %v3319_v62 = vadd.f32 1e-08, %v1322_v59  ;;  %v1198_v61 = vmul.f32 -0.5, %v2255_v48 }
 0x213   : > { %v1565_v6 = vmul.f32 %v1564_v17, %v3239_v35  ;;  %v1585_v41 = vmul.f32 %v2253_v36, %v1584_v43  ;;  %v1201_v40 = vand.u32 2147483647, %v2255_v48  ;;  %vm1592_vm13 = vcmp.eq.f32.partialorder %v3282_v5, 0.0 }
 0x214   : > { %v1576_v63 = vmul.f32 %v2249_v42, %v1575_v52  ;;  %2256 = vlog2.f32 %v1195_v60  ;;  %v747_v23 = vpop.f32.mrf.mxu2  ;;  %v1199_v3 = vadd.f32 1.0, %v1198_v61  ;;  %v1593_v15 = vand.u32 2147483648, %v3282_v5 }
 0x215   : > { %v1567_v30 = vsel %vm1566_vm7, %v3239_v35, %v1565_v6  ;;  %v1586_v1 = vmul.f32 0.5, %v1585_v41  ;;  %2258 = vrsqrt.f32 %v3319_v62  ;;  %v860_v58 = vpop.f32.mrf.mxu3  ;;  %v3329_v34 = vadd.f32 %v747_v23, %v2758_v25 }
 0x216   : > { %v1570_v54 = vsel %vm1568_vm8, %v1569_v46, %v1567_v30  ;;  %v1577_v20 = vmul.f32 %v1576_v63, %v3265_v11  ;;  %2260 = vpow2.f32 %v993_v45  ;;  %v637_v8 = vpop.f32.mrf.mxu1  ;;  %v861_v9 = vadd.f32 %v860_v58, %v2760_v26 }
 0x217   : > { %v1767_v27 = vmax.f32 %v1570_v54, 1e-05  ;;  %v1587_v16 = vsub.f32 1.5, %v1586_v1  ;;  %2262 = vpow2.f32 %v995_v0  ;;  %v942_v10 = vmin.f32 %v3329_v34, 20.0 }
 0x218   : > { %v1579_v4 = vsel %vm1578_vm10, %v3265_v11, %v1577_v20  ;;  %v638_v11 = vadd.f32 %v637_v8, %v2751_v19  ;;  %v1200_v21 = vmul.f32 %v2255_v48, %v1199_v3  ;;  %1902 = vst [vmem:[%s2755_s23 + $0x238] sm:$0xff] %v861_v9  ;;  %vm1202_vm14 = vcmp.lt.f32.partialorder %v1201_v40, 0.0004427343 }
 0x219   : > { %v1799_v35 = vmin.f32 %v1767_v27, 100000.0  ;;  %v1588_v7 = vmul.f32 %v2253_v36, %v1587_v16  ;;  %v1582_v44 = vsel %vm1580_vm11, %v1581_v2, %v1579_v4  ;;  %v997_v47 = vmul.f32 1.442695, %v942_v10 }
 0x21a   : > { %v2257_v12 = vpop.eup %2256  ;;  %v1768_v55 = vmax.f32 %v1582_v44, 1e-05  ;;  %1839 = vst [vmem:[%s2755_s23 + $0x240] sm:$0xff] %v638_v11  ;;  %vm907_vm15 = vcmp.gt.f32.partialorder %v3261_v56, 20.0  ;;  %vm908_vm0 = vcmp.gt.f32.partialorder %v3291_v24, 20.0  ;;  %vm909_vm1 = vcmp.gt.f32.partialorder %v3297_v32, 20.0 }
 0x21b   : > { %1863 = vst [vmem:[%s2755_s23 + $0x188] sm:$0xff] %v1799_v35  ;;  %v1589_v42 = vmul.f32 %v1588_v7, %v3282_v5  ;;  %v2259_v14 = vpop.eup %2258  ;;  %v1197_v18 = vmul.f32 0.6931472, %v2257_v12  ;;  %2264 = vpow2.f32 %v997_v47  ;;  %vm1602_vm2 = vcmp.eq.f32.partialorder %v3319_v62, inf }
 0x21c   : > { %v1800_v28 = vmin.f32 %v1768_v55, 100000.0  ;;  %v1596_v31 = vmul.f32 %v2259_v14, %v3319_v62  ;;  %v2261_v13 = vpop.eup %2260  ;;  %v750_v39 = vpop.f32.mrf.mxu2  ;;  %vm1604_vm3 = vcmp.eq.f32.partialorder %v3319_v62, 0.0  ;;  %v1605_v54 = vand.u32 2147483648, %v3319_v62 }
 0x21d   : > { %v1591_v22 = vsel %vm1590_vm12, %v3282_v5, %v1589_v42  ;;  %v1203_v37 = vsel %vm1202_vm14, %v1200_v21, %v1197_v18  ;;  %v2263_v29 = vpop.eup %2262  ;;  %v1204_v17 = vadd.f32 1.0, %v2261_v13  ;;  %v1207_v57 = vmul.f32 -0.5, %v2261_v13  ;;  %v863_v49 = vpop.f32.mrf.mxu3 }
 0x21e   : > { %v1594_v33 = vsel %vm1592_vm13, %v1593_v15, %v1591_v22  ;;  %1864 = vst [vmem:[%s2755_s23 + $0x1a0] sm:$0xff] %v1800_v28  ;;  %v1597_v38 = vmul.f32 %v2259_v14, %v1596_v31  ;;  %v1323_v36 = vsel %vm907_vm15, %v3261_v56, %v1203_v37  ;;  %v1213_v53 = vadd.f32 1.0, %v2263_v29  ;;  %v640_v46 = vpop.f32.mrf.mxu1 }
 0x21f   : > { %v1769_v51 = vmax.f32 %v1594_v33, 1e-05  ;;  %v3347_v5 = vadd.f32 1e-08, %v1323_v36  ;;  %2266 = vlog2.f32 %v1204_v17  ;;  %v1216_v6 = vmul.f32 -0.5, %v2263_v29 }
 0x220   : > { %v1598_v48 = vmul.f32 0.5, %v1597_v38  ;;  %v1210_v50 = vand.u32 2147483647, %v2261_v13  ;;  %v1208_v56 = vadd.f32 1.0, %v1207_v57  ;;  %v1219_v59 = vand.u32 2147483647, %v2263_v29 }
 0x221   : > { %v1801_v43 = vmin.f32 %v1769_v51, 100000.0  ;;  %2268 = vrsqrt.f32 %v3347_v5  ;;  %v3352_v52 = vpop.eup %2264  ;;  %v1217_v41 = vadd.f32 1.0, %v1216_v6  ;;  %v3356_v60 = vadd.f32 %v750_v39, %v2758_v25 }
 0x222   : > { %v1599_v45 = vsub.f32 1.5, %v1598_v48  ;;  %2270 = vlog2.f32 %v1213_v53  ;;  %v864_v30 = vadd.f32 %v863_v49, %v2760_v26  ;;  %v1222_v0 = vadd.f32 1.0, %v3352_v52 }
 0x223   : > { %1865 = vst [vmem:[%s2755_s23 + $0x1b8] sm:$0xff] %v1801_v43  ;;  %v1209_v63 = vmul.f32 %v2261_v13, %v1208_v56  ;;  %vm3363_vm4 = vcmp.lt.f32.partialorder %v1210_v50, 0.0004427343  ;;  %v1225_v23 = vmul.f32 -0.5, %v3352_v52  ;;  %v1218_v20 = vmul.f32 %v2263_v29, %v1217_v41 }
 0x224   : > { %v1600_v61 = vmul.f32 %v2259_v14, %v1599_v45  ;;  %1903 = vst [vmem:[%s2755_s23 + $0x250] sm:$0xff] %v864_v30  ;;  %2272 = vlog2.f32 %v1222_v0  ;;  %v943_v2 = vmin.f32 %v3356_v60, 20.0  ;;  %v753_v16 = vpop.f32.mrf.mxu2  ;;  %vm3371_vm5 = vcmp.lt.f32.partialorder %v1219_v59, 0.0004427343 }
 0x225   : > { %v2267_v27 = vpop.eup %2266  ;;  %v641_v7 = vadd.f32 %v640_v46, %v2751_v19  ;;  %v3377_v40 = vadd.f32 %v753_v16, %v2758_v25  ;;  %v866_v8 = vpop.f32.mrf.mxu3  ;;  %v1228_v12 = vand.u32 2147483647, %v3352_v52  ;;  %v1226_v18 = vadd.f32 1.0, %v1225_v23 }
 0x226   : > { %v1601_v58 = vmul.f32 %v1600_v61, %v3319_v62  ;;  %v1206_v3 = vmul.f32 0.6931472, %v2267_v27  ;;  %v999_v55 = vmul.f32 1.442695, %v943_v2  ;;  %v643_v42 = vpop.f32.mrf.mxu1  ;;  %v867_v13 = vadd.f32 %v866_v8, %v2760_v26 }
 0x227   : > { %v2269_v35 = vpop.eup %2268  ;;  %1840 = vst [vmem:[%s2755_s23 + $0x258] sm:$0xff] %v641_v7  ;;  %v944_v31 = vmin.f32 %v3377_v40, 20.0  ;;  %v1227_v57 = vmul.f32 %v3352_v52, %v1226_v18  ;;  %vm1229_vm6 = vcmp.lt.f32.partialorder %v1228_v12, 0.0004427343  ;;  %vm910_vm7 = vcmp.gt.f32.partialorder %v3329_v34, 20.0 }
 0x228   : > { %v2271_v44 = vpop.eup %2270  ;;  %v1603_v10 = vsel %vm1602_vm2, %v3319_v62, %v1601_v58  ;;  %v1608_v9 = vmul.f32 %v2269_v35, %v3347_v5  ;;  %v1212_v14 = vsel %vm3363_vm4, %v1209_v63, %v1206_v3  ;;  %2274 = vpow2.f32 %v999_v55  ;;  %1904 = vst [vmem:[%s2755_s23 + $0x268] sm:$0xff] %v867_v13 }
 0x229   : > { %v1606_v11 = vsel %vm1604_vm3, %v1605_v54, %v1603_v10  ;;  %v1215_v15 = vmul.f32 0.6931472, %v2271_v44  ;;  %v1324_v28 = vsel %vm908_vm0, %v3291_v24, %v1212_v14  ;;  %v644_v24 = vadd.f32 %v643_v42, %v2751_v19 }
 0x22a   : > { %v1770_v21 = vmax.f32 %v1606_v11, 1e-05  ;;  %v1609_v47 = vmul.f32 %v2269_v35, %v1608_v9  ;;  %v3392_v22 = vadd.f32 1e-08, %v1324_v28  ;;  %v2273_v33 = vpop.eup %2272  ;;  %v1001_v53 = vmul.f32 1.442695, %v944_v31 }
 0x22b   : > { %v1221_v62 = vsel %vm3371_vm5, %v1218_v20, %v1215_v15  ;;  %v1224_v17 = vmul.f32 0.6931472, %v2273_v33  ;;  %1841 = vst [vmem:[%s2755_s23 + $0x270] sm:$0xff] %v644_v24  ;;  %vm1614_vm8 = vcmp.eq.f32.partialorder %v3347_v5, inf  ;;  %v1617_v59 = vand.u32 2147483648, %v3347_v5 }
 0x22c   : > { %v1802_v37 = vmin.f32 %v1770_v21, 100000.0  ;;  %v1610_v29 = vmul.f32 0.5, %v1609_v47  ;;  %v1325_v51 = vsel %vm909_vm1, %v3297_v32, %v1221_v62  ;;  %2276 = vrsqrt.f32 %v3392_v22  ;;  %v756_v39 = vpop.f32.mrf.mxu2 }
 0x22d   : > { %v3405_v36 = vadd.f32 1e-08, %v1325_v51  ;;  %v869_v49 = vpop.f32.mrf.mxu3  ;;  %v3411_v32 = vadd.f32 %v756_v39, %v2758_v25  ;;  %v1230_v46 = vsel %vm1229_vm6, %v1227_v57, %v1224_v17  ;;  %vm1616_vm9 = vcmp.eq.f32.partialorder %v3347_v5, 0.0 }
 0x22e   : > { %1866 = vst [vmem:[%s2755_s23 + $0x1d0] sm:$0xff] %v1802_v37  ;;  %v1611_v38 = vsub.f32 1.5, %v1610_v29  ;;  %v2275_v43 = vpop.eup %2274  ;;  %v646_v6 = vpop.f32.mrf.mxu1  ;;  %v1326_v56 = vsel %vm910_vm7, %v3329_v34, %v1230_v46  ;;  %vm911_vm10 = vcmp.gt.f32.partialorder %v3356_v60, 20.0  ;;  %vm1626_vm11 = vcmp.eq.f32.partialorder %v3392_v22, inf }
 0x22f   : > { %2278 = vrsqrt.f32 %v3405_v36  ;;  %v1231_v50 = vadd.f32 1.0, %v2275_v43  ;;  %v1234_v52 = vmul.f32 -0.5, %v2275_v43  ;;  %v3418_v30 = vadd.f32 1e-08, %v1326_v56 }
 0x230   : > { %v1612_v48 = vmul.f32 %v2269_v35, %v1611_v38  ;;  %2280 = vpow2.f32 %v1001_v53  ;;  %v945_v54 = vmin.f32 %v3411_v32, 20.0  ;;  %v1237_v58 = vand.u32 2147483647, %v2275_v43 }
 0x231   : > { %2282 = vlog2.f32 %v1231_v50  ;;  %v1235_v27 = vadd.f32 1.0, %v1234_v52  ;;  %v870_v16 = vadd.f32 %v869_v49, %v2760_v26  ;;  %v647_v35 = vadd.f32 %v646_v6, %v2751_v19 }
 0x232   : > { %v1613_v45 = vmul.f32 %v1612_v48, %v3347_v5  ;;  %v2277_v41 = vpop.eup %2276  ;;  %2284 = vrsqrt.f32 %v3418_v30  ;;  %vm1628_vm12 = vcmp.eq.f32.partialorder %v3392_v22, 0.0  ;;  %vm1238_vm13 = vcmp.lt.f32.partialorder %v1237_v58, 0.0004427343 }
 0x233   : > { %v1620_v0 = vmul.f32 %v2277_v41, %v3392_v22  ;;  %1905 = vst [vmem:[%s2755_s23 + $0x280] sm:$0xff] %v870_v16  ;;  %v1236_v18 = vmul.f32 %v2275_v43, %v1235_v27  ;;  %vm912_vm14 = vcmp.gt.f32.partialorder %v3377_v40, 20.0  ;;  %v1629_v17 = vand.u32 2147483648, %v3392_v22 }
 0x234   : > { %v1615_v61 = vsel %vm1614_vm8, %v3347_v5, %v1613_v45  ;;  %v759_v20 = vpop.f32.mrf.mxu2  ;;  %v1003_v5 = vmul.f32 1.442695, %v945_v54  ;;  %1842 = vst [vmem:[%s2755_s23 + $0x288] sm:$0xff] %v647_v35  ;;  %vm1638_vm15 = vcmp.eq.f32.partialorder %v3405_v36, inf  ;;  %vm1640_vm0 = vcmp.eq.f32.partialorder %v3405_v36, 0.0 }
 0x235   : > { %v1618_v63 = vsel %vm1616_vm9, %v1617_v59, %v1615_v61  ;;  %v2279_v34 = vpop.eup %2278  ;;  %v1621_v23 = vmul.f32 %v2277_v41, %v1620_v0  ;;  %v872_v3 = vpop.f32.mrf.mxu3  ;;  %v3431_v44 = vadd.f32 %v759_v20, %v2758_v25  ;;  %v1641_v46 = vand.u32 2147483648, %v3405_v36 }
 0x236   : > { %v1771_v1 = vmax.f32 %v1618_v63, 1e-05  ;;  %v1632_v2 = vmul.f32 %v2279_v34, %v3405_v36  ;;  %v2281_v4 = vpop.eup %2280  ;;  %v873_v10 = vadd.f32 %v872_v3, %v2760_v26  ;;  %v649_v9 = vpop.f32.mrf.mxu1  ;;  %2286 = vpow2.f32 %v1003_v5 }
 0x237   : > { %v1622_v8 = vmul.f32 0.5, %v1621_v23  ;;  %v2283_v12 = vpop.eup %2282  ;;  %v1240_v42 = vadd.f32 1.0, %v2281_v4  ;;  %v1243_v11 = vmul.f32 -0.5, %v2281_v4  ;;  %v1246_v28 = vand.u32 2147483647, %v2281_v4 }
 0x238   : > { %v1803_v7 = vmin.f32 %v1771_v1, 100000.0  ;;  %v1633_v55 = vmul.f32 %v2279_v34, %v1632_v2  ;;  %v1233_v15 = vmul.f32 0.6931472, %v2283_v12  ;;  %v2285_v21 = vpop.eup %2284  ;;  %v946_v33 = vmin.f32 %v3431_v44, 20.0  ;;  %1906 = vst [vmem:[%s2755_s23 + $0x298] sm:$0xff] %v873_v10 }
 0x239   : > { %v1623_v14 = vsub.f32 1.5, %v1622_v8  ;;  %2288 = vlog2.f32 %v1240_v42  ;;  %v1644_v31 = vmul.f32 %v2285_v21, %v3418_v30  ;;  %v1244_v51 = vadd.f32 1.0, %v1243_v11 }
 0x23a   : > { %1867 = vst [vmem:[%s2755_s23 + $0x1e8] sm:$0xff] %v1803_v7  ;;  %v1634_v47 = vmul.f32 0.5, %v1633_v55  ;;  %v1239_v13 = vsel %vm1238_vm13, %v1236_v18, %v1233_v15  ;;  %v650_v24 = vadd.f32 %v649_v9, %v2751_v19  ;;  %v1005_v43 = vmul.f32 1.442695, %v946_v33 }
 0x23b   : > { %v1624_v62 = vmul.f32 %v2277_v41, %v1623_v14  ;;  %v1327_v29 = vsel %vm911_vm10, %v3356_v60, %v1239_v13  ;;  %v1645_v39 = vmul.f32 %v2285_v21, %v1644_v31  ;;  %v1245_v59 = vmul.f32 %v2281_v4, %v1244_v51 }
 0x23c   : > { %v1635_v37 = vsub.f32 1.5, %v1634_v47  ;;  %v3448_v57 = vadd.f32 1e-08, %v1327_v29  ;;  %v762_v53 = vpop.f32.mrf.mxu2  ;;  %1843 = vst [vmem:[%s2755_s23 + $0x2a0] sm:$0xff] %v650_v24  ;;  %v2287_v60 = vpop.eup %2286  ;;  %vm1247_vm1 = vcmp.lt.f32.partialorder %v1246_v28, 0.0004427343 }
 0x23d   : > { %v1625_v38 = vmul.f32 %v1624_v62, %v3392_v22  ;;  %v875_v48 = vpop.f32.mrf.mxu3  ;;  %v1646_v50 = vmul.f32 0.5, %v1645_v39  ;;  %v1249_v63 = vadd.f32 1.0, %v2287_v60  ;;  %v1252_v1 = vmul.f32 -0.5, %v2287_v60 }
 0x23e   : > { %v1636_v49 = vmul.f32 %v2279_v34, %v1635_v37  ;;  %2290 = vrsqrt.f32 %v3448_v57  ;;  %v652_v45 = vpop.f32.mrf.mxu1  ;;  %v3465_v23 = vadd.f32 %v762_v53, %v2758_v25  ;;  %vm1650_vm2 = vcmp.eq.f32.partialorder %v3418_v30, inf }
 0x23f   : > { %v1627_v6 = vsel %vm1626_vm11, %v3392_v22, %v1625_v38  ;;  %v2289_v56 = vpop.eup %2288  ;;  %v1647_v0 = vsub.f32 1.5, %v1646_v50  ;;  %2292 = vpow2.f32 %v1005_v43  ;;  %v1653_v7 = vand.u32 2147483648, %v3418_v30 }
 0x240   : > { %v1630_v52 = vsel %vm1628_vm12, %v1629_v17, %v1627_v6  ;;  %v1637_v41 = vmul.f32 %v1636_v49, %v3405_v36  ;;  %v1242_v54 = vmul.f32 0.6931472, %v2289_v56  ;;  %2294 = vlog2.f32 %v1249_v63 }
 0x241   : > { %v1772_v61 = vmax.f32 %v1630_v52, 1e-05  ;;  %v1648_v58 = vmul.f32 %v2285_v21, %v1647_v0  ;;  %v947_v10 = vmin.f32 %v3465_v23, 20.0  ;;  %vm1652_vm3 = vcmp.eq.f32.partialorder %v3418_v30, 0.0 }
 0x242   : > { %v1639_v34 = vsel %vm1638_vm15, %v3405_v36, %v1637_v41  ;;  %v1248_v20 = vsel %vm1247_vm1, %v1245_v59, %v1242_v54  ;;  %v1253_v12 = vadd.f32 1.0, %v1252_v1  ;;  %v1255_v15 = vand.u32 2147483647, %v2287_v60 }
 0x243   : > { %v1804_v22 = vmin.f32 %v1772_v61, 100000.0  ;;  %v1642_v27 = vsel %vm1640_vm0, %v1641_v46, %v1639_v34  ;;  %v1328_v5 = vsel %vm912_vm14, %v3377_v40, %v1248_v20  ;;  %v1649_v35 = vmul.f32 %v1648_v58, %v3418_v30 }
 0x244   : > { %v1773_v2 = vmax.f32 %v1642_v27, 1e-05  ;;  %v2291_v16 = vpop.eup %2290  ;;  %v3475_v3 = vadd.f32 1e-08, %v1328_v5  ;;  %v765_v4 = vpop.f32.mrf.mxu2  ;;  %v1007_v18 = vmul.f32 1.442695, %v947_v10  ;;  %v653_v13 = vadd.f32 %v652_v45, %v2751_v19 }
 0x245   : > { %1868 = vst [vmem:[%s2755_s23 + $0x200] sm:$0xff] %v1804_v22  ;;  %v1656_v8 = vmul.f32 %v2291_v16, %v3448_v57  ;;  %v878_v9 = vpop.f32.mrf.mxu3  ;;  %v1651_v40 = vsel %vm1650_vm2, %v3418_v30, %v1649_v35  ;;  %v2293_v42 = vpop.eup %2292  ;;  %vm913_vm4 = vcmp.gt.f32.partialorder %v3411_v32, 20.0  ;;  %v876_v30 = vadd.f32 %v875_v48, %v2760_v26 }
 0x246   : > { %v1805_v36 = vmin.f32 %v1773_v2, 100000.0  ;;  %2296 = vrsqrt.f32 %v3475_v3  ;;  %v655_v55 = vpop.f32.mrf.mxu1  ;;  %v1654_v11 = vsel %vm1652_vm3, %v1653_v7, %v1651_v40  ;;  %v1258_v47 = vadd.f32 1.0, %v2293_v42  ;;  %v2295_v62 = vpop.eup %2294  ;;  %1844 = vst [vmem:[%s2755_s23 + $0x2b8] sm:$0xff] %v653_v13 }
 0x247   : > { %v1657_v14 = vmul.f32 %v2291_v16, %v1656_v8  ;;  %v1774_v21 = vmax.f32 %v1654_v11, 1e-05  ;;  %v1261_v28 = vmul.f32 -0.5, %v2293_v42  ;;  %2298 = vpow2.f32 %v1007_v18  ;;  %1907 = vst [vmem:[%s2755_s23 + $0x2b0] sm:$0xff] %v876_v30 }
 0x248   : > { %1869 = vst [vmem:[%s2755_s23 + $0x218] sm:$0xff] %v1805_v36  ;;  %v1251_v37 = vmul.f32 0.6931472, %v2295_v62  ;;  %v1254_v29 = vmul.f32 %v2287_v60, %v1253_v12  ;;  %2300 = vlog2.f32 %v1258_v47  ;;  %vm1256_vm5 = vcmp.lt.f32.partialorder %v1255_v15, 0.0004427343 }
 0x249   : > { %v1658_v31 = vmul.f32 0.5, %v1657_v14  ;;  %v1806_v33 = vmin.f32 %v1774_v21, 100000.0  ;;  %v3489_v24 = vadd.f32 %v765_v4, %v2758_v25  ;;  %v879_v38 = vadd.f32 %v878_v9, %v2760_v26 }
 0x24a   : > { %v1257_v39 = vsel %vm1256_vm5, %v1254_v29, %v1251_v37  ;;  %v1262_v53 = vadd.f32 1.0, %v1261_v28  ;;  %v1264_v49 = vand.u32 2147483647, %v2293_v42  ;;  %v656_v43 = vadd.f32 %v655_v55, %v2751_v19 }
 0x24b   : > { %v1659_v51 = vsub.f32 1.5, %v1658_v31  ;;  %1870 = vst [vmem:[%s2755_s23 + $0x230] sm:$0xff] %v1806_v33  ;;  %v1329_v46 = vsel %vm913_vm4, %v3411_v32, %v1257_v39  ;;  %vm914_vm6 = vcmp.gt.f32.partialorder %v3431_v44, 20.0  ;;  %vm1662_vm7 = vcmp.eq.f32.partialorder %v3448_v57, inf }
 0x24c   : > { %v2297_v17 = vpop.eup %2296  ;;  %v768_v48 = vpop.f32.mrf.mxu2  ;;  %v3501_v45 = vadd.f32 1e-08, %v1329_v46  ;;  %v948_v56 = vmin.f32 %v3489_v24, 20.0  ;;  %1908 = vst [vmem:[%s2755_s23 + $0x2c8] sm:$0xff] %v879_v38  ;;  %vm1664_vm8 = vcmp.eq.f32.partialorder %v3448_v57, 0.0  ;;  %v1665_v63 = vand.u32 2147483648, %v3448_v57 }
 0x24d   : > { %v1660_v60 = vmul.f32 %v2291_v16, %v1659_v51  ;;  %v1668_v6 = vmul.f32 %v2297_v17, %v3475_v3  ;;  %v881_v50 = vpop.f32.mrf.mxu3  ;;  %v2299_v59 = vpop.eup %2298  ;;  %1845 = vst [vmem:[%s2755_s23 + $0x2d0] sm:$0xff] %v656_v43  ;;  %v1263_v34 = vmul.f32 %v2293_v42, %v1262_v53  ;;  %vm3512_vm9 = vcmp.lt.f32.partialorder %v1264_v49, 0.0004427343 }
 0x24e   : > { %v882_v52 = vadd.f32 %v881_v50, %v2760_v26  ;;  %v658_v41 = vpop.f32.mrf.mxu1  ;;  %v2301_v54 = vpop.eup %2300  ;;  %2302 = vrsqrt.f32 %v3501_v45  ;;  %v1267_v20 = vadd.f32 1.0, %v2299_v59  ;;  %v1270_v2 = vmul.f32 -0.5, %v2299_v59 }
 0x24f   : > { %v1661_v61 = vmul.f32 %v1660_v60, %v3448_v57  ;;  %v1669_v32 = vmul.f32 %v2297_v17, %v1668_v6  ;;  %v659_v0 = vadd.f32 %v658_v41, %v2751_v19  ;;  %v1260_v58 = vmul.f32 0.6931472, %v2301_v54 }
 0x250   : > { %1909 = vst [vmem:[%s2755_s23 + $0x2e0] sm:$0xff] %v882_v52  ;;  %v1009_v5 = vmul.f32 1.442695, %v948_v56  ;;  %v3522_v16 = vadd.f32 %v768_v48, %v2758_v25  ;;  %2304 = vlog2.f32 %v1267_v20  ;;  %v1271_v55 = vadd.f32 1.0, %v1270_v2 }
 0x251   : > { %v1663_v22 = vsel %vm1662_vm7, %v3448_v57, %v1661_v61  ;;  %v1670_v27 = vmul.f32 0.5, %v1669_v32  ;;  %1846 = vst [vmem:[%s2755_s23 + $0x2e8] sm:$0xff] %v659_v0  ;;  %v1266_v36 = vsel %vm3512_vm9, %v1263_v34, %v1260_v58  ;;  %v1273_v18 = vand.u32 2147483647, %v2299_v59 }
 0x252   : > { %v1666_v19 = vsel %vm1664_vm8, %v1665_v63, %v1663_v22  ;;  %v1330_v57 = vsel %vm914_vm6, %v3431_v44, %v1266_v36  ;;  %2306 = vpow2.f32 %v1009_v5  ;;  %v949_v42 = vmin.f32 %v3522_v16, 20.0 }
 0x253   : > { %v1775_v35 = vmax.f32 %v1666_v19, 1e-05  ;;  %v1671_v4 = vsub.f32 1.5, %v1670_v27  ;;  %v3529_v9 = vadd.f32 1e-08, %v1330_v57  ;;  %vm1674_vm10 = vcmp.eq.f32.partialorder %v3475_v3, inf }
 0x254   : > { %v771_v7 = vpop.f32.mrf.mxu2  ;;  %v2303_v12 = vpop.eup %2302  ;;  %v1677_v21 = vand.u32 2147483648, %v3475_v3  ;;  %v1011_v47 = vmul.f32 1.442695, %v949_v42  ;;  %vm1676_vm11 = vcmp.eq.f32.partialorder %v3475_v3, 0.0  ;;  %v1272_v33 = vmul.f32 %v2299_v59, %v1271_v55 }
 0x255   : > { %v1807_v8 = vmin.f32 %v1775_v35, 100000.0  ;;  %v1672_v10 = vmul.f32 %v2297_v17, %v1671_v4  ;;  %v884_v40 = vpop.f32.mrf.mxu3  ;;  %v3533_v11 = vadd.f32 %v771_v7, %v2758_v25  ;;  %v1680_v15 = vmul.f32 %v2303_v12, %v3501_v45 }
 0x256   : > { %v885_v14 = vadd.f32 %v884_v40, %v2760_v26  ;;  %2308 = vrsqrt.f32 %v3529_v9  ;;  %v2305_v28 = vpop.eup %2304  ;;  %vm1274_vm12 = vcmp.lt.f32.partialorder %v1273_v18, 0.0004427343  ;;  %vm915_vm13 = vcmp.gt.f32.partialorder %v3465_v23, 20.0 }
 0x257   : > { %1871 = vst [vmem:[%s2755_s23 + $0x248] sm:$0xff] %v1807_v8  ;;  %v1673_v44 = vmul.f32 %v1672_v10, %v3475_v3  ;;  %v1681_v26 = vmul.f32 %v2303_v12, %v1680_v15  ;;  %v950_v62 = vmin.f32 %v3533_v11, 20.0  ;;  %v1269_v13 = vmul.f32 0.6931472, %v2305_v28 }
 0x258   : > { %1910 = vst [vmem:[%s2755_s23 + $0x2f8] sm:$0xff] %v885_v14  ;;  %v2307_v31 = vpop.eup %2306  ;;  %2310 = vpow2.f32 %v1011_v47  ;;  %vm1686_vm14 = vcmp.eq.f32.partialorder %v3501_v45, inf  ;;  %vm1688_vm15 = vcmp.eq.f32.partialorder %v3501_v45, 0.0  ;;  %vm916_vm0 = vcmp.gt.f32.partialorder %v3489_v24, 20.0 }
 0x259   : > { %v1675_v25 = vsel %vm1674_vm10, %v3475_v3, %v1673_v44  ;;  %v1682_v29 = vmul.f32 0.5, %v1681_v26  ;;  %v1276_v51 = vadd.f32 1.0, %v2307_v31  ;;  %v1275_v38 = vsel %vm1274_vm12, %v1272_v33, %v1269_v13 }
 0x25a   : > { %v1678_v30 = vsel %vm1676_vm11, %v1677_v21, %v1675_v25  ;;  %v1279_v17 = vmul.f32 -0.5, %v2307_v31  ;;  %v1013_v39 = vmul.f32 1.442695, %v950_v62  ;;  %v1331_v43 = vsel %vm915_vm13, %v3465_v23, %v1275_v38 }
 0x25b   : > { %v1776_v37 = vmax.f32 %v1678_v30, 1e-05  ;;  %v1683_v49 = vsub.f32 1.5, %v1682_v29  ;;  %2312 = vlog2.f32 %v1276_v51  ;;  %v3549_v60 = vadd.f32 1e-08, %v1331_v43 }
 0x25c   : > { %v2309_v53 = vpop.eup %2308  ;;  %2314 = vpow2.f32 %v1013_v39  ;;  %v1280_v56 = vadd.f32 1.0, %v1279_v17  ;;  %v1282_v41 = vand.u32 2147483647, %v2307_v31  ;;  %v1689_v23 = vand.u32 2147483648, %v3501_v45 }
 0x25d   : > { %v1808_v3 = vmin.f32 %v1776_v37, 100000.0  ;;  %v1692_v48 = vmul.f32 %v2309_v53, %v3529_v9  ;;  %v1684_v6 = vmul.f32 %v2303_v12, %v1683_v49  ;;  %2316 = vrsqrt.f32 %v3549_v60 }
 0x25e   : > { %v2311_v46 = vpop.eup %2310  ;;  %v1281_v22 = vmul.f32 %v2307_v31, %v1280_v56  ;;  %vm1283_vm1 = vcmp.lt.f32.partialorder %v1282_v41, 0.0004427343  ;;  %vm1698_vm2 = vcmp.eq.f32.partialorder %v3529_v9, inf  ;;  %v1701_v12 = vand.u32 2147483648, %v3529_v9 }
 0x25f   : > { %1872 = vst [vmem:[%s2755_s23 + $0x260] sm:$0xff] %v1808_v3  ;;  %v1693_v50 = vmul.f32 %v2309_v53, %v1692_v48  ;;  %v1685_v52 = vmul.f32 %v1684_v6, %v3501_v45  ;;  %v1285_v59 = vadd.f32 1.0, %v2311_v46  ;;  %v1288_v54 = vmul.f32 -0.5, %v2311_v46 }
 0x260   : > { %v1291_v5 = vand.u32 2147483647, %v2311_v46  ;;  %vm1700_vm3 = vcmp.eq.f32.partialorder %v3529_v9, 0.0  ;;  %vm917_vm5 = vcmp.gt.f32.partialorder %v3522_v16, 20.0  ;;  %vm1710_vm7 = vcmp.eq.f32.partialorder %v3549_v60, inf }
 0x261   : > { %v1694_v61 = vmul.f32 0.5, %v1693_v50  ;;  %v2313_v32 = vpop.eup %2312  ;;  %v1687_v0 = vsel %vm1686_vm14, %v3501_v45, %v1685_v52  ;;  %2318 = vlog2.f32 %v1285_v59  ;;  %v1289_v57 = vadd.f32 1.0, %v1288_v54 }
 0x262   : > { %v1690_v63 = vsel %vm1688_vm15, %v1689_v23, %v1687_v0  ;;  %v1278_v1 = vmul.f32 0.6931472, %v2313_v32  ;;  %v2315_v27 = vpop.eup %2314  ;;  %vm1292_vm4 = vcmp.lt.f32.partialorder %v1291_v5, 0.0004427343  ;;  %v1713_v38 = vand.u32 2147483648, %v3549_v60 }
 0x263   : > { %v1695_v34 = vsub.f32 1.5, %v1694_v61  ;;  %v1777_v58 = vmax.f32 %v1690_v63, 1e-05  ;;  %v2317_v20 = vpop.eup %2316  ;;  %v1294_v35 = vadd.f32 1.0, %v2315_v27  ;;  %v1297_v10 = vmul.f32 -0.5, %v2315_v27 }
 0x264   : > { %v1284_v2 = vsel %vm1283_vm1, %v1281_v22, %v1278_v1  ;;  %v1704_v45 = vmul.f32 %v2317_v20, %v3549_v60  ;;  %v1290_v15 = vmul.f32 %v2311_v46, %v1289_v57  ;;  %v1300_v25 = vand.u32 2147483647, %v2315_v27 }
 0x265   : > { %v1696_v19 = vmul.f32 %v2309_v53, %v1695_v34  ;;  %v1809_v4 = vmin.f32 %v1777_v58, 100000.0  ;;  %v1332_v36 = vsel %vm916_vm0, %v3489_v24, %v1284_v2  ;;  %2320 = vlog2.f32 %v1294_v35 }
 0x266   : > { %v3562_v8 = vadd.f32 1e-08, %v1332_v36  ;;  %v1705_v55 = vmul.f32 %v2317_v20, %v1704_v45  ;;  %v1298_v21 = vadd.f32 1.0, %v1297_v10  ;;  %vm1301_vm6 = vcmp.lt.f32.partialorder %v1300_v25, 0.0004427343 }
 0x267   : > { %v1697_v7 = vmul.f32 %v1696_v19, %v3529_v9  ;;  %v2319_v40 = vpop.eup %2318  ;;  %1873 = vst [vmem:[%s2755_s23 + $0x278] sm:$0xff] %v1809_v4  ;;  %vm918_vm8 = vcmp.gt.f32.partialorder %v3533_v11, 20.0  ;;  %vm1712_vm9 = vcmp.eq.f32.partialorder %v3549_v60, 0.0 }
 0x268   : > { %2322 = vrsqrt.f32 %v3562_v8  ;;  %v1706_v14 = vmul.f32 0.5, %v1705_v55  ;;  %v1287_v44 = vmul.f32 0.6931472, %v2319_v40  ;;  %v1299_v37 = vmul.f32 %v2315_v27, %v1298_v21 }
 0x269   : > { %v1699_v42 = vsel %vm1698_vm2, %v3529_v9, %v1697_v7  ;;  %vm1722_vm10 = vcmp.eq.f32.partialorder %v3562_v8, inf  ;;  %vm1724_vm11 = vcmp.eq.f32.partialorder %v3562_v8, 0.0 }
 0x26a   : > { %v1702_v24 = vsel %vm1700_vm3, %v1701_v12, %v1699_v42  ;;  %v1707_v47 = vsub.f32 1.5, %v1706_v14  ;;  %v1293_v28 = vsel %vm1292_vm4, %v1290_v15, %v1287_v44 }
 0x26b   : > { %v1778_v18 = vmax.f32 %v1702_v24, 1e-05  ;;  %v2321_v26 = vpop.eup %2320  ;;  %v1333_v31 = vsel %vm917_vm5, %v3522_v16, %v1293_v28 }
 0x26c   : > { %v1708_v9 = vmul.f32 %v2317_v20, %v1707_v47  ;;  %v1365_v30 = vadd.f32 1e-08, %v1333_v31  ;;  %v1296_v13 = vmul.f32 0.6931472, %v2321_v26 }
 0x26d   : > { %v1810_v62 = vmin.f32 %v1778_v18, 100000.0 }
 0x26e   : > { %v2323_v33 = vpop.eup %2322  ;;  %v1709_v29 = vmul.f32 %v1708_v9, %v3549_v60  ;;  %2324 = vrsqrt.f32 %v1365_v30  ;;  %v1302_v16 = vsel %vm1301_vm6, %v1299_v37, %v1296_v13  ;;  %vm1734_vm12 = vcmp.eq.f32.partialorder %v1365_v30, inf }
 0x26f   : > { %1874 = vst [vmem:[%s2755_s23 + $0x290] sm:$0xff] %v1810_v62  ;;  %v1716_v51 = vmul.f32 %v2323_v33, %v3562_v8  ;;  %v1334_v53 = vsel %vm918_vm8, %v3533_v11, %v1302_v16  ;;  %v1725_v11 = vand.u32 2147483648, %v3562_v8  ;;  %v1737_v20 = vand.u32 2147483648, %v1365_v30 }
 0x270   : > { %v1711_v17 = vsel %vm1710_vm7, %v3549_v60, %v1709_v29  ;;  %v1366_v49 = vadd.f32 1e-08, %v1334_v53  ;;  %vm1736_vm13 = vcmp.eq.f32.partialorder %v1365_v30, 0.0 }
 0x271   : > { %v1717_v39 = vmul.f32 %v2323_v33, %v1716_v51  ;;  %v1714_v3 = vsel %vm1712_vm9, %v1713_v38, %v1711_v17 }
 0x272   : > { %v1779_v43 = vmax.f32 %v1714_v3, 1e-05  ;;  %2326 = vrsqrt.f32 %v1366_v49  ;;  %vm1746_vm14 = vcmp.eq.f32.partialorder %v1366_v49, inf  ;;  %v1749_v57 = vand.u32 2147483648, %v1366_v49 }
 0x273   : > { %v1718_v48 = vmul.f32 0.5, %v1717_v39  ;;  %vm1748_vm15 = vcmp.eq.f32.partialorder %v1366_v49, 0.0 }
 0x274   : > { %v2325_v6 = vpop.eup %2324  ;;  %v1811_v46 = vmin.f32 %v1779_v43, 100000.0 }
 0x275   : > { %v1719_v50 = vsub.f32 1.5, %v1718_v48  ;;  %v1728_v56 = vmul.f32 %v2325_v6, %v1365_v30 }
 0x276   : > { %1875 = vst [vmem:[%s2755_s23 + $0x2a8] sm:$0xff] %v1811_v46 }
 0x277   : > { %v1720_v52 = vmul.f32 %v2323_v33, %v1719_v50  ;;  %v1729_v41 = vmul.f32 %v2325_v6, %v1728_v56 }
 0x278   : > { %v2327_v23 = vpop.eup %2326 }
 0x279   : > { %v1721_v59 = vmul.f32 %v1720_v52, %v3562_v8  ;;  %v1730_v60 = vmul.f32 0.5, %v1729_v41  ;;  %v1740_v32 = vmul.f32 %v2327_v23, %v1366_v49 }
 0x27b   : > { %v1723_v61 = vsel %vm1722_vm10, %v3562_v8, %v1721_v59  ;;  %v1731_v54 = vsub.f32 1.5, %v1730_v60  ;;  %v1741_v34 = vmul.f32 %v2327_v23, %v1740_v32 }
 0x27c   : > { %v1726_v0 = vsel %vm1724_vm11, %v1725_v11, %v1723_v61 }
 0x27d   : > { %v1780_v63 = vmax.f32 %v1726_v0, 1e-05  ;;  %v1732_v1 = vmul.f32 %v2325_v6, %v1731_v54  ;;  %v1742_v27 = vmul.f32 0.5, %v1741_v34 }
 0x27f   : > { %v1812_v22 = vmin.f32 %v1780_v63, 100000.0  ;;  %v1733_v58 = vmul.f32 %v1732_v1, %v1365_v30  ;;  %v1743_v19 = vsub.f32 1.5, %v1742_v27 }
 0x281   : > { %1876 = vst [vmem:[%s2755_s23 + $0x2c0] sm:$0xff] %v1812_v22  ;;  %v1735_v2 = vsel %vm1734_vm12, %v1365_v30, %v1733_v58  ;;  %v1744_v35 = vmul.f32 %v2327_v23, %v1743_v19 }
 0x282   : > { %v1738_v5 = vsel %vm1736_vm13, %v1737_v20, %v1735_v2 }
 0x283   : > { %v1781_v4 = vmax.f32 %v1738_v5, 1e-05  ;;  %v1745_v45 = vmul.f32 %v1744_v35, %v1366_v49 }
 0x285   : > { %v1813_v36 = vmin.f32 %v1781_v4, 100000.0  ;;  %v1747_v7 = vsel %vm1746_vm14, %v1366_v49, %v1745_v45 }
 0x286   : > { %v1750_v8 = vsel %vm1748_vm15, %v1749_v57, %v1747_v7 }
 0x287   : > { %1877 = vst [vmem:[%s2755_s23 + $0x2d8] sm:$0xff] %v1813_v36  ;;  %v1782_v10 = vmax.f32 %v1750_v8, 1e-05 }
 0x289   : > { %v1814_v40 = vmin.f32 %v1782_v10, 100000.0 }
 0x28b   : > { %1878 = vst [vmem:[%s2755_s23 + $0x2f0] sm:$0xff] %v1814_v40 }
 0x28c   : > { %2476 = shalt.err (!%p2473_p10)
}
 0x28d   : > { %s2532_s26 = smov 384   ;;  %s2533_s12 = smov 24  }
 0x28e   : > { %2066 = dma.vmem_to_hbm [thread:$0]  (%p2649_p3), %s1926_s7, 12288, %s1928_s22, %s1912_s16, %s2532_s26, %s2532_s26, %s2533_s12  }
 0x28f PF: > { %s1942_s23 = sand.u32 1, %s2511_s18   ;;  %p3656_p12 = scmp.ge.s32.totalorder %s2523_s21, 2 }
 0x290   : > { %s1943_s27 = scalar_lea.sflag [#allocation4], %s1942_s23 }
 0x291   : > { %p2083_p13 = pnand %p3656_p12, %p2599_p6 }
 0x293   : > { %p2084_p0 = pneg %p2083_p13 }
 0x295   : > { %2506 = dma.done.wait (%p2084_p0), %s1943_s27, 12288  }
 0x296   : > { %2508 = vsyncadd (%p2084_p0), %s1943_s27, 4294955008  ;;  %p20_p5 = scmp.ge.s32.totalorder %s2636_s30, 4   ;;  %s3657_s18 = smov %s2515_s19 }
 0x297   : > { %s3658_s19 = smov %s2519_s20  ;;  %s3659_s20 = smov %s2645_s9 }
 0x298   : > { %s3660_s21 = smov %s2636_s30  ;;  %22 = sbr.rel (!%p20_p5) target bundleno = 7 (0x7), region = 97 }
 0x29d   :  { %1949 = vsyncpa [#allocation3], 1 }
 0x29e   :  { %1951 = vsyncpa [#allocation3 + $0x1], 1 }
 0x29f   :  { %1952 = vsyncpa [#allocation6], 1 }
 0x2a0   :  { %1953 = vsyncpa [#allocation9], 1 }
 0x2a1   :  { %1954 = vsyncpa [#allocation4], 1 }
 0x2a2   :  { %1956 = vsyncpa [#allocation4 + $0x1], 1 }

// kernel: tpu_custom_call.1
= control target key start
LH: loop header
LB: loop body
LE: loop exit
PB: predicated region body
PF: predicated region fallthrough
CT: control target
= control target key end

     0   :  { %10 = vsyncpa [#allocation3], 0  ;;  %s3624_s0 = inlined_call_operand.hbm [shape: f32[512,128], index: 0, kind: input, shape index: {}]   ;;  %s3625_s1 = inlined_call_operand.hbm [shape: f32[128,128], index: 1, kind: input, shape index: {}]   ;;  %s3626_s2 = inlined_call_operand.hbm [shape: f32[1,128], index: 2, kind: input, shape index: {}]   ;;  %s3627_s3 = inlined_call_operand.hbm [shape: f32[128,384], index: 3, kind: input, shape index: {}]   ;;  %s3628_s4 = inlined_call_operand.vmem [shape: f32[1,384], index: 4, kind: input, shape index: {}]   ;;  %s3629_s5 = inlined_call_operand.hbm [shape: f32[512,384], index: 5, kind: output, shape index: {}]  }
   0x1   :  { %12 = vsyncpa [#allocation3 + $0x1], 0 }
   0x2   :  { %13 = vsyncpa [#allocation6], 0 }
   0x3   :  { %14 = vsyncpa [#allocation9], 0 }
   0x4   :  { %15 = vsyncpa [#allocation4], 0 }
   0x5   :  { %17 = vsyncpa [#allocation4 + $0x1], 0  ;;  %s2564_s18 = smov 0   ;;  %s2566_s19 = smov 0  }
   0x6   :  { %s2568_s20 = smov 0   ;;  %s2570_s21 = smov 0  }
   0x7 LB: > { %s2585_s22 = sadd.s32 4294967295, %s2523_s21   ;;  %s2030_s23 = sadd.s32 4294967294, %s2523_s21   ;;  %s2523_s21 = sphi %s2570_s21, %s3660_s21   ;;  %s2519_s20 = sphi %s2568_s20, %s3659_s20   ;;  %s2515_s19 = sphi %s2566_s19, %s3658_s19   ;;  %s2511_s18 = sphi %s2564_s18, %s3657_s18  }
   0x8   : > { %p43_p0 = scmp.ne.s32.totalorder %s2515_s19, %s2511_s18  ;;  %p44_p1 = scmp.eq.s32.totalorder %s2585_s22, 0 }
   0x9   : > { %p151_p2 = scmp.eq.s32.totalorder %s2585_s22, 1  ;;  %p157_p3 = scmp.eq.s32.totalorder %s2030_s23, 1 }
   0xa   : > { %p2594_p4 = por %p44_p1, %p43_p0  ;;  %p2031_p5 = scmp.ge.s32.totalorder %s2523_s21, 1 }
   0xb   : > { %p2599_p6 = por %p157_p3, %p43_p0  ;;  %p164_p7 = scmp.lt.s32.totalorder %s2523_s21, 3 }
   0xc   : > { %s175_s28 = sshll.u32 %s3625_s1, 4  ;;  %s2525_s30 = smov [#allocation5]   ;;  %s176_s28 = int_to_ptr.hbm [resolvable:$true] %s175_s28 }
   0xd   : > { %p2607_p8 = pnand %p2031_p5, %p164_p7  ;;  %s177_s6 = sshll.u32 %s2525_s30, 4  ;;  %s178_s6 = int_to_ptr.vmem [resolvable:$true] %s177_s6 }
   0xe   : > { %s190_s10 = sshll.u32 %s3626_s2, 4  ;;  %s3630_s11 = smov 128   ;;  %s191_s10 = int_to_ptr.hbm [resolvable:$true] %s190_s10 }
   0xf   : > { %p2068_p9 = pneg %p2607_p8  ;;  %s2527_s12 = smov 8  }
  0x10   : > { %s2528_s13 = smov [#allocation7]   ;;  %s201_s17 = sshll.u32 %s3627_s3, 4  ;;  %s202_s17 = int_to_ptr.hbm [resolvable:$true] %s201_s17 }
  0x11   : > { %p2615_p10 = pnand %p2068_p9, %p44_p1  ;;  %s192_s14 = sshll.u32 %s2528_s13, 4  ;;  %s193_s14 = int_to_ptr.vmem [resolvable:$true] %s192_s14 }
  0x12   : > { %s2529_s23 = smov [#allocation8]   ;;  %s2530_s27 = smov 384  }
  0x13   : > { %2071 = dma.hbm_to_vmem [thread:$0]  (!%p2615_p10), %s176_s28, 2048, %s178_s6, [#allocation6], %s3630_s11, %s3630_s11, %s2527_s12  }
  0x14   : > { %2074 = dma.hbm_to_vmem [thread:$0]  (!%p2615_p10), %s191_s10, 16, %s193_s14, [#allocation6]  }
  0x15   : > { %s203_s26 = sshll.u32 %s2529_s23, 4  ;;  %s2531_s28 = smov 24   ;;  %s204_s26 = int_to_ptr.vmem [resolvable:$true] %s203_s26 }
  0x16   : > { %2077 = dma.hbm_to_vmem [thread:$0]  (!%p2615_p10), %s202_s17, 6144, %s204_s26, [#allocation9], %s2530_s27, %s2530_s27, %s2531_s28  }
  0x17   : > { %s2636_s30 = sadd.s32 1, %s2523_s21   ;;  %s30_s8 = sadd.s32 1, %s2519_s20 }
  0x18   : > { %s27_s6 = ssub.s32 %s2523_s21, %s2636_s30  ;;  %p37_p13 = scmp.ne.s32.totalorder %s2519_s20, %s2515_s19 }
  0x19   : > { %p28_p12 = scmp.eq.s32.totalorder %s27_s6, 0  ;;  %p38_p0 = scmp.eq.s32.totalorder %s2523_s21, 0 }
  0x1a   : > { %p2649_p3 = por %p151_p2, %p37_p13  ;;  %p2089_p5 = scmp.lt.s32.totalorder %s2523_s21, 2 }
  0x1b   : > { %s2645_s9 = scalar_select %p28_p12, %s2519_s20, %s30_s8  }
  0x1c   : > { %s220_s13 = sand.u32 1, %s2519_s20   ;;  %s2049_s14 = sshll.u32 %s2523_s21, 8 }
  0x1d   : > { %p39_p7 = por %p38_p0, %p37_p13  ;;  %s2036_s7 = sshll.u32 %s220_s13, 8 }
  0x1e   : > { %s229_s17 = scalar_lea.hbm %s3624_s0, %s2049_s14  ;;  %s224_s26 = scalar_lea.vmem [#allocation2], %s2036_s7 }
  0x1f   : > { %s230_s23 = sshll.u32 %s229_s17, 4  ;;  %s232_s27 = sshll.u32 %s224_s26, 4  ;;  %s231_s23 = int_to_ptr.hbm [resolvable:$true] %s230_s23  ;;  %s233_s27 = int_to_ptr.vmem [resolvable:$true] %s232_s27 }
  0x20   : > { %p2659_p9 = pnand %p2089_p5, %p39_p7  ;;  %s221_s6 = scalar_lea.sflag [#allocation3], %s220_s13 }
  0x21   : > { %s2419_s8 = sshra.s32 %s231_s23, 4  ;;  %s2426_s7 = scalar_lea.hbm %s3624_s0, 512  ;;  %s2420_s8 = int_to_ptr.hbm [resolvable:$true] %s2419_s8 }
  0x22   : > { %s2421_s11 = scalar_lea.hbm %s2420_s8, 256  ;;  %p2423_p10 = pneg %p2659_p9 }
  0x23   : > { %p2422_p2 = scmp.ne.s32.totalorder %s2420_s8, %s2421_s11  ;;  %p2427_p0 = scmp.lt.s32.totalorder %s2420_s8, %s3624_s0 }
  0x24   : > { %p2428_p5 = scmp.lt.s32.totalorder %s2426_s7, %s2421_s11 }
  0x25   : > { %p2424_p12 = pnand %p2423_p10, %p2422_p2 }
  0x26   : > { %p2429_p7 = por %p2428_p5, %p2427_p0 }
  0x27   : > { %p2425_p13 = pneg %p2424_p12 }
  0x29   : > { %p2430_p11 = pnand %p2429_p7, %p2425_p13 }
  0x2b   : > { %2433 = shalt.err (!%p2430_p11)
}
  0x2c   : > { %s3637_s13 = smov 128   ;;  %244 = sbr.rel (%p2607_p8) target bundleno = 655 (0x28f), region = 40 }
  0x2d   : > { %2081 = dma.hbm_to_vmem [thread:$0]  (!%p2659_p9), %s231_s23, 4096, %s233_s27, %s221_s6, %s3637_s13, %s3637_s13, %s2527_s12  }
  0x2e   : > { %s2679_s26 = sand.u32 (!%p2607_p8), 1, %s2515_s19  }
  0x2f   : > { %s2040_s8 = sshll.u32 (!%p2607_p8), %s2679_s26, 8  ;;  %s247_s11 = scalar_lea.sflag (!%p2607_p8), [#allocation3], %s2679_s26 }
  0x30   : > { %s2683_s14 = scalar_lea.vmem (!%p2607_p8), [#allocation2], %s2040_s8 }
  0x31   : > { %2494 = dma.done.wait (%p2594_p4), %s247_s11, 4096  }
  0x32   : > { %2496 = vsyncadd (%p2594_p4), %s247_s11, 4294963200 }
  0x33   : > { %2498 = dma.done.wait (%p44_p1), [#allocation6], 2064  }
  0x34   : > { %2500 = vsyncadd (%p44_p1), [#allocation6], 4294965232 }
  0x35   : > { %2502 = dma.done.wait (%p44_p1), [#allocation9], 6144  }
  0x36   : > { %2504 = vsyncadd (%p44_p1), [#allocation9], 4294961152  ;;  %v342_v0 = vld [vmem:[#allocation5 + $0x78] sm:$0xff]  ;;  %v341_v1 = vld [vmem:[#allocation5 + $0x70] sm:$0xff]  ;;  %s2050_s12 = smul.u32 768, %s2679_s26  ;;  %s1912_s16 = scalar_lea.sflag [#allocation4], %s2679_s26 }
  0x37   : > { %347 = vmatpush.msra.mxu0 %v342_v0  ;;  %v340_v2 = vld [vmem:[#allocation5 + $0x68] sm:$0xff]  ;;  %v339_v3 = vld [vmem:[#allocation5 + $0x60] sm:$0xff]  ;;  %v338_v4 = vld [vmem:[#allocation5 + $0x58] sm:$0xff]  ;;  %s2051_s27 = smul.u32 768, %s2585_s22 }
  0x38   : > { %v337_v5 = vld [vmem:[#allocation5 + $0x50] sm:$0xff]  ;;  %v336_v6 = vld [vmem:[#allocation5 + $0x48] sm:$0xff]  ;;  %v335_v7 = vld [vmem:[#allocation5 + $0x40] sm:$0xff]  ;;  %s2755_s23 = scalar_lea.vmem [#allocation10], %s2050_s12 }
  0x39   : > { %348 = vmatpush.msra.mxu0 %v341_v1  ;;  %v334_v8 = vld [vmem:[#allocation5 + $0x38] sm:$0xff]  ;;  %v333_v9 = vld [vmem:[#allocation5 + $0x30] sm:$0xff]  ;;  %v332_v10 = vld [vmem:[#allocation5 + $0x28] sm:$0xff]  ;;  %s1924_s15 = scalar_lea.hbm %s3629_s5, %s2051_s27  ;;  %s1925_s7 = sshll.u32 %s2755_s23, 4  ;;  %s1926_s7 = int_to_ptr.vmem [resolvable:$true] %s1925_s7 }
  0x3a   : > { %v331_v11 = vld [vmem:[#allocation5 + $0x20] sm:$0xff]  ;;  %v330_v12 = vld [vmem:[#allocation5 + $0x18] sm:$0xff]  ;;  %v329_v13 = vld [vmem:[#allocation5 + $0x10] sm:$0xff]  ;;  %s1927_s22 = sshll.u32 %s1924_s15, 4  ;;  %s1928_s22 = int_to_ptr.hbm [resolvable:$true] %s1927_s22 }
  0x3b   : > { %349 = vmatpush.msra.mxu0 %v340_v2  ;;  %v328_v14 = vld [vmem:[#allocation5 + $0x8] sm:$0xff]  ;;  %v327_v15 = vld [vmem:[#allocation5] sm:$0xff]  ;;  %v297_v18 = vld [vmem:[%s2683_s14 + $0x10] sm:$0xff]  ;;  %s2463_s17 = sshra.s32 %s1928_s22, 4  ;;  %s2464_s17 = int_to_ptr.hbm [resolvable:$true] %s2463_s17 }
  0x3c   : > { %v295_v16 = vld [vmem:[%s2683_s14] sm:$0xff]  ;;  %v296_v17 = vld [vmem:[%s2683_s14 + $0x8] sm:$0xff]  ;;  %v298_v19 = vld [vmem:[%s2683_s14 + $0x18] sm:$0xff]  ;;  %s2465_s13 = scalar_lea.hbm %s2464_s17, 768  ;;  %p2470_p11 = scmp.lt.s32.totalorder %s2464_s17, %s3629_s5 }
  0x3d   : > { %350 = vmatpush.msra.mxu0 %v339_v3  ;;  %v299_v20 = vld [vmem:[%s2683_s14 + $0x20] sm:$0xff]  ;;  %v300_v21 = vld [vmem:[%s2683_s14 + $0x28] sm:$0xff]  ;;  %v301_v22 = vld [vmem:[%s2683_s14 + $0x30] sm:$0xff]  ;;  %p2466_p1 = scmp.ne.s32.totalorder %s2464_s17, %s2465_s13 }
  0x3e   : > { %v302_v23 = vld [vmem:[%s2683_s14 + $0x38] sm:$0xff]  ;;  %v303_v24 = vld [vmem:[%s2683_s14 + $0x40] sm:$0xff]  ;;  %v537_v25 = vld [vmem:[#allocation8 + $0x168] sm:$0xff] }
  0x3f   : > { %351 = vmatpush.msra.mxu0 %v338_v4  ;;  %v538_v26 = vld [vmem:[#allocation8 + $0x170] sm:$0xff]  ;;  %v539_v27 = vld [vmem:[#allocation8 + $0x178] sm:$0xff]  ;;  %548 = vmatpush.msra.mxu1 %v537_v25  ;;  %v536_v30 = vld [vmem:[#allocation8 + $0x160] sm:$0xff]  ;;  %p2467_p4 = pnand %p2466_p1, %p2649_p3 }
  0x40   : > { %661 = vmatpush.msra.mxu2 %v538_v26  ;;  %v534_v28 = vld [vmem:[#allocation8 + $0x150] sm:$0xff]  ;;  %v535_v29 = vld [vmem:[#allocation8 + $0x158] sm:$0xff]  ;;  %774 = vmatpush.msra.mxu3 %v539_v27  ;;  %v532_v32 = vld [vmem:[#allocation8 + $0x140] sm:$0xff] }
  0x41   : > { %352 = vmatpush.msra.mxu0 %v337_v5  ;;  %v531_v31 = vld [vmem:[#allocation8 + $0x138] sm:$0xff]  ;;  %549 = vmatpush.msra.mxu1 %v534_v28  ;;  %v533_v33 = vld [vmem:[#allocation8 + $0x148] sm:$0xff]  ;;  %v528_v35 = vld [vmem:[#allocation8 + $0x120] sm:$0xff]  ;;  %p2468_p8 = pneg %p2467_p4 }
  0x42   : > { %662 = vmatpush.msra.mxu2 %v535_v29  ;;  %775 = vmatpush.msra.mxu3 %v536_v30  ;;  %v304_v34 = vld [vmem:[%s2683_s14 + $0x48] sm:$0xff]  ;;  %v530_v37 = vld [vmem:[#allocation8 + $0x130] sm:$0xff]  ;;  %v527_v40 = vld [vmem:[#allocation8 + $0x118] sm:$0xff] }
  0x43   : > { %353 = vmatpush.msra.mxu0 %v336_v6  ;;  %550 = vmatpush.msra.mxu1 %v531_v31  ;;  %v529_v36 = vld [vmem:[#allocation8 + $0x128] sm:$0xff]  ;;  %v526_v39 = vld [vmem:[#allocation8 + $0x110] sm:$0xff]  ;;  %v523_v42 = vld [vmem:[#allocation8 + $0xf8] sm:$0xff] }
  0x44   : > { %663 = vmatpush.msra.mxu2 %v532_v32  ;;  %776 = vmatpush.msra.mxu3 %v533_v33  ;;  %v525_v38 = vld [vmem:[#allocation8 + $0x108] sm:$0xff]  ;;  %v522_v41 = vld [vmem:[#allocation8 + $0xf0] sm:$0xff]  ;;  %v524_v43 = vld [vmem:[#allocation8 + $0x100] sm:$0xff] }
  0x45   : > { %354 = vmatpush.msra.mxu0 %v335_v7  ;;  %551 = vmatpush.msra.mxu1 %v528_v35  ;;  %v519_v44 = vld [vmem:[#allocation8 + $0xd8] sm:$0xff]  ;;  %v520_v45 = vld [vmem:[#allocation8 + $0xe0] sm:$0xff]  ;;  %v305_v46 = vld [vmem:[%s2683_s14 + $0x50] sm:$0xff] }
  0x46   : > { %664 = vmatpush.msra.mxu2 %v529_v36  ;;  %777 = vmatpush.msra.mxu3 %v530_v37  ;;  %v521_v47 = vld [vmem:[#allocation8 + $0xe8] sm:$0xff]  ;;  %v516_v48 = vld [vmem:[#allocation8 + $0xc0] sm:$0xff]  ;;  %v518_v50 = vld [vmem:[#allocation8 + $0xd0] sm:$0xff] }
  0x47   : > { %355 = vmatpush.msra.mxu0 %v334_v8  ;;  %552 = vmatpush.msra.mxu1 %v525_v38  ;;  %v517_v49 = vld [vmem:[#allocation8 + $0xc8] sm:$0xff]  ;;  %v514_v52 = vld [vmem:[#allocation8 + $0xb0] sm:$0xff]  ;;  %v515_v53 = vld [vmem:[#allocation8 + $0xb8] sm:$0xff] }
  0x48   : > { %665 = vmatpush.msra.mxu2 %v526_v39  ;;  %778 = vmatpush.msra.mxu3 %v527_v40  ;;  %v513_v51 = vld [vmem:[#allocation8 + $0xa8] sm:$0xff]  ;;  %v510_v54 = vld [vmem:[#allocation8 + $0x90] sm:$0xff]  ;;  %v511_v55 = vld [vmem:[#allocation8 + $0x98] sm:$0xff] }
  0x49   : > { %356 = vmatpush.msra.mxu0 %v333_v9  ;;  %553 = vmatpush.msra.mxu1 %v522_v41  ;;  %v512_v56 = vld [vmem:[#allocation8 + $0xa0] sm:$0xff]  ;;  %v507_v57 = vld [vmem:[#allocation8 + $0x78] sm:$0xff]  ;;  %v509_v60 = vld [vmem:[#allocation8 + $0x88] sm:$0xff] }
  0x4a   : > { %666 = vmatpush.msra.mxu2 %v523_v42  ;;  %779 = vmatpush.msra.mxu3 %v524_v43  ;;  %v508_v58 = vld [vmem:[#allocation8 + $0x80] sm:$0xff]  ;;  %v306_v59 = vld [vmem:[%s2683_s14 + $0x58] sm:$0xff]  ;;  %v505_v62 = vld [vmem:[#allocation8 + $0x68] sm:$0xff] }
  0x4b   : > { %357 = vmatpush.msra.mxu0 %v332_v10  ;;  %554 = vmatpush.msra.mxu1 %v519_v44  ;;  %v504_v61 = vld [vmem:[#allocation8 + $0x60] sm:$0xff]  ;;  %v506_v63 = vld [vmem:[#allocation8 + $0x70] sm:$0xff]  ;;  %v501_v0 = vld [vmem:[#allocation8 + $0x48] sm:$0xff] }
  0x4c   : > { %667 = vmatpush.msra.mxu2 %v520_v45  ;;  %780 = vmatpush.msra.mxu3 %v521_v47  ;;  %v502_v1 = vld [vmem:[#allocation8 + $0x50] sm:$0xff]  ;;  %v503_v2 = vld [vmem:[#allocation8 + $0x58] sm:$0xff]  ;;  %v500_v5 = vld [vmem:[#allocation8 + $0x40] sm:$0xff] }
  0x4d   : > { %358 = vmatpush.msra.mxu0 %v331_v11  ;;  %555 = vmatpush.msra.mxu1 %v516_v48  ;;  %v498_v3 = vld [vmem:[#allocation8 + $0x30] sm:$0xff]  ;;  %v499_v4 = vld [vmem:[#allocation8 + $0x38] sm:$0xff]  ;;  %v496_v8 = vld [vmem:[#allocation8 + $0x20] sm:$0xff] }
  0x4e   : > { %668 = vmatpush.msra.mxu2 %v517_v49  ;;  %781 = vmatpush.msra.mxu3 %v518_v50  ;;  %v307_v6 = vld [vmem:[%s2683_s14 + $0x60] sm:$0xff]  ;;  %v497_v9 = vld [vmem:[#allocation8 + $0x28] sm:$0xff]  ;;  %v314_v30 = vld [vmem:[%s2683_s14 + $0x98] sm:$0xff] }
  0x4f   : > { %359 = vmatpush.msra.mxu0 %v330_v12  ;;  %556 = vmatpush.msra.mxu1 %v513_v51  ;;  %v495_v7 = vld [vmem:[#allocation8 + $0x18] sm:$0xff]  ;;  %v492_v10 = vld [vmem:[#allocation8] sm:$0xff]  ;;  %v493_v11 = vld [vmem:[#allocation8 + $0x8] sm:$0xff] }
  0x50   : > { %669 = vmatpush.msra.mxu2 %v514_v52  ;;  %782 = vmatpush.msra.mxu3 %v515_v53  ;;  %v494_v12 = vld [vmem:[#allocation8 + $0x10] sm:$0xff]  ;;  %v316_v38 = vld [vmem:[%s2683_s14 + $0xa8] sm:$0xff]  ;;  %v319_v50 = vld [vmem:[%s2683_s14 + $0xc0] sm:$0xff] }
  0x51   : > { %360 = vmatpush.msra.mxu0 %v329_v13  ;;  %557 = vmatpush.msra.mxu1 %v510_v54  ;;  %v308_v13 = vld [vmem:[%s2683_s14 + $0x68] sm:$0xff]  ;;  %v313_v26 = vld [vmem:[%s2683_s14 + $0x90] sm:$0xff] }
  0x52   : > { %670 = vmatpush.msra.mxu2 %v511_v55  ;;  %783 = vmatpush.msra.mxu3 %v512_v56  ;;  %v317_v42 = vld [vmem:[%s2683_s14 + $0xb0] sm:$0xff]  ;;  %v320_v54 = vld [vmem:[%s2683_s14 + $0xc8] sm:$0xff] }
  0x53   : > { %361 = vmatpush.msra.mxu0 %v328_v14  ;;  %558 = vmatpush.msra.mxu1 %v507_v57  ;;  %v309_v14 = vld [vmem:[%s2683_s14 + $0x70] sm:$0xff] }
  0x54   : > { %671 = vmatpush.msra.mxu2 %v508_v58  ;;  %784 = vmatpush.msra.mxu3 %v509_v60  ;;  %v321_v58 = vld [vmem:[%s2683_s14 + $0xd0] sm:$0xff] }
  0x55   : > { %362 = vmatpush.msra.mxu0 %v327_v15  ;;  %559 = vmatpush.msra.mxu1 %v504_v61  ;;  %v310_v15 = vld [vmem:[%s2683_s14 + $0x78] sm:$0xff] }
  0x56   : > { %363 = vmatmul.f32.vlgmr.msra.gmra.mxu0 %v295_v16  ;;  %672 = vmatpush.msra.mxu2 %v505_v62  ;;  %v2713_v16 = vld [vmem:[#allocation7] ss:$0 sm:$0xff]  ;;  %v322_v62 = vld [vmem:[%s2683_s14 + $0xd8] sm:$0xff] }
  0x57   : > { %785 = vmatpush.msra.mxu3 %v506_v63  ;;  %560 = vmatpush.msra.mxu1 %v501_v0 }
  0x58   : > { %673 = vmatpush.msra.mxu2 %v502_v1 }
  0x59   : > { %786 = vmatpush.msra.mxu3 %v503_v2  ;;  %561 = vmatpush.msra.mxu1 %v498_v3  ;;  %v323_v2 = vld [vmem:[%s2683_s14 + $0xe0] sm:$0xff] }
  0x5a   : > { %674 = vmatpush.msra.mxu2 %v499_v4 }
  0x5b   : > { %787 = vmatpush.msra.mxu3 %v500_v5  ;;  %562 = vmatpush.msra.mxu1 %v495_v7 }
  0x5c   : > { %675 = vmatpush.msra.mxu2 %v496_v8 }
  0x5d   : > { %788 = vmatpush.msra.mxu3 %v497_v9  ;;  %563 = vmatpush.msra.mxu1 %v492_v10  ;;  %v325_v10 = vld [vmem:[%s2683_s14 + $0xf0] sm:$0xff] }
  0x5e   : > { %366 = vmatmul.f32.gmra.mxu0 %v296_v17  ;;  %676 = vmatpush.msra.mxu2 %v493_v11 }
  0x5f   : > { %789 = vmatpush.msra.mxu3 %v494_v12 }
  0x66   : > { %369 = vmatmul.f32.gmra.mxu0 %v297_v18  ;;  %v311_v18 = vld [vmem:[%s2683_s14 + $0x80] sm:$0xff] }
  0x6e   : > { %372 = vmatmul.f32.gmra.mxu0 %v298_v19 }
  0x76   : > { %375 = vmatmul.f32.gmra.mxu0 %v299_v20 }
  0x7e   : > { %378 = vmatmul.f32.gmra.mxu0 %v300_v21 }
  0x86   : > { %381 = vmatmul.f32.gmra.mxu0 %v301_v22  ;;  %v312_v22 = vld [vmem:[%s2683_s14 + $0x88] sm:$0xff] }
  0x8e   : > { %384 = vmatmul.f32.gmra.mxu0 %v302_v23 }
  0x96   : > { %387 = vmatmul.f32.gmra.mxu0 %v303_v24 }
  0x9e   : > { %390 = vmatmul.f32.gmra.mxu0 %v304_v34  ;;  %v315_v34 = vld [vmem:[%s2683_s14 + $0xa0] sm:$0xff] }
  0xa6   : > { %393 = vmatmul.f32.gmra.mxu0 %v305_v46  ;;  %v318_v46 = vld [vmem:[%s2683_s14 + $0xb8] sm:$0xff] }
  0xae   : > { %396 = vmatmul.f32.gmra.mxu0 %v306_v59 }
  0xb6   : > { %399 = vmatmul.f32.gmra.mxu0 %v307_v6  ;;  %v324_v6 = vld [vmem:[%s2683_s14 + $0xe8] sm:$0xff] }
  0xbe   : > { %402 = vmatmul.f32.gmra.mxu0 %v308_v13 }
  0xc6   : > { %405 = vmatmul.f32.gmra.mxu0 %v309_v14  ;;  %v326_v14 = vld [vmem:[%s2683_s14 + $0xf8] sm:$0xff]  ;;  %s2469_s14 = scalar_lea.hbm %s3629_s5, 1536 }
  0xc7   : > { %p2471_p9 = scmp.lt.s32.totalorder %s2469_s14, %s2465_s13 }
  0xc9   : > { %p2472_p2 = por %p2471_p9, %p2470_p11 }
  0xcb   : > { %p2473_p10 = pnand %p2472_p2, %p2468_p8 }
  0xce   : > { %408 = vmatmul.f32.gmra.mxu0 %v310_v15 }
  0xd3   : > { %v364_v17 = vpop.f32.mrf.mxu0 }
  0xd4   : > { %v365_v19 = vadd.f32 %v2713_v16, %v364_v17 }
  0xd6   : > { %v460_v20 = vmax.f32 %v365_v19, 0.0  ;;  %411 = vmatmul.f32.gmra.mxu0 %v311_v18  ;;  %v540_v18 = vld [vmem:[%s3628_s4] sm:$0x7] }
  0xd7   : > { %v2751_v19 = vperm.slane %v540_v18, 0 }
  0xd8   : > { %564 = vmatmul.f32.vlgmr.msra.gmra.mxu1 %v460_v20  ;;  %677 = vmatmul.f32.vlgmr.msra.gmra.mxu2 %v460_v20 }
  0xd9   : > { %790 = vmatmul.f32.vlgmr.msra.gmra.mxu3 %v460_v20 }
  0xdb   : > { %v367_v21 = vpop.f32.mrf.mxu0 }
  0xdc   : > { %v368_v23 = vadd.f32 %v2713_v16, %v367_v21 }
  0xde   : > { %v461_v24 = vmax.f32 %v368_v23, 0.0  ;;  %414 = vmatmul.f32.gmra.mxu0 %v312_v22 }
  0xe0   : > { %567 = vmatmul.f32.gmra.mxu1 %v461_v24  ;;  %680 = vmatmul.f32.gmra.mxu2 %v461_v24 }
  0xe1   : > { %793 = vmatmul.f32.gmra.mxu3 %v461_v24 }
  0xe3   : > { %v370_v25 = vpop.f32.mrf.mxu0 }
  0xe4   : > { %v371_v27 = vadd.f32 %v2713_v16, %v370_v25  ;;  %v2758_v25 = vperm.slane %v540_v18, 1 }
  0xe6   : > { %v462_v28 = vmax.f32 %v371_v27, 0.0  ;;  %417 = vmatmul.f32.gmra.mxu0 %v313_v26  ;;  %v2760_v26 = vperm.slane %v540_v18, 2 }
  0xe8   : > { %570 = vmatmul.f32.gmra.mxu1 %v462_v28  ;;  %683 = vmatmul.f32.gmra.mxu2 %v462_v28 }
  0xe9   : > { %796 = vmatmul.f32.gmra.mxu3 %v462_v28 }
  0xeb   : > { %v373_v29 = vpop.f32.mrf.mxu0 }
  0xec   : > { %v374_v31 = vadd.f32 %v2713_v16, %v373_v29 }
  0xee   : > { %v463_v32 = vmax.f32 %v374_v31, 0.0  ;;  %420 = vmatmul.f32.gmra.mxu0 %v314_v30 }
  0xf0   : > { %573 = vmatmul.f32.gmra.mxu1 %v463_v32  ;;  %686 = vmatmul.f32.gmra.mxu2 %v463_v32 }
  0xf1   : > { %799 = vmatmul.f32.gmra.mxu3 %v463_v32 }
  0xf3   : > { %v376_v33 = vpop.f32.mrf.mxu0 }
  0xf4   : > { %v377_v35 = vadd.f32 %v2713_v16, %v376_v33 }
  0xf6   : > { %v464_v36 = vmax.f32 %v377_v35, 0.0  ;;  %423 = vmatmul.f32.gmra.mxu0 %v315_v34 }
  0xf8   : > { %576 = vmatmul.f32.gmra.mxu1 %v464_v36  ;;  %689 = vmatmul.f32.gmra.mxu2 %v464_v36 }
  0xf9   : > { %802 = vmatmul.f32.gmra.mxu3 %v464_v36 }
  0xfb   : > { %v379_v37 = vpop.f32.mrf.mxu0 }
  0xfc   : > { %v380_v39 = vadd.f32 %v2713_v16, %v379_v37 }
  0xfe   : > { %v465_v40 = vmax.f32 %v380_v39, 0.0  ;;  %426 = vmatmul.f32.gmra.mxu0 %v316_v38 }
 0x100   : > { %579 = vmatmul.f32.gmra.mxu1 %v465_v40  ;;  %692 = vmatmul.f32.gmra.mxu2 %v465_v40 }
 0x101   : > { %805 = vmatmul.f32.gmra.mxu3 %v465_v40 }
 0x103   : > { %v382_v41 = vpop.f32.mrf.mxu0 }
 0x104   : > { %v383_v43 = vadd.f32 %v2713_v16, %v382_v41 }
 0x106   : > { %v466_v44 = vmax.f32 %v383_v43, 0.0  ;;  %429 = vmatmul.f32.gmra.mxu0 %v317_v42 }
 0x108   : > { %582 = vmatmul.f32.gmra.mxu1 %v466_v44  ;;  %695 = vmatmul.f32.gmra.mxu2 %v466_v44 }
 0x109   : > { %808 = vmatmul.f32.gmra.mxu3 %v466_v44 }
 0x10b   : > { %v385_v45 = vpop.f32.mrf.mxu0 }
 0x10c   : > { %v386_v47 = vadd.f32 %v2713_v16, %v385_v45 }
 0x10e   : > { %v467_v48 = vmax.f32 %v386_v47, 0.0  ;;  %432 = vmatmul.f32.gmra.mxu0 %v318_v46 }
 0x110   : > { %585 = vmatmul.f32.gmra.mxu1 %v467_v48  ;;  %698 = vmatmul.f32.gmra.mxu2 %v467_v48 }
 0x111   : > { %811 = vmatmul.f32.gmra.mxu3 %v467_v48 }
 0x113   : > { %v388_v49 = vpop.f32.mrf.mxu0 }
 0x114   : > { %v389_v51 = vadd.f32 %v2713_v16, %v388_v49 }
 0x116   : > { %v468_v52 = vmax.f32 %v389_v51, 0.0  ;;  %435 = vmatmul.f32.gmra.mxu0 %v319_v50 }
 0x118   : > { %588 = vmatmul.f32.gmra.mxu1 %v468_v52  ;;  %701 = vmatmul.f32.gmra.mxu2 %v468_v52 }
 0x119   : > { %814 = vmatmul.f32.gmra.mxu3 %v468_v52 }
 0x11b   : > { %v391_v53 = vpop.f32.mrf.mxu0 }
 0x11c   : > { %v392_v55 = vadd.f32 %v2713_v16, %v391_v53 }
 0x11e   : > { %v469_v56 = vmax.f32 %v392_v55, 0.0  ;;  %438 = vmatmul.f32.gmra.mxu0 %v320_v54 }
 0x120   : > { %591 = vmatmul.f32.gmra.mxu1 %v469_v56  ;;  %704 = vmatmul.f32.gmra.mxu2 %v469_v56 }
 0x121   : > { %817 = vmatmul.f32.gmra.mxu3 %v469_v56 }
 0x123   : > { %v394_v57 = vpop.f32.mrf.mxu0 }
 0x124   : > { %v395_v59 = vadd.f32 %v2713_v16, %v394_v57 }
 0x126   : > { %v470_v60 = vmax.f32 %v395_v59, 0.0  ;;  %441 = vmatmul.f32.gmra.mxu0 %v321_v58 }
 0x128   : > { %594 = vmatmul.f32.gmra.mxu1 %v470_v60  ;;  %707 = vmatmul.f32.gmra.mxu2 %v470_v60 }
 0x129   : > { %820 = vmatmul.f32.gmra.mxu3 %v470_v60 }
 0x12b   : > { %v397_v61 = vpop.f32.mrf.mxu0 }
 0x12c   : > { %v398_v63 = vadd.f32 %v2713_v16, %v397_v61 }
 0x12e   : > { %v471_v0 = vmax.f32 %v398_v63, 0.0  ;;  %444 = vmatmul.f32.gmra.mxu0 %v322_v62 }
 0x130   : > { %597 = vmatmul.f32.gmra.mxu1 %v471_v0  ;;  %710 = vmatmul.f32.gmra.mxu2 %v471_v0 }
 0x131   : > { %823 = vmatmul.f32.gmra.mxu3 %v471_v0 }
 0x133   : > { %v400_v1 = vpop.f32.mrf.mxu0 }
 0x134   : > { %v401_v3 = vadd.f32 %v2713_v16, %v400_v1 }
 0x136   : > { %v472_v4 = vmax.f32 %v401_v3, 0.0  ;;  %447 = vmatmul.f32.gmra.mxu0 %v323_v2 }
 0x138   : > { %600 = vmatmul.f32.gmra.mxu1 %v472_v4  ;;  %713 = vmatmul.f32.gmra.mxu2 %v472_v4 }
 0x139   : > { %826 = vmatmul.f32.gmra.mxu3 %v472_v4 }
 0x13b   : > { %v403_v5 = vpop.f32.mrf.mxu0 }
 0x13c   : > { %v404_v7 = vadd.f32 %v2713_v16, %v403_v5 }
 0x13e   : > { %v473_v8 = vmax.f32 %v404_v7, 0.0  ;;  %450 = vmatmul.f32.gmra.mxu0 %v324_v6 }
 0x140   : > { %603 = vmatmul.f32.gmra.mxu1 %v473_v8  ;;  %716 = vmatmul.f32.gmra.mxu2 %v473_v8 }
 0x141   : > { %829 = vmatmul.f32.gmra.mxu3 %v473_v8 }
 0x143   : > { %v406_v9 = vpop.f32.mrf.mxu0 }
 0x144   : > { %v407_v11 = vadd.f32 %v2713_v16, %v406_v9 }
 0x146   : > { %v474_v12 = vmax.f32 %v407_v11, 0.0  ;;  %453 = vmatmul.f32.gmra.mxu0 %v325_v10 }
 0x148   : > { %606 = vmatmul.f32.gmra.mxu1 %v474_v12  ;;  %719 = vmatmul.f32.gmra.mxu2 %v474_v12 }
 0x149   : > { %832 = vmatmul.f32.gmra.mxu3 %v474_v12 }
 0x14b   : > { %v409_v13 = vpop.f32.mrf.mxu0 }
 0x14c   : > { %v410_v15 = vadd.f32 %v2713_v16, %v409_v13 }
 0x14e   : > { %v475_v17 = vmax.f32 %v410_v15, 0.0  ;;  %456 = vmatmul.f32.gmra.mxu0 %v326_v14 }
 0x150   : > { %609 = vmatmul.f32.gmra.mxu1 %v475_v17  ;;  %722 = vmatmul.f32.gmra.mxu2 %v475_v17 }
 0x151   : > { %835 = vmatmul.f32.gmra.mxu3 %v475_v17 }
 0x153   : > { %v412_v20 = vpop.f32.mrf.mxu0 }
 0x154   : > { %v413_v21 = vadd.f32 %v2713_v16, %v412_v20 }
 0x155   : > { %v565_v22 = vpop.f32.mrf.mxu1 }
 0x156   : > { %v476_v23 = vmax.f32 %v413_v21, 0.0  ;;  %v566_v24 = vadd.f32 %v565_v22, %v2751_v19 }
 0x158   : > { %1815 = vst [vmem:[%s2755_s23] sm:$0xff] %v566_v24  ;;  %612 = vmatmul.f32.gmra.mxu1 %v476_v23  ;;  %725 = vmatmul.f32.gmra.mxu2 %v476_v23 }
 0x159   : > { %838 = vmatmul.f32.gmra.mxu3 %v476_v23 }
 0x15b   : > { %v415_v27 = vpop.f32.mrf.mxu0  ;;  %v678_v28 = vpop.f32.mrf.mxu2 }
 0x15c   : > { %v416_v29 = vadd.f32 %v2713_v16, %v415_v27  ;;  %v2764_v30 = vadd.f32 %v678_v28, %v2758_v25  ;;  %v791_v31 = vpop.f32.mrf.mxu3 }
 0x15d   : > { %v792_v32 = vadd.f32 %v791_v31, %v2760_v26  ;;  %v568_v33 = vpop.f32.mrf.mxu1 }
 0x15e   : > { %v477_v34 = vmax.f32 %v416_v29, 0.0  ;;  %v919_v35 = vmin.f32 %v2764_v30, 20.0  ;;  %v569_v36 = vadd.f32 %v568_v33, %v2751_v19  ;;  %vm887_vm1 = vcmp.gt.f32.partialorder %v2764_v30, 20.0 }
 0x15f   : > { %1879 = vst [vmem:[%s2755_s23 + $0x10] sm:$0xff] %v792_v32 }
 0x160   : > { %v951_v37 = vmul.f32 1.442695, %v919_v35  ;;  %1816 = vst [vmem:[%s2755_s23 + $0x18] sm:$0xff] %v569_v36  ;;  %615 = vmatmul.f32.gmra.mxu1 %v477_v34  ;;  %728 = vmatmul.f32.gmra.mxu2 %v477_v34 }
 0x161   : > { %841 = vmatmul.f32.gmra.mxu3 %v477_v34 }
 0x162   : > { %2136 = vpow2.f32 %v951_v37 }
 0x163   : > { %v418_v38 = vpop.f32.mrf.mxu0  ;;  %v681_v39 = vpop.f32.mrf.mxu2 }
 0x164   : > { %v419_v40 = vadd.f32 %v2713_v16, %v418_v38  ;;  %v2773_v41 = vadd.f32 %v681_v39, %v2758_v25  ;;  %v794_v42 = vpop.f32.mrf.mxu3 }
 0x165   : > { %v795_v43 = vadd.f32 %v794_v42, %v2760_v26  ;;  %v571_v44 = vpop.f32.mrf.mxu1 }
 0x166   : > { %v478_v45 = vmax.f32 %v419_v40, 0.0  ;;  %v920_v46 = vmin.f32 %v2773_v41, 20.0  ;;  %v572_v47 = vadd.f32 %v571_v44, %v2751_v19  ;;  %vm888_vm2 = vcmp.gt.f32.partialorder %v2773_v41, 20.0 }
 0x167   : > { %1880 = vst [vmem:[%s2755_s23 + $0x28] sm:$0xff] %v795_v43 }
 0x168   : > { %v2137_v48 = vpop.eup %2136  ;;  %v953_v49 = vmul.f32 1.442695, %v920_v46  ;;  %1817 = vst [vmem:[%s2755_s23 + $0x30] sm:$0xff] %v572_v47  ;;  %618 = vmatmul.f32.gmra.mxu1 %v478_v45  ;;  %731 = vmatmul.f32.gmra.mxu2 %v478_v45 }
 0x169   : > { %v1015_v50 = vadd.f32 1.0, %v2137_v48  ;;  %844 = vmatmul.f32.gmra.mxu3 %v478_v45  ;;  %v1018_v51 = vmul.f32 -0.5, %v2137_v48  ;;  %v1021_v63 = vand.u32 2147483647, %v2137_v48 }
 0x16a   : > { %2138 = vpow2.f32 %v953_v49 }
 0x16b   : > { %2140 = vlog2.f32 %v1015_v50  ;;  %v421_v52 = vpop.f32.mrf.mxu0  ;;  %v684_v53 = vpop.f32.mrf.mxu2  ;;  %v1019_v59 = vadd.f32 1.0, %v1018_v51  ;;  %vm1022_vm0 = vcmp.lt.f32.partialorder %v1021_v63, 0.0004427343 }
 0x16c   : > { %v422_v54 = vadd.f32 %v2713_v16, %v421_v52  ;;  %v2782_v55 = vadd.f32 %v684_v53, %v2758_v25  ;;  %v797_v56 = vpop.f32.mrf.mxu3 }
 0x16d   : > { %v798_v57 = vadd.f32 %v797_v56, %v2760_v26  ;;  %v574_v58 = vpop.f32.mrf.mxu1  ;;  %v1020_v5 = vmul.f32 %v2137_v48, %v1019_v59 }
 0x16e   : > { %v479_v60 = vmax.f32 %v422_v54, 0.0  ;;  %v921_v61 = vmin.f32 %v2782_v55, 20.0  ;;  %v575_v62 = vadd.f32 %v574_v58, %v2751_v19  ;;  %vm889_vm4 = vcmp.gt.f32.partialorder %v2782_v55, 20.0 }
 0x16f   : > { %1881 = vst [vmem:[%s2755_s23 + $0x40] sm:$0xff] %v798_v57 }
 0x170   : > { %v2139_v0 = vpop.eup %2138  ;;  %v955_v1 = vmul.f32 1.442695, %v921_v61  ;;  %1818 = vst [vmem:[%s2755_s23 + $0x48] sm:$0xff] %v575_v62  ;;  %621 = vmatmul.f32.gmra.mxu1 %v479_v60  ;;  %734 = vmatmul.f32.gmra.mxu2 %v479_v60 }
 0x171   : > { %v2141_v2 = vpop.eup %2140  ;;  %v1024_v3 = vadd.f32 1.0, %v2139_v0  ;;  %847 = vmatmul.f32.gmra.mxu3 %v479_v60  ;;  %v1027_v6 = vmul.f32 -0.5, %v2139_v0  ;;  %v1030_v22 = vand.u32 2147483647, %v2139_v0 }
 0x172   : > { %v1017_v4 = vmul.f32 0.6931472, %v2141_v2  ;;  %2142 = vpow2.f32 %v955_v1 }
 0x173   : > { %2144 = vlog2.f32 %v1024_v3  ;;  %v424_v7 = vpop.f32.mrf.mxu0  ;;  %v687_v8 = vpop.f32.mrf.mxu2  ;;  %v1028_v18 = vadd.f32 1.0, %v1027_v6  ;;  %vm1031_vm3 = vcmp.lt.f32.partialorder %v1030_v22, 0.0004427343 }
 0x174   : > { %v1023_v9 = vsel %vm1022_vm0, %v1020_v5, %v1017_v4  ;;  %v425_v10 = vadd.f32 %v2713_v16, %v424_v7  ;;  %v2792_v11 = vadd.f32 %v687_v8, %v2758_v25  ;;  %v800_v12 = vpop.f32.mrf.mxu3 }
 0x175   : > { %v1303_v13 = vsel %vm887_vm1, %v2764_v30, %v1023_v9  ;;  %v801_v14 = vadd.f32 %v800_v12, %v2760_v26  ;;  %v577_v15 = vpop.f32.mrf.mxu1  ;;  %v1029_v31 = vmul.f32 %v2139_v0, %v1028_v18 }
 0x176   : > { %v2796_v17 = vadd.f32 1e-08, %v1303_v13  ;;  %v480_v20 = vmax.f32 %v425_v10, 0.0  ;;  %v922_v21 = vmin.f32 %v2792_v11, 20.0  ;;  %v578_v23 = vadd.f32 %v577_v15, %v2751_v19 }
 0x177   : > { %1882 = vst [vmem:[%s2755_s23 + $0x58] sm:$0xff] %v801_v14  ;;  %vm890_vm9 = vcmp.gt.f32.partialorder %v2792_v11, 20.0 }
 0x178   : > { %v2143_v24 = vpop.eup %2142  ;;  %2146 = vrsqrt.f32 %v2796_v17  ;;  %624 = vmatmul.f32.gmra.mxu1 %v480_v20  ;;  %737 = vmatmul.f32.gmra.mxu2 %v480_v20  ;;  %v957_v29 = vmul.f32 1.442695, %v922_v21  ;;  %1819 = vst [vmem:[%s2755_s23 + $0x60] sm:$0xff] %v578_v23  ;;  %vm1374_vm6 = vcmp.eq.f32.partialorder %v2796_v17, inf  ;;  %vm1376_vm7 = vcmp.eq.f32.partialorder %v2796_v17, 0.0 }
 0x179   : > { %v2145_v27 = vpop.eup %2144  ;;  %v1033_v28 = vadd.f32 1.0, %v2143_v24  ;;  %850 = vmatmul.f32.gmra.mxu3 %v480_v20  ;;  %v1036_v32 = vmul.f32 -0.5, %v2143_v24  ;;  %v1039_v49 = vand.u32 2147483647, %v2143_v24  ;;  %v1377_v21 = vand.u32 2147483648, %v2796_v17 }
 0x17a   : > { %v1026_v30 = vmul.f32 0.6931472, %v2145_v27 }
 0x17b   : > { %2148 = vlog2.f32 %v1033_v28  ;;  %v427_v33 = vpop.f32.mrf.mxu0  ;;  %v690_v34 = vpop.f32.mrf.mxu2  ;;  %v1037_v45 = vadd.f32 1.0, %v1036_v32  ;;  %vm1040_vm5 = vcmp.lt.f32.partialorder %v1039_v49, 0.0004427343 }
 0x17c   : > { %v1032_v35 = vsel %vm1031_vm3, %v1029_v31, %v1026_v30  ;;  %2150 = vpow2.f32 %v957_v29  ;;  %v428_v36 = vadd.f32 %v2713_v16, %v427_v33  ;;  %v2806_v37 = vadd.f32 %v690_v34, %v2758_v25  ;;  %v803_v38 = vpop.f32.mrf.mxu3 }
 0x17d   : > { %v1304_v39 = vsel %vm888_vm2, %v2773_v41, %v1032_v35  ;;  %v804_v40 = vadd.f32 %v803_v38, %v2760_v26  ;;  %v580_v42 = vpop.f32.mrf.mxu1  ;;  %v1038_v56 = vmul.f32 %v2143_v24, %v1037_v45 }
 0x17e   : > { %v2147_v43 = vpop.eup %2146  ;;  %v2810_v44 = vadd.f32 1e-08, %v1304_v39  ;;  %v481_v46 = vmax.f32 %v428_v36, 0.0  ;;  %v923_v47 = vmin.f32 %v2806_v37, 20.0  ;;  %v581_v50 = vadd.f32 %v580_v42, %v2751_v19 }
 0x17f   : > { %v1368_v48 = vmul.f32 %v2147_v43, %v2796_v17  ;;  %1883 = vst [vmem:[%s2755_s23 + $0x70] sm:$0xff] %v804_v40  ;;  %vm891_vm13 = vcmp.gt.f32.partialorder %v2806_v37, 20.0 }
 0x180   : > { %2152 = vrsqrt.f32 %v2810_v44  ;;  %627 = vmatmul.f32.gmra.mxu1 %v481_v46  ;;  %740 = vmatmul.f32.gmra.mxu2 %v481_v46  ;;  %v959_v52 = vmul.f32 1.442695, %v923_v47  ;;  %1820 = vst [vmem:[%s2755_s23 + $0x78] sm:$0xff] %v581_v50  ;;  %vm1386_vm10 = vcmp.eq.f32.partialorder %v2810_v44, inf  ;;  %vm1388_vm11 = vcmp.eq.f32.partialorder %v2810_v44, 0.0 }
 0x181   : > { %v2149_v41 = vpop.eup %2148  ;;  %v1369_v51 = vmul.f32 %v2147_v43, %v1368_v48  ;;  %853 = vmatmul.f32.gmra.mxu3 %v481_v46 }
 0x182   : > { %v2151_v53 = vpop.eup %2150  ;;  %v1035_v54 = vmul.f32 0.6931472, %v2149_v41  ;;  %2154 = vpow2.f32 %v959_v52 }
 0x183   : > { %v1370_v57 = vmul.f32 0.5, %v1369_v51  ;;  %v1042_v58 = vadd.f32 1.0, %v2151_v53  ;;  %v1045_v59 = vmul.f32 -0.5, %v2151_v53  ;;  %v430_v60 = vpop.f32.mrf.mxu0  ;;  %v693_v61 = vpop.f32.mrf.mxu2  ;;  %v1048_v13 = vand.u32 2147483647, %v2151_v53 }
 0x184   : > { %v1041_v62 = vsel %vm1040_vm5, %v1038_v56, %v1035_v54  ;;  %v431_v63 = vadd.f32 %v2713_v16, %v430_v60  ;;  %v2821_v0 = vadd.f32 %v693_v61, %v2758_v25  ;;  %v806_v1 = vpop.f32.mrf.mxu3 }
 0x185   : > { %v1371_v2 = vsub.f32 1.5, %v1370_v57  ;;  %v1305_v3 = vsel %vm889_vm4, %v2782_v55, %v1041_v62  ;;  %2156 = vlog2.f32 %v1042_v58  ;;  %v583_v4 = vpop.f32.mrf.mxu1  ;;  %v1046_v10 = vadd.f32 1.0, %v1045_v59 }
 0x186   : > { %v2153_v5 = vpop.eup %2152  ;;  %v2824_v6 = vadd.f32 1e-08, %v1305_v3  ;;  %v482_v7 = vmax.f32 %v431_v63, 0.0  ;;  %v924_v12 = vmin.f32 %v2821_v0, 20.0  ;;  %v807_v18 = vadd.f32 %v806_v1, %v2760_v26 }
 0x187   : > { %v1372_v8 = vmul.f32 %v2147_v43, %v1371_v2  ;;  %v1380_v9 = vmul.f32 %v2153_v5, %v2810_v44  ;;  %v584_v22 = vadd.f32 %v583_v4, %v2751_v19  ;;  %v1047_v28 = vmul.f32 %v2151_v53, %v1046_v10 }
 0x188   : > { %2158 = vrsqrt.f32 %v2824_v6  ;;  %630 = vmatmul.f32.gmra.mxu1 %v482_v7  ;;  %743 = vmatmul.f32.gmra.mxu2 %v482_v7  ;;  %v961_v15 = vmul.f32 1.442695, %v924_v12  ;;  %v2831_v20 = vpop.eup %2154  ;;  %1884 = vst [vmem:[%s2755_s23 + $0x88] sm:$0xff] %v807_v18  ;;  %vm1049_vm8 = vcmp.lt.f32.partialorder %v1048_v13, 0.0004427343  ;;  %vm1398_vm14 = vcmp.eq.f32.partialorder %v2824_v6, inf }
 0x189   : > { %v1373_v55 = vmul.f32 %v1372_v8, %v2796_v17  ;;  %v1381_v14 = vmul.f32 %v2153_v5, %v1380_v9  ;;  %856 = vmatmul.f32.gmra.mxu3 %v482_v7  ;;  %v1051_v29 = vadd.f32 1.0, %v2831_v20  ;;  %v1054_v34 = vmul.f32 -0.5, %v2831_v20  ;;  %1821 = vst [vmem:[%s2755_s23 + $0x90] sm:$0xff] %v584_v22 }
 0x18a   : > { %2160 = vpow2.f32 %v961_v15  ;;  %v1057_v41 = vand.u32 2147483647, %v2831_v20  ;;  %vm1400_vm15 = vcmp.eq.f32.partialorder %v2824_v6, 0.0  ;;  %vm892_vm1 = vcmp.gt.f32.partialorder %v2821_v0, 20.0 }
 0x18b   : > { %v2157_v23 = vpop.eup %2156  ;;  %v1375_v24 = vsel %vm1374_vm6, %v2796_v17, %v1373_v55  ;;  %v1382_v27 = vmul.f32 0.5, %v1381_v14  ;;  %v433_v30 = vpop.f32.mrf.mxu0  ;;  %2162 = vlog2.f32 %v1051_v29  ;;  %v1055_v50 = vadd.f32 1.0, %v1054_v34 }
 0x18c   : > { %v696_v31 = vpop.f32.mrf.mxu2  ;;  %v1378_v32 = vsel %vm1376_vm7, %v1377_v21, %v1375_v24  ;;  %v1044_v33 = vmul.f32 0.6931472, %v2157_v23  ;;  %v809_v35 = vpop.f32.mrf.mxu3  ;;  %v434_v42 = vadd.f32 %v2713_v16, %v433_v30  ;;  %vm1058_vm12 = vcmp.lt.f32.partialorder %v1057_v41, 0.0004427343 }
 0x18d   : > { %v1751_v36 = vmax.f32 %v1378_v32, 1e-05  ;;  %v1383_v38 = vsub.f32 1.5, %v1382_v27  ;;  %v586_v17 = vpop.f32.mrf.mxu1  ;;  %v2845_v43 = vadd.f32 %v696_v31, %v2758_v25  ;;  %v810_v56 = vadd.f32 %v809_v35, %v2760_v26 }
 0x18e   : > { %v2159_v39 = vpop.eup %2158  ;;  %v1050_v40 = vsel %vm1049_vm8, %v1047_v28, %v1044_v33  ;;  %v483_v51 = vmax.f32 %v434_v42, 0.0  ;;  %v1056_v4 = vmul.f32 %v2831_v20, %v1055_v50  ;;  %v587_v12 = vadd.f32 %v586_v17, %v2751_v19 }
 0x18f   : > { %v1783_v45 = vmin.f32 %v1751_v36, 100000.0  ;;  %v1384_v46 = vmul.f32 %v2153_v5, %v1383_v38  ;;  %v1392_v47 = vmul.f32 %v2159_v39, %v2824_v6  ;;  %v1306_v48 = vsel %vm890_vm9, %v2792_v11, %v1050_v40  ;;  %1885 = vst [vmem:[%s2755_s23 + $0xa0] sm:$0xff] %v810_v56 }
 0x190   : > { %v2849_v49 = vadd.f32 1e-08, %v1306_v48  ;;  %v925_v54 = vmin.f32 %v2845_v43, 20.0  ;;  %v2856_v57 = vpop.eup %2160  ;;  %v1389_v11 = vand.u32 2147483648, %v2810_v44  ;;  %633 = vmatmul.f32.gmra.mxu1 %v483_v51  ;;  %746 = vmatmul.f32.gmra.mxu2 %v483_v51  ;;  %1822 = vst [vmem:[%s2755_s23 + $0xa8] sm:$0xff] %v587_v12  ;;  %v1401_v29 = vand.u32 2147483648, %v2824_v6 }
 0x191   : > { %1847 = vst [vmem:[%s2755_s23 + $0x8] sm:$0xff] %v1783_v45  ;;  %v1385_v52 = vmul.f32 %v1384_v46, %v2810_v44  ;;  %v1393_v53 = vmul.f32 %v2159_v39, %v1392_v47  ;;  %v2163_v58 = vpop.eup %2162  ;;  %v1060_v61 = vadd.f32 1.0, %v2856_v57  ;;  %v1063_v62 = vmul.f32 -0.5, %v2856_v57  ;;  %859 = vmatmul.f32.gmra.mxu3 %v483_v51 }
 0x192   : > { %2164 = vrsqrt.f32 %v2849_v49  ;;  %v1053_v3 = vmul.f32 0.6931472, %v2163_v58  ;;  %v963_v5 = vmul.f32 1.442695, %v925_v54  ;;  %vm893_vm2 = vcmp.gt.f32.partialorder %v2845_v43, 20.0 }
 0x193   : > { %v1387_v59 = vsel %vm1386_vm10, %v2810_v44, %v1385_v52  ;;  %v1394_v60 = vmul.f32 0.5, %v1393_v53  ;;  %v436_v63 = vpop.f32.mrf.mxu0  ;;  %2166 = vlog2.f32 %v1060_v61  ;;  %v1064_v15 = vadd.f32 1.0, %v1063_v62 }
 0x194   : > { %v699_v1 = vpop.f32.mrf.mxu2  ;;  %v1390_v2 = vsel %vm1388_vm11, %v1389_v11, %v1387_v59  ;;  %v812_v7 = vpop.f32.mrf.mxu3  ;;  %v1059_v10 = vsel %vm1058_vm12, %v1056_v4, %v1053_v3  ;;  %2168 = vpow2.f32 %v963_v5  ;;  %v437_v21 = vadd.f32 %v2713_v16, %v436_v63 }
 0x195   : > { %v1752_v8 = vmax.f32 %v1390_v2, 1e-05  ;;  %v1395_v9 = vsub.f32 1.5, %v1394_v60  ;;  %v589_v44 = vpop.f32.mrf.mxu1  ;;  %v1307_v14 = vsel %vm891_vm13, %v2806_v37, %v1059_v10  ;;  %v2875_v22 = vadd.f32 %v699_v1, %v2758_v25 }
 0x196   : > { %v2870_v20 = vadd.f32 1e-08, %v1307_v14  ;;  %v813_v23 = vadd.f32 %v812_v7, %v2760_v26  ;;  %v1066_v37 = vand.u32 2147483647, %v2856_v57  ;;  %v590_v28 = vadd.f32 %v589_v44, %v2751_v19 }
 0x197   : > { %v1784_v13 = vmin.f32 %v1752_v8, 100000.0  ;;  %v1396_v55 = vmul.f32 %v2159_v39, %v1395_v9  ;;  %v1065_v33 = vmul.f32 %v2856_v57, %v1064_v15  ;;  %v484_v34 = vmax.f32 %v437_v21, 0.0 }
 0x198   : > { %v2165_v18 = vpop.eup %2164  ;;  %2170 = vrsqrt.f32 %v2870_v20  ;;  %1886 = vst [vmem:[%s2755_s23 + $0xb8] sm:$0xff] %v813_v23  ;;  %v926_v40 = vmin.f32 %v2875_v22, 20.0  ;;  %vm1067_vm0 = vcmp.lt.f32.partialorder %v1066_v37, 0.0004427343  ;;  %vm1410_vm3 = vcmp.eq.f32.partialorder %v2849_v49, inf }
 0x199   : > { %1848 = vst [vmem:[%s2755_s23 + $0x20] sm:$0xff] %v1784_v13  ;;  %v1397_v24 = vmul.f32 %v1396_v55, %v2824_v6  ;;  %v1404_v27 = vmul.f32 %v2165_v18, %v2849_v49  ;;  %v2167_v30 = vpop.eup %2166  ;;  %636 = vmatmul.f32.gmra.mxu1 %v484_v34  ;;  %749 = vmatmul.f32.gmra.mxu2 %v484_v34  ;;  %vm1412_vm4 = vcmp.eq.f32.partialorder %v2849_v49, 0.0  ;;  %v1413_v4 = vand.u32 2147483648, %v2849_v49 }
 0x19a   : > { %1823 = vst [vmem:[%s2755_s23 + $0xc0] sm:$0xff] %v590_v28  ;;  %v2169_v38 = vpop.eup %2168  ;;  %v1062_v39 = vmul.f32 0.6931472, %v2167_v30  ;;  %v965_v51 = vmul.f32 1.442695, %v926_v40  ;;  %862 = vmatmul.f32.gmra.mxu3 %v484_v34  ;;  %vm1422_vm6 = vcmp.eq.f32.partialorder %v2870_v20, inf }
 0x19b   : > { %v1399_v31 = vsel %vm1398_vm14, %v2824_v6, %v1397_v24  ;;  %v1405_v32 = vmul.f32 %v2165_v18, %v1404_v27  ;;  %v439_v35 = vpop.f32.mrf.mxu0  ;;  %v1069_v48 = vadd.f32 1.0, %v2169_v38  ;;  %v1072_v41 = vmul.f32 -0.5, %v2169_v38 }
 0x19c   : > { %v702_v36 = vpop.f32.mrf.mxu2  ;;  %v1402_v17 = vsel %vm1400_vm15, %v1401_v29, %v1399_v31  ;;  %v440_v42 = vadd.f32 %v2713_v16, %v439_v35  ;;  %v815_v45 = vpop.f32.mrf.mxu3  ;;  %v1068_v50 = vsel %vm1067_vm0, %v1065_v33, %v1062_v39  ;;  %v1075_v11 = vand.u32 2147483647, %v2169_v38 }
 0x19d   : > { %v1753_v46 = vmax.f32 %v1402_v17, 1e-05  ;;  %v1406_v47 = vmul.f32 0.5, %v1405_v32  ;;  %v592_v6 = vpop.f32.mrf.mxu1  ;;  %v1308_v54 = vsel %vm892_vm1, %v2821_v0, %v1068_v50  ;;  %2172 = vlog2.f32 %v1069_v48 }
 0x19e   : > { %v2171_v56 = vpop.eup %2170  ;;  %v2895_v57 = vadd.f32 1e-08, %v1308_v54  ;;  %2174 = vpow2.f32 %v965_v51  ;;  %v485_v58 = vmax.f32 %v440_v42, 0.0  ;;  %v2900_v61 = vadd.f32 %v702_v36, %v2758_v25 }
 0x19f   : > { %v1785_v52 = vmin.f32 %v1753_v46, 100000.0  ;;  %v1407_v53 = vsub.f32 1.5, %v1406_v47  ;;  %v1416_v60 = vmul.f32 %v2171_v56, %v2870_v20  ;;  %v816_v62 = vadd.f32 %v815_v45, %v2760_v26 }
 0x1a0   : > { %2176 = vrsqrt.f32 %v2895_v57  ;;  %v1073_v0 = vadd.f32 1.0, %v1072_v41  ;;  %v927_v5 = vmin.f32 %v2900_v61, 20.0  ;;  %v593_v7 = vadd.f32 %v592_v6, %v2751_v19 }
 0x1a1   : > { %1849 = vst [vmem:[%s2755_s23 + $0x38] sm:$0xff] %v1785_v52  ;;  %v1408_v59 = vmul.f32 %v2165_v18, %v1407_v53  ;;  %v1417_v1 = vmul.f32 %v2171_v56, %v1416_v60  ;;  %vm2914_vm5 = vcmp.lt.f32.partialorder %v1075_v11, 0.0004427343  ;;  %639 = vmatmul.f32.gmra.mxu1 %v485_v58  ;;  %752 = vmatmul.f32.gmra.mxu2 %v485_v58  ;;  %vm1424_vm7 = vcmp.eq.f32.partialorder %v2870_v20, 0.0 }
 0x1a2   : > { %1887 = vst [vmem:[%s2755_s23 + $0xd0] sm:$0xff] %v816_v62  ;;  %v1074_v23 = vmul.f32 %v2169_v38, %v1073_v0  ;;  %v967_v24 = vmul.f32 1.442695, %v927_v5  ;;  %865 = vmatmul.f32.gmra.mxu3 %v485_v58  ;;  %vm894_vm8 = vcmp.gt.f32.partialorder %v2875_v22, 20.0  ;;  %vm1434_vm9 = vcmp.eq.f32.partialorder %v2895_v57, inf }
 0x1a3   : > { %v1409_v63 = vmul.f32 %v1408_v59, %v2849_v49  ;;  %v442_v2 = vpop.f32.mrf.mxu0  ;;  %v2173_v44 = vpop.eup %2172  ;;  %v1418_v12 = vmul.f32 0.5, %v1417_v1  ;;  %1824 = vst [vmem:[%s2755_s23 + $0xd8] sm:$0xff] %v593_v7  ;;  %vm1436_vm10 = vcmp.eq.f32.partialorder %v2895_v57, 0.0  ;;  %vm895_vm13 = vcmp.gt.f32.partialorder %v2900_v61, 20.0 }
 0x1a4   : > { %v705_v3 = vpop.f32.mrf.mxu2  ;;  %v443_v8 = vadd.f32 %v2713_v16, %v442_v2  ;;  %v818_v9 = vpop.f32.mrf.mxu3  ;;  %v1071_v21 = vmul.f32 0.6931472, %v2173_v44  ;;  %2178 = vpow2.f32 %v967_v24 }
 0x1a5   : > { %v1411_v10 = vsel %vm1410_vm3, %v2849_v49, %v1409_v63  ;;  %v819_v55 = vadd.f32 %v818_v9, %v2760_v26  ;;  %v595_v14 = vpop.f32.mrf.mxu1  ;;  %v2919_v15 = vpop.eup %2174  ;;  %v1419_v37 = vsub.f32 1.5, %v1418_v12  ;;  %v2926_v29 = vadd.f32 %v705_v3, %v2758_v25 }
 0x1a6   : > { %v1414_v18 = vsel %vm1412_vm4, %v1413_v4, %v1411_v10  ;;  %v1078_v28 = vadd.f32 1.0, %v2919_v15  ;;  %v2177_v30 = vpop.eup %2176  ;;  %v1077_v31 = vsel %vm2914_vm5, %v1074_v23, %v1071_v21  ;;  %v1081_v49 = vmul.f32 -0.5, %v2919_v15 }
 0x1a7   : > { %v1754_v27 = vmax.f32 %v1414_v18, 1e-05  ;;  %1888 = vst [vmem:[%s2755_s23 + $0xe8] sm:$0xff] %v819_v55  ;;  %v486_v32 = vmax.f32 %v443_v8, 0.0  ;;  %v1420_v34 = vmul.f32 %v2171_v56, %v1419_v37  ;;  %v1428_v35 = vmul.f32 %v2177_v30, %v2895_v57  ;;  %v2978_v37 = vld [vmem:[#allocation7] ss:$0 sm:$0xff] }
 0x1a8   : > { %v1309_v36 = vsel %vm893_vm2, %v2845_v43, %v1077_v31  ;;  %2180 = vlog2.f32 %v1078_v28  ;;  %v928_v40 = vmin.f32 %v2926_v29, 20.0  ;;  %v596_v42 = vadd.f32 %v595_v14, %v2751_v19 }
 0x1a9   : > { %v1786_v33 = vmin.f32 %v1754_v27, 100000.0  ;;  %v2938_v38 = vadd.f32 1e-08, %v1309_v36  ;;  %v1421_v17 = vmul.f32 %v1420_v34, %v2870_v20  ;;  %v1429_v39 = vmul.f32 %v2177_v30, %v1428_v35  ;;  %642 = vmatmul.f32.gmra.mxu1 %v486_v32  ;;  %755 = vmatmul.f32.gmra.mxu2 %v486_v32 }
 0x1aa   : > { %v1425_v43 = vand.u32 2147483648, %v2870_v20  ;;  %v1082_v47 = vadd.f32 1.0, %v1081_v49  ;;  %v1084_v41 = vand.u32 2147483647, %v2919_v15  ;;  %v969_v51 = vmul.f32 1.442695, %v928_v40  ;;  %v2179_v53 = vpop.eup %2178  ;;  %868 = vmatmul.f32.gmra.mxu3 %v486_v32 }
 0x1ab   : > { %1850 = vst [vmem:[%s2755_s23 + $0x50] sm:$0xff] %v1786_v33  ;;  %v445_v45 = vpop.f32.mrf.mxu0  ;;  %2182 = vrsqrt.f32 %v2938_v38  ;;  %v1423_v6 = vsel %vm1422_vm6, %v2870_v20, %v1421_v17  ;;  %v1430_v50 = vmul.f32 0.5, %v1429_v39  ;;  %v1087_v62 = vadd.f32 1.0, %v2179_v53 }
 0x1ac   : > { %v708_v46 = vpop.f32.mrf.mxu2  ;;  %v821_v48 = vpop.f32.mrf.mxu3  ;;  %1825 = vst [vmem:[%s2755_s23 + $0xf0] sm:$0xff] %v596_v42  ;;  %v1426_v54 = vsel %vm1424_vm7, %v1425_v43, %v1423_v6  ;;  %v446_v56 = vadd.f32 %v2713_v16, %v445_v45  ;;  %v1083_v63 = vmul.f32 %v2919_v15, %v1082_v47  ;;  %v1090_v1 = vmul.f32 -0.5, %v2179_v53 }
 0x1ad   : > { %v598_v52 = vpop.f32.mrf.mxu1  ;;  %v2956_v11 = vadd.f32 %v708_v46, %v2758_v25  ;;  %v822_v58 = vadd.f32 %v821_v48, %v2760_v26  ;;  %v1755_v59 = vmax.f32 %v1426_v54, 1e-05  ;;  %v1431_v60 = vsub.f32 1.5, %v1430_v50 }
 0x1ae   : > { %v2181_v0 = vpop.eup %2180  ;;  %2184 = vpow2.f32 %v969_v51  ;;  %v487_v20 = vmax.f32 %v446_v56, 0.0  ;;  %vm1085_vm11 = vcmp.lt.f32.partialorder %v1084_v41, 0.0004427343  ;;  %v599_v7 = vadd.f32 %v598_v52, %v2751_v19 }
 0x1af   : > { %1889 = vst [vmem:[%s2755_s23 + $0x100] sm:$0xff] %v822_v58  ;;  %v1787_v2 = vmin.f32 %v1755_v59, 100000.0  ;;  %v1432_v16 = vmul.f32 %v2177_v30, %v1431_v60  ;;  %v1080_v3 = vmul.f32 0.6931472, %v2181_v0  ;;  %2186 = vlog2.f32 %v1087_v62 }
 0x1b0   : > { %v929_v5 = vmin.f32 %v2956_v11, 20.0  ;;  %v1437_v9 = vand.u32 2147483648, %v2895_v57  ;;  %v1091_v14 = vadd.f32 1.0, %v1090_v1  ;;  %v1093_v15 = vand.u32 2147483647, %v2179_v53  ;;  %1826 = vst [vmem:[%s2755_s23 + $0x108] sm:$0xff] %v599_v7 }
 0x1b1   : > { %v2183_v4 = vpop.eup %2182  ;;  %1851 = vst [vmem:[%s2755_s23 + $0x68] sm:$0xff] %v1787_v2  ;;  %v1433_v8 = vmul.f32 %v1432_v16, %v2895_v57  ;;  %v1086_v10 = vsel %vm1085_vm11, %v1083_v63, %v1080_v3  ;;  %645 = vmatmul.f32.gmra.mxu1 %v487_v20  ;;  %758 = vmatmul.f32.gmra.mxu2 %v487_v20  ;;  %vm1446_vm14 = vcmp.eq.f32.partialorder %v2938_v38, inf  ;;  %v1449_v63 = vand.u32 2147483648, %v2938_v38 }
 0x1b2   : > { %v1440_v44 = vmul.f32 %v2183_v4, %v2938_v38  ;;  %v1310_v55 = vsel %vm894_vm8, %v2875_v22, %v1086_v10  ;;  %v971_v18 = vmul.f32 1.442695, %v929_v5  ;;  %871 = vmatmul.f32.gmra.mxu3 %v487_v20  ;;  %v1092_v17 = vmul.f32 %v2179_v53, %v1091_v14 }
 0x1b3   : > { %v448_v12 = vpop.f32.mrf.mxu0  ;;  %v1435_v23 = vsel %vm1434_vm9, %v2895_v57, %v1433_v8  ;;  %v2976_v27 = vadd.f32 1e-08, %v1310_v55  ;;  %vm1094_vm12 = vcmp.lt.f32.partialorder %v1093_v15, 0.0004427343  ;;  %vm1448_vm15 = vcmp.eq.f32.partialorder %v2938_v38, 0.0 }
 0x1b4   : > { %v711_v13 = vpop.f32.mrf.mxu2  ;;  %v824_v21 = vpop.f32.mrf.mxu3  ;;  %v1441_v24 = vmul.f32 %v2183_v4, %v1440_v44  ;;  %v449_v28 = vadd.f32 %v2978_v37, %v448_v12  ;;  %v1438_v31 = vsel %vm1436_vm10, %v1437_v9, %v1435_v23  ;;  %2188 = vpow2.f32 %v971_v18 }
 0x1b5   : > { %v601_v22 = vpop.f32.mrf.mxu1  ;;  %v2185_v30 = vpop.eup %2184  ;;  %v2984_v49 = vadd.f32 %v711_v13, %v2758_v25  ;;  %v825_v32 = vadd.f32 %v824_v21, %v2760_v26  ;;  %v1756_v34 = vmax.f32 %v1438_v31, 1e-05  ;;  %2190 = vrsqrt.f32 %v2976_v27 }
 0x1b6   : > { %v2187_v33 = vpop.eup %2186  ;;  %v1442_v35 = vmul.f32 0.5, %v1441_v24  ;;  %v1096_v39 = vadd.f32 1.0, %v2185_v30  ;;  %v1099_v42 = vmul.f32 -0.5, %v2185_v30  ;;  %v488_v45 = vmax.f32 %v449_v28, 0.0 }
 0x1b7   : > { %v1089_v36 = vmul.f32 0.6931472, %v2187_v33  ;;  %1890 = vst [vmem:[%s2755_s23 + $0x118] sm:$0xff] %v825_v32  ;;  %v1788_v57 = vmin.f32 %v1756_v34, 100000.0  ;;  %v930_v43 = vmin.f32 %v2984_v49, 20.0  ;;  %v602_v54 = vadd.f32 %v601_v22, %v2751_v19 }
 0x1b8   : > { %v1443_v40 = vsub.f32 1.5, %v1442_v35  ;;  %2192 = vlog2.f32 %v1096_v39  ;;  %v1102_v52 = vand.u32 2147483647, %v2185_v30  ;;  %v1100_v60 = vadd.f32 1.0, %v1099_v42 }
 0x1b9   : > { %v1095_v46 = vsel %vm1094_vm12, %v1092_v17, %v1089_v36  ;;  %1852 = vst [vmem:[%s2755_s23 + $0x80] sm:$0xff] %v1788_v57  ;;  %v973_v53 = vmul.f32 1.442695, %v930_v43  ;;  %648 = vmatmul.f32.gmra.mxu1 %v488_v45  ;;  %761 = vmatmul.f32.gmra.mxu2 %v488_v45  ;;  %vm896_vm0 = vcmp.gt.f32.partialorder %v2926_v29, 20.0  ;;  %vm897_vm2 = vcmp.gt.f32.partialorder %v2956_v11, 20.0 }
 0x1ba   : > { %v1444_v47 = vmul.f32 %v2183_v4, %v1443_v40  ;;  %v1311_v48 = vsel %vm895_vm13, %v2900_v61, %v1095_v46  ;;  %v2994_v41 = vpop.eup %2188  ;;  %1827 = vst [vmem:[%s2755_s23 + $0x120] sm:$0xff] %v602_v54  ;;  %874 = vmatmul.f32.gmra.mxu3 %v488_v45  ;;  %vm3012_vm1 = vcmp.lt.f32.partialorder %v1102_v52, 0.0004427343  ;;  %v1101_v9 = vmul.f32 %v2185_v30, %v1100_v60 }
 0x1bb   : > { %v451_v6 = vpop.f32.mrf.mxu0  ;;  %v2996_v51 = vadd.f32 1e-08, %v1311_v48  ;;  %v2191_v58 = vpop.eup %2190  ;;  %v1105_v62 = vadd.f32 1.0, %v2994_v41  ;;  %v1108_v20 = vmul.f32 -0.5, %v2994_v41  ;;  %v1111_v15 = vand.u32 2147483647, %v2994_v41 }
 0x1bc   : > { %v714_v50 = vpop.f32.mrf.mxu2  ;;  %v827_v56 = vpop.f32.mrf.mxu3  ;;  %v1445_v59 = vmul.f32 %v1444_v47, %v2938_v38  ;;  %v452_v61 = vadd.f32 %v2978_v37, %v451_v6  ;;  %v1452_v1 = vmul.f32 %v2191_v58, %v2976_v27  ;;  %vm1458_vm3 = vcmp.eq.f32.partialorder %v2976_v27, inf }
 0x1bd   : > { %v604_v0 = vpop.f32.mrf.mxu1  ;;  %2194 = vrsqrt.f32 %v2996_v51  ;;  %v1109_v12 = vadd.f32 1.0, %v1108_v20  ;;  %v828_v13 = vadd.f32 %v827_v56, %v2760_v26  ;;  %vm1460_vm4 = vcmp.eq.f32.partialorder %v2976_v27, 0.0 }
 0x1be   : > { %v1447_v2 = vsel %vm1446_vm14, %v2938_v38, %v1445_v59  ;;  %2196 = vlog2.f32 %v1105_v62  ;;  %v2193_v16 = vpop.eup %2192  ;;  %v1453_v4 = vmul.f32 %v2191_v58, %v1452_v1  ;;  %v489_v44 = vmax.f32 %v452_v61, 0.0 }
 0x1bf   : > { %v1450_v3 = vsel %vm1448_vm15, %v1449_v63, %v1447_v2  ;;  %2198 = vpow2.f32 %v973_v53  ;;  %v1098_v8 = vmul.f32 0.6931472, %v2193_v16  ;;  %v3017_v38 = vadd.f32 %v714_v50, %v2758_v25  ;;  %1891 = vst [vmem:[%s2755_s23 + $0x130] sm:$0xff] %v828_v13 }
 0x1c0   : > { %v1757_v7 = vmax.f32 %v1450_v3, 1e-05  ;;  %v1454_v10 = vmul.f32 0.5, %v1453_v4  ;;  %v605_v18 = vadd.f32 %v604_v0, %v2751_v19  ;;  %v1110_v39 = vmul.f32 %v2994_v41, %v1109_v12 }
 0x1c1   : > { %v1104_v14 = vsel %vm3012_vm1, %v1101_v9, %v1098_v8  ;;  %v931_v30 = vmin.f32 %v3017_v38, 20.0  ;;  %651 = vmatmul.f32.gmra.mxu1 %v489_v44  ;;  %764 = vmatmul.f32.gmra.mxu2 %v489_v44  ;;  %v1461_v40 = vand.u32 2147483648, %v2976_v27  ;;  %vm1112_vm5 = vcmp.lt.f32.partialorder %v1111_v15, 0.0004427343 }
 0x1c2   : > { %v1789_v55 = vmin.f32 %v1757_v7, 100000.0  ;;  %v1455_v28 = vsub.f32 1.5, %v1454_v10  ;;  %v1312_v22 = vsel %vm896_vm0, %v2926_v29, %v1104_v14  ;;  %1828 = vst [vmem:[%s2755_s23 + $0x138] sm:$0xff] %v605_v18  ;;  %877 = vmatmul.f32.gmra.mxu3 %v489_v44  ;;  %vm898_vm6 = vcmp.gt.f32.partialorder %v2984_v49, 20.0 }
 0x1c3   : > { %v454_v21 = vpop.f32.mrf.mxu0  ;;  %v2195_v24 = vpop.eup %2194  ;;  %v3034_v34 = vadd.f32 1e-08, %v1312_v22  ;;  %v975_v47 = vmul.f32 1.442695, %v931_v30  ;;  %vm1470_vm7 = vcmp.eq.f32.partialorder %v2996_v51, inf  ;;  %vm1472_vm8 = vcmp.eq.f32.partialorder %v2996_v51, 0.0 }
 0x1c4   : > { %v717_v23 = vpop.f32.mrf.mxu2  ;;  %v830_v31 = vpop.f32.mrf.mxu3  ;;  %1853 = vst [vmem:[%s2755_s23 + $0x98] sm:$0xff] %v1789_v55  ;;  %v1464_v33 = vmul.f32 %v2195_v24, %v2996_v51  ;;  %v1456_v36 = vmul.f32 %v2191_v58, %v1455_v28  ;;  %v455_v57 = vadd.f32 %v2978_v37, %v454_v21  ;;  %v1473_v1 = vand.u32 2147483648, %v2996_v51 }
 0x1c5   : > { %v2197_v32 = vpop.eup %2196  ;;  %v607_v29 = vpop.f32.mrf.mxu1  ;;  %2200 = vrsqrt.f32 %v3034_v34  ;;  %v3050_v41 = vadd.f32 %v717_v23, %v2758_v25  ;;  %v831_v7 = vadd.f32 %v830_v31, %v2760_v26  ;;  %vm1482_vm10 = vcmp.eq.f32.partialorder %v3034_v34, inf }
 0x1c6   : > { %v3036_v35 = vpop.eup %2198  ;;  %v1107_v17 = vmul.f32 0.6931472, %v2197_v32  ;;  %v1465_v42 = vmul.f32 %v2195_v24, %v1464_v33  ;;  %v1457_v45 = vmul.f32 %v1456_v36, %v2976_v27  ;;  %v490_v54 = vmax.f32 %v455_v57, 0.0 }
 0x1c7   : > { %v1114_v43 = vadd.f32 1.0, %v3036_v35  ;;  %v1117_v50 = vmul.f32 -0.5, %v3036_v35  ;;  %v932_v4 = vmin.f32 %v3050_v41, 20.0  ;;  %v608_v8 = vadd.f32 %v607_v29, %v2751_v19  ;;  %1892 = vst [vmem:[%s2755_s23 + $0x148] sm:$0xff] %v831_v7 }
 0x1c8   : > { %v1113_v46 = vsel %vm1112_vm5, %v1110_v39, %v1107_v17  ;;  %v1466_v48 = vmul.f32 0.5, %v1465_v42  ;;  %v1459_v52 = vsel %vm1458_vm3, %v2976_v27, %v1457_v45  ;;  %v1120_v27 = vand.u32 2147483647, %v3036_v35 }
 0x1c9   : > { %v1313_v6 = vsel %vm897_vm2, %v2956_v11, %v1113_v46  ;;  %2202 = vlog2.f32 %v1114_v43  ;;  %v1462_v56 = vsel %vm1460_vm4, %v1461_v40, %v1459_v52  ;;  %v1118_v11 = vadd.f32 1.0, %v1117_v50  ;;  %654 = vmatmul.f32.gmra.mxu1 %v490_v54  ;;  %767 = vmatmul.f32.gmra.mxu2 %v490_v54  ;;  %1829 = vst [vmem:[%s2755_s23 + $0x150] sm:$0xff] %v608_v8 }
 0x1ca   : > { %v3055_v53 = vadd.f32 1e-08, %v1313_v6  ;;  %v1467_v58 = vsub.f32 1.5, %v1466_v48  ;;  %v1758_v60 = vmax.f32 %v1462_v56, 1e-05  ;;  %880 = vmatmul.f32.gmra.mxu3 %v490_v54  ;;  %vm1484_vm11 = vcmp.eq.f32.partialorder %v3034_v34, 0.0 }
 0x1cb   : > { %v457_v62 = vpop.f32.mrf.mxu0  ;;  %v2201_v0 = vpop.eup %2200  ;;  %v1119_v3 = vmul.f32 %v3036_v35, %v1118_v11  ;;  %v977_v12 = vmul.f32 1.442695, %v932_v4  ;;  %vm1121_vm9 = vcmp.lt.f32.partialorder %v1120_v27, 0.0004427343  ;;  %vm899_vm12 = vcmp.gt.f32.partialorder %v3017_v38, 20.0 }
 0x1cc   : > { %v720_v59 = vpop.f32.mrf.mxu2  ;;  %2204 = vrsqrt.f32 %v3055_v53  ;;  %v833_v61 = vpop.f32.mrf.mxu3  ;;  %v1468_v63 = vmul.f32 %v2195_v24, %v1467_v58  ;;  %v1790_v2 = vmin.f32 %v1758_v60, 100000.0  ;;  %v1476_v16 = vmul.f32 %v2201_v0, %v3034_v34 }
 0x1cd   : > { %2206 = vpow2.f32 %v975_v47  ;;  %v610_v20 = vpop.f32.mrf.mxu1  ;;  %v458_v9 = vadd.f32 %v2978_v37, %v457_v62  ;;  %v3074_v13 = vadd.f32 %v720_v59, %v2758_v25  ;;  %v834_v55 = vadd.f32 %v833_v61, %v2760_v26 }
 0x1ce   : > { %v1469_v5 = vmul.f32 %v1468_v63, %v2996_v51  ;;  %1854 = vst [vmem:[%s2755_s23 + $0xb0] sm:$0xff] %v1790_v2  ;;  %v1477_v10 = vmul.f32 %v2201_v0, %v1476_v16  ;;  %v611_v37 = vadd.f32 %v610_v20, %v2751_v19  ;;  %2208 = vpow2.f32 %v977_v12 }
 0x1cf   : > { %v2203_v44 = vpop.eup %2202  ;;  %v491_v18 = vmax.f32 %v458_v9, 0.0  ;;  %v933_v32 = vmin.f32 %v3074_v13, 20.0  ;;  %1893 = vst [vmem:[%s2755_s23 + $0x160] sm:$0xff] %v834_v55  ;;  %vm1494_vm13 = vcmp.eq.f32.partialorder %v3055_v53, inf  ;;  %vm1496_vm14 = vcmp.eq.f32.partialorder %v3055_v53, 0.0 }
 0x1d0   : > { %v1471_v14 = vsel %vm1470_vm7, %v2996_v51, %v1469_v5  ;;  %v1116_v15 = vmul.f32 0.6931472, %v2203_v44  ;;  %v1478_v24 = vmul.f32 0.5, %v1477_v10  ;;  %1830 = vst [vmem:[%s2755_s23 + $0x168] sm:$0xff] %v611_v37  ;;  %v1497_v61 = vand.u32 2147483648, %v3055_v53 }
 0x1d1   : > { %v1474_v23 = vsel %vm1472_vm8, %v1473_v1, %v1471_v14  ;;  %657 = vmatmul.f32.gmra.mxu1 %v491_v18  ;;  %770 = vmatmul.f32.gmra.mxu2 %v491_v18  ;;  %v979_v46 = vmul.f32 1.442695, %v933_v32  ;;  %vm900_vm1 = vcmp.gt.f32.partialorder %v3050_v41, 20.0  ;;  %vm901_vm2 = vcmp.gt.f32.partialorder %v3074_v13, 20.0 }
 0x1d2   : > { %v2205_v21 = vpop.eup %2204  ;;  %v1759_v22 = vmax.f32 %v1474_v23, 1e-05  ;;  %v1122_v31 = vsel %vm1121_vm9, %v1119_v3, %v1116_v15  ;;  %v1479_v29 = vsub.f32 1.5, %v1478_v24  ;;  %883 = vmatmul.f32.gmra.mxu3 %v491_v18 }
 0x1d3   : > { %v2207_v28 = vpop.eup %2206  ;;  %v1488_v30 = vmul.f32 %v2205_v21, %v3055_v53  ;;  %v1314_v51 = vsel %vm898_vm6, %v2984_v49, %v1122_v31  ;;  %v1485_v49 = vand.u32 2147483648, %v3034_v34 }
 0x1d4   : > { %v723_v33 = vpop.f32.mrf.mxu2  ;;  %v1123_v35 = vadd.f32 1.0, %v2207_v28  ;;  %v1126_v36 = vmul.f32 -0.5, %v2207_v28  ;;  %v836_v17 = vpop.f32.mrf.mxu3  ;;  %v1791_v39 = vmin.f32 %v1759_v22, 100000.0  ;;  %v3092_v40 = vadd.f32 1e-08, %v1314_v51 }
 0x1d5   : > { %v1489_v57 = vmul.f32 %v2205_v21, %v1488_v30  ;;  %v613_v42 = vpop.f32.mrf.mxu1  ;;  %v1480_v45 = vmul.f32 %v2201_v0, %v1479_v29  ;;  %v2209_v47 = vpop.eup %2208  ;;  %v1129_v50 = vand.u32 2147483647, %v2207_v28  ;;  %v3107_v11 = vadd.f32 %v723_v33, %v2758_v25 }
 0x1d6   : > { %2210 = vlog2.f32 %v1123_v35  ;;  %1855 = vst [vmem:[%s2755_s23 + $0xc8] sm:$0xff] %v1791_v39  ;;  %v1127_v6 = vadd.f32 1.0, %v1126_v36  ;;  %v1132_v54 = vadd.f32 1.0, %v2209_v47  ;;  %v1135_v56 = vmul.f32 -0.5, %v2209_v47 }
 0x1d7   : > { %v1490_v43 = vmul.f32 0.5, %v1489_v57  ;;  %2212 = vrsqrt.f32 %v3092_v40  ;;  %v1481_v48 = vmul.f32 %v1480_v45, %v3034_v34  ;;  %v837_v59 = vadd.f32 %v836_v17, %v2760_v26 }
 0x1d8   : > { %2214 = vpow2.f32 %v979_v46  ;;  %v1128_v27 = vmul.f32 %v2207_v28, %v1127_v6  ;;  %vm3113_vm15 = vcmp.lt.f32.partialorder %v1129_v50, 0.0004427343  ;;  %v934_v2 = vmin.f32 %v3107_v11, 20.0 }
 0x1d9   : > { %v1491_v52 = vsub.f32 1.5, %v1490_v43  ;;  %v1483_v58 = vsel %vm1482_vm10, %v3034_v34, %v1481_v48  ;;  %2216 = vlog2.f32 %v1132_v54  ;;  %v1138_v5 = vand.u32 2147483647, %v2209_v47  ;;  %1894 = vst [vmem:[%s2755_s23 + $0x178] sm:$0xff] %v837_v59 }
 0x1da   : > { %v1486_v60 = vsel %vm1484_vm11, %v1485_v49, %v1483_v58  ;;  %v614_v7 = vadd.f32 %v613_v42, %v2751_v19  ;;  %v1136_v10 = vadd.f32 1.0, %v1135_v56  ;;  %v981_v12 = vmul.f32 1.442695, %v934_v2 }
 0x1db   : > { %v1492_v62 = vmul.f32 %v2205_v21, %v1491_v52  ;;  %v1760_v1 = vmax.f32 %v1486_v60, 1e-05  ;;  %vm1139_vm0 = vcmp.lt.f32.partialorder %v1138_v5, 0.0004427343  ;;  %vm1506_vm3 = vcmp.eq.f32.partialorder %v3092_v40, inf }
 0x1dc   : > { %v726_v0 = vpop.f32.mrf.mxu2  ;;  %v2211_v63 = vpop.eup %2210  ;;  %1831 = vst [vmem:[%s2755_s23 + $0x180] sm:$0xff] %v614_v7  ;;  %2218 = vpow2.f32 %v981_v12  ;;  %v1137_v51 = vmul.f32 %v2209_v47, %v1136_v10  ;;  %vm1508_vm4 = vcmp.eq.f32.partialorder %v3092_v40, 0.0  ;;  %v1509_v58 = vand.u32 2147483648, %v3092_v40 }
 0x1dd   : > { %v839_v16 = vpop.f32.mrf.mxu3  ;;  %v2213_v3 = vpop.eup %2212  ;;  %v1493_v34 = vmul.f32 %v1492_v62, %v3055_v53  ;;  %v1125_v4 = vmul.f32 0.6931472, %v2211_v63  ;;  %v1792_v9 = vmin.f32 %v1760_v1, 100000.0  ;;  %vm902_vm7 = vcmp.gt.f32.partialorder %v3107_v11, 20.0 }
 0x1de   : > { %v616_v8 = vpop.f32.mrf.mxu1  ;;  %v1500_v44 = vmul.f32 %v2213_v3, %v3092_v40  ;;  %v840_v15 = vadd.f32 %v839_v16, %v2760_v26  ;;  %v2215_v37 = vpop.eup %2214 }
 0x1df   : > { %v1495_v55 = vsel %vm1494_vm13, %v3055_v53, %v1493_v34  ;;  %v1131_v14 = vsel %vm3113_vm15, %v1128_v27, %v1125_v4  ;;  %v617_v18 = vadd.f32 %v616_v8, %v2751_v19  ;;  %1856 = vst [vmem:[%s2755_s23 + $0xe0] sm:$0xff] %v1792_v9  ;;  %v2217_v28 = vpop.eup %2216  ;;  %v1141_v31 = vadd.f32 1.0, %v2215_v37 }
 0x1e0   : > { %v1498_v21 = vsel %vm1496_vm14, %v1497_v61, %v1495_v55  ;;  %v1501_v23 = vmul.f32 %v2213_v3, %v1500_v44  ;;  %v1315_v24 = vsel %vm899_vm12, %v3017_v38, %v1131_v14  ;;  %v1144_v32 = vmul.f32 -0.5, %v2215_v37  ;;  %1895 = vst [vmem:[%s2755_s23 + $0x190] sm:$0xff] %v840_v15 }
 0x1e1   : > { %v1761_v22 = vmax.f32 %v1498_v21, 1e-05  ;;  %v3136_v30 = vadd.f32 1e-08, %v1315_v24  ;;  %v1134_v29 = vmul.f32 0.6931472, %v2217_v28  ;;  %v3139_v53 = vadd.f32 %v726_v0, %v2758_v25 }
 0x1e2   : > { %v1502_v33 = vmul.f32 0.5, %v1501_v23  ;;  %1832 = vst [vmem:[%s2755_s23 + $0x198] sm:$0xff] %v617_v18  ;;  %v1145_v42 = vadd.f32 1.0, %v1144_v32  ;;  %v1147_v45 = vand.u32 2147483647, %v2215_v37  ;;  %v2219_v49 = vpop.eup %2218 }
 0x1e3   : > { %v1793_v35 = vmin.f32 %v1761_v22, 100000.0  ;;  %2220 = vrsqrt.f32 %v3136_v30  ;;  %v1140_v17 = vsel %vm1139_vm0, %v1137_v51, %v1134_v29  ;;  %v935_v48 = vmin.f32 %v3139_v53, 20.0 }
 0x1e4   : > { %v729_v38 = vpop.f32.mrf.mxu2  ;;  %v1503_v36 = vsub.f32 1.5, %v1502_v33  ;;  %2222 = vlog2.f32 %v1141_v31  ;;  %v1316_v57 = vsel %vm900_vm1, %v3050_v41, %v1140_v17  ;;  %v1150_v50 = vadd.f32 1.0, %v2219_v49 }
 0x1e5   : > { %v842_v39 = vpop.f32.mrf.mxu3  ;;  %1857 = vst [vmem:[%s2755_s23 + $0xf8] sm:$0xff] %v1793_v35  ;;  %v3147_v47 = vadd.f32 1e-08, %v1316_v57  ;;  %v1153_v52 = vmul.f32 -0.5, %v2219_v49  ;;  %v3153_v54 = vadd.f32 %v729_v38, %v2758_v25  ;;  %v1146_v59 = vmul.f32 %v2215_v37, %v1145_v42 }
 0x1e6   : > { %v619_v46 = vpop.f32.mrf.mxu1  ;;  %v1504_v43 = vmul.f32 %v2213_v3, %v1503_v36  ;;  %v843_v6 = vadd.f32 %v842_v39, %v2760_v26  ;;  %vm3161_vm5 = vcmp.lt.f32.partialorder %v1147_v45, 0.0004427343  ;;  %v1156_v63 = vand.u32 2147483647, %v2219_v49 }
 0x1e7   : > { %2224 = vrsqrt.f32 %v3147_v47  ;;  %v983_v1 = vmul.f32 1.442695, %v935_v48  ;;  %v1154_v2 = vadd.f32 1.0, %v1153_v52  ;;  %v936_v16 = vmin.f32 %v3153_v54, 20.0 }
 0x1e8   : > { %v1505_v41 = vmul.f32 %v1504_v43, %v3092_v40  ;;  %1896 = vst [vmem:[%s2755_s23 + $0x1a8] sm:$0xff] %v843_v6  ;;  %2226 = vlog2.f32 %v1150_v50  ;;  %v620_v5 = vadd.f32 %v619_v46, %v2751_v19  ;;  %vm1157_vm6 = vcmp.lt.f32.partialorder %v1156_v63, 0.0004427343 }
 0x1e9   : > { %v2221_v56 = vpop.eup %2220  ;;  %2228 = vpow2.f32 %v983_v1  ;;  %v985_v8 = vmul.f32 1.442695, %v936_v16  ;;  %v1155_v22 = vmul.f32 %v2219_v49, %v1154_v2  ;;  %vm1518_vm8 = vcmp.eq.f32.partialorder %v3136_v30, inf }
 0x1ea   : > { %v2223_v62 = vpop.eup %2222  ;;  %v1507_v61 = vsel %vm1506_vm3, %v3092_v40, %v1505_v41  ;;  %v1512_v0 = vmul.f32 %v2221_v56, %v3136_v30  ;;  %1833 = vst [vmem:[%s2755_s23 + $0x1b0] sm:$0xff] %v620_v5  ;;  %v1521_v49 = vand.u32 2147483648, %v3136_v30  ;;  %vm1520_vm9 = vcmp.eq.f32.partialorder %v3136_v30, 0.0 }
 0x1eb   : > { %v1510_v27 = vsel %vm1508_vm4, %v1509_v58, %v1507_v61  ;;  %v1143_v20 = vmul.f32 0.6931472, %v2223_v62  ;;  %2230 = vpow2.f32 %v985_v8  ;;  %vm903_vm10 = vcmp.gt.f32.partialorder %v3139_v53, 20.0 }
 0x1ec   : > { %v732_v3 = vpop.f32.mrf.mxu2  ;;  %v1762_v34 = vmax.f32 %v1510_v27, 1e-05  ;;  %v1513_v4 = vmul.f32 %v2221_v56, %v1512_v0  ;;  %vm1530_vm11 = vcmp.eq.f32.partialorder %v3147_v47, inf  ;;  %vm1532_vm12 = vcmp.eq.f32.partialorder %v3147_v47, 0.0 }
 0x1ed   : > { %v845_v7 = vpop.f32.mrf.mxu3  ;;  %v1149_v40 = vsel %vm3161_vm5, %v1146_v59, %v1143_v20  ;;  %v3172_v9 = vadd.f32 %v732_v3, %v2758_v25  ;;  %v2225_v12 = vpop.eup %2224  ;;  %v1533_v61 = vand.u32 2147483648, %v3147_v47  ;;  %vm904_vm15 = vcmp.gt.f32.partialorder %v3153_v54, 20.0 }
 0x1ee   : > { %v846_v44 = vadd.f32 %v845_v7, %v2760_v26  ;;  %v622_v10 = vpop.f32.mrf.mxu1  ;;  %v1794_v55 = vmin.f32 %v1762_v34, 100000.0  ;;  %v1514_v14 = vmul.f32 0.5, %v1513_v4  ;;  %v1317_v15 = vsel %vm901_vm2, %v3074_v13, %v1149_v40  ;;  %v2227_v37 = vpop.eup %2226 }
 0x1ef   : > { %v623_v18 = vadd.f32 %v622_v10, %v2751_v19  ;;  %v1524_v21 = vmul.f32 %v2225_v12, %v3147_v47  ;;  %v3181_v23 = vadd.f32 1e-08, %v1317_v15  ;;  %v1152_v28 = vmul.f32 0.6931472, %v2227_v37  ;;  %v2229_v13 = vpop.eup %2228 }
 0x1f0   : > { %1897 = vst [vmem:[%s2755_s23 + $0x1c0] sm:$0xff] %v846_v44  ;;  %v1515_v24 = vsub.f32 1.5, %v1514_v14  ;;  %v937_v31 = vmin.f32 %v3172_v9, 20.0  ;;  %v1159_v36 = vadd.f32 1.0, %v2229_v13  ;;  %v1162_v17 = vmul.f32 -0.5, %v2229_v13 }
 0x1f1   : > { %1858 = vst [vmem:[%s2755_s23 + $0x110] sm:$0xff] %v1794_v55  ;;  %v1525_v32 = vmul.f32 %v2225_v12, %v1524_v21  ;;  %2232 = vrsqrt.f32 %v3181_v23  ;;  %v1158_v29 = vsel %vm1157_vm6, %v1155_v22, %v1152_v28  ;;  %v3196_v46 = vpop.eup %2230  ;;  %v1165_v50 = vand.u32 2147483647, %v2229_v13 }
 0x1f2   : > { %1834 = vst [vmem:[%s2755_s23 + $0x1c8] sm:$0xff] %v623_v18  ;;  %v1516_v33 = vmul.f32 %v2221_v56, %v1515_v24  ;;  %v987_v51 = vmul.f32 1.442695, %v937_v31  ;;  %v1318_v38 = vsel %vm902_vm7, %v3107_v11, %v1158_v29  ;;  %v1163_v48 = vadd.f32 1.0, %v1162_v17 }
 0x1f3   : > { %v1526_v35 = vmul.f32 0.5, %v1525_v32  ;;  %v3192_v42 = vadd.f32 1e-08, %v1318_v38  ;;  %v1171_v63 = vmul.f32 -0.5, %v3196_v46  ;;  %vm3215_vm13 = vcmp.lt.f32.partialorder %v1165_v50, 0.0004427343 }
 0x1f4   : > { %v735_v39 = vpop.f32.mrf.mxu2  ;;  %v1517_v57 = vmul.f32 %v1516_v33, %v3136_v30  ;;  %2234 = vpow2.f32 %v987_v51  ;;  %v1164_v0 = vmul.f32 %v2229_v13, %v1163_v48  ;;  %vm1542_vm14 = vcmp.eq.f32.partialorder %v3181_v23, inf }
 0x1f5   : > { %v3194_v45 = vpop.f32.mrf.mxu3  ;;  %v1527_v43 = vsub.f32 1.5, %v1526_v35  ;;  %2236 = vlog2.f32 %v1159_v36  ;;  %v3207_v58 = vadd.f32 %v735_v39, %v2758_v25  ;;  %v1172_v34 = vadd.f32 1.0, %v1171_v63 }
 0x1f6   : > { %v3199_v11 = vpop.f32.mrf.mxu1  ;;  %v1519_v6 = vsel %vm1518_vm8, %v3136_v30, %v1517_v57  ;;  %2238 = vrsqrt.f32 %v3192_v42  ;;  %v1168_v30 = vadd.f32 1.0, %v3196_v46  ;;  %vm1544_vm0 = vcmp.eq.f32.partialorder %v3181_v23, 0.0 }
 0x1f7   : > { %v2233_v52 = vpop.eup %2232  ;;  %v1522_v41 = vsel %vm1520_vm9, %v1521_v49, %v1519_v6  ;;  %v1528_v56 = vmul.f32 %v2225_v12, %v1527_v43  ;;  %v938_v5 = vmin.f32 %v3207_v58, 20.0  ;;  %v1174_v18 = vand.u32 2147483647, %v3196_v46 }
 0x1f8   : > { %v1763_v59 = vmax.f32 %v1522_v41, 1e-05  ;;  %v1536_v60 = vmul.f32 %v2233_v52, %v3181_v23  ;;  %2240 = vlog2.f32 %v1168_v30  ;;  %v1545_v51 = vand.u32 2147483648, %v3181_v23 }
 0x1f9   : > { %v1529_v62 = vmul.f32 %v1528_v56, %v3147_v47  ;;  %v989_v13 = vmul.f32 1.442695, %v938_v5  ;;  %v1173_v38 = vmul.f32 %v3196_v46, %v1172_v34  ;;  %v849_v39 = vadd.f32 %v3194_v45, %v2760_v26 }
 0x1fa   : > { %v2235_v1 = vpop.eup %2234  ;;  %v1795_v27 = vmin.f32 %v1763_v59, 100000.0  ;;  %v1537_v20 = vmul.f32 %v2233_v52, %v1536_v60  ;;  %vm1175_vm1 = vcmp.lt.f32.partialorder %v1174_v18, 0.0004427343  ;;  %v626_v46 = vadd.f32 %v3199_v11, %v2751_v19 }
 0x1fb   : > { %v2237_v16 = vpop.eup %2236  ;;  %v1531_v3 = vsel %vm1530_vm11, %v3147_v47, %v1529_v62  ;;  %v1177_v4 = vadd.f32 1.0, %v2235_v1  ;;  %v1180_v12 = vmul.f32 -0.5, %v2235_v1  ;;  %v1183_v28 = vand.u32 2147483647, %v2235_v1  ;;  %1898 = vst [vmem:[%s2755_s23 + $0x1d8] sm:$0xff] %v849_v39 }
 0x1fc   : > { %v738_v7 = vpop.f32.mrf.mxu2  ;;  %v2239_v40 = vpop.eup %2238  ;;  %1859 = vst [vmem:[%s2755_s23 + $0x128] sm:$0xff] %v1795_v27  ;;  %v1534_v8 = vsel %vm1532_vm12, %v1533_v61, %v1531_v3  ;;  %v1538_v44 = vmul.f32 0.5, %v1537_v20  ;;  %v1161_v10 = vmul.f32 0.6931472, %v2237_v16  ;;  %vm905_vm3 = vcmp.gt.f32.partialorder %v3172_v9, 20.0 }
 0x1fd   : > { %v851_v55 = vpop.f32.mrf.mxu3  ;;  %v1764_v14 = vmax.f32 %v1534_v8, 1e-05  ;;  %v1548_v15 = vmul.f32 %v2239_v40, %v3192_v42  ;;  %2242 = vlog2.f32 %v1177_v4  ;;  %v1181_v24 = vadd.f32 1.0, %v1180_v12  ;;  %1835 = vst [vmem:[%s2755_s23 + $0x1e0] sm:$0xff] %v626_v46 }
 0x1fe   : > { %v3231_v37 = vpop.f32.mrf.mxu1  ;;  %v1539_v21 = vsub.f32 1.5, %v1538_v44  ;;  %v1167_v47 = vsel %vm3215_vm13, %v1164_v0, %v1161_v10  ;;  %v2241_v33 = vpop.eup %2240  ;;  %2244 = vpow2.f32 %v989_v13  ;;  %vm3247_vm2 = vcmp.lt.f32.partialorder %v1183_v28, 0.0004427343 }
 0x1ff   : > { %v1796_v22 = vmin.f32 %v1764_v14, 100000.0  ;;  %v1549_v31 = vmul.f32 %v2239_v40, %v1548_v15  ;;  %v1319_v32 = vsel %vm903_vm10, %v3139_v53, %v1167_v47  ;;  %v1170_v17 = vmul.f32 0.6931472, %v2241_v33 }
 0x200   : > { %v1540_v29 = vmul.f32 %v2233_v52, %v1539_v21  ;;  %v3239_v35 = vadd.f32 1e-08, %v1319_v32  ;;  %v1182_v53 = vmul.f32 %v2235_v1, %v1181_v24  ;;  %v3261_v56 = vadd.f32 %v738_v7, %v2758_v25 }
 0x201   : > { %1860 = vst [vmem:[%s2755_s23 + $0x140] sm:$0xff] %v1796_v22  ;;  %v1550_v36 = vmul.f32 0.5, %v1549_v31  ;;  %v1176_v48 = vsel %vm1175_vm1, %v1173_v38, %v1170_v17  ;;  %v852_v62 = vadd.f32 %v851_v55, %v2760_v26  ;;  %vm1554_vm4 = vcmp.eq.f32.partialorder %v3192_v42, inf }
 0x202   : > { %v1541_v57 = vmul.f32 %v1540_v29, %v3181_v23  ;;  %2246 = vrsqrt.f32 %v3239_v35  ;;  %v1320_v52 = vsel %vm904_vm15, %v3153_v54, %v1176_v48  ;;  %v939_v63 = vmin.f32 %v3261_v56, 20.0 }
 0x203   : > { %v2243_v49 = vpop.eup %2242  ;;  %v1551_v43 = vsub.f32 1.5, %v1550_v36  ;;  %v3265_v11 = vadd.f32 1e-08, %v1320_v52  ;;  %vm1556_vm5 = vcmp.eq.f32.partialorder %v3192_v42, 0.0  ;;  %1899 = vst [vmem:[%s2755_s23 + $0x1f0] sm:$0xff] %v852_v62  ;;  %v1557_v2 = vand.u32 2147483648, %v3192_v42 }
 0x204   : > { %v741_v50 = vpop.f32.mrf.mxu2  ;;  %v1543_v45 = vsel %vm1542_vm14, %v3181_v23, %v1541_v57  ;;  %v1179_v41 = vmul.f32 0.6931472, %v2243_v49  ;;  %v2245_v1 = vpop.eup %2244  ;;  %v991_v8 = vmul.f32 1.442695, %v939_v63  ;;  %vm906_vm6 = vcmp.gt.f32.partialorder %v3207_v58, 20.0 }
 0x205   : > { %v854_v59 = vpop.f32.mrf.mxu3  ;;  %v1546_v60 = vsel %vm1544_vm0, %v1545_v51, %v1543_v45  ;;  %v1552_v30 = vmul.f32 %v2239_v40, %v1551_v43  ;;  %2248 = vrsqrt.f32 %v3265_v11  ;;  %v1186_v3 = vadd.f32 1.0, %v2245_v1 }
 0x206   : > { %v631_v61 = vpop.f32.mrf.mxu1  ;;  %v1765_v0 = vmax.f32 %v1546_v60, 1e-05  ;;  %v1185_v54 = vsel %vm3247_vm2, %v1182_v53, %v1179_v41  ;;  %v1189_v7 = vmul.f32 -0.5, %v2245_v1  ;;  %v629_v18 = vadd.f32 %v3231_v37, %v2751_v19 }
 0x207   : > { %v1553_v23 = vmul.f32 %v1552_v30, %v3192_v42  ;;  %v1321_v16 = vsel %vm905_vm3, %v3172_v9, %v1185_v54  ;;  %2250 = vlog2.f32 %v1186_v3  ;;  %v1192_v47 = vand.u32 2147483647, %v2245_v1 }
 0x208   : > { %v2247_v27 = vpop.eup %2246  ;;  %v1797_v20 = vmin.f32 %v1765_v0, 100000.0  ;;  %v3282_v5 = vadd.f32 1e-08, %v1321_v16  ;;  %v1190_v9 = vadd.f32 1.0, %v1189_v7  ;;  %v3291_v24 = vadd.f32 %v741_v50, %v2758_v25  ;;  %1836 = vst [vmem:[%s2755_s23 + $0x1f8] sm:$0xff] %v629_v18 }
 0x209   : > { %v1555_v34 = vsel %vm1554_vm4, %v3192_v42, %v1553_v23  ;;  %v1560_v4 = vmul.f32 %v2247_v27, %v3239_v35  ;;  %v855_v28 = vadd.f32 %v854_v59, %v2760_v26  ;;  %v632_v31 = vadd.f32 %v631_v61, %v2751_v19 }
 0x20a   : > { %1861 = vst [vmem:[%s2755_s23 + $0x158] sm:$0xff] %v1797_v20  ;;  %v1558_v40 = vsel %vm1556_vm5, %v1557_v2, %v1555_v34  ;;  %2252 = vrsqrt.f32 %v3282_v5  ;;  %vm1566_vm7 = vcmp.eq.f32.partialorder %v3239_v35, inf  ;;  %v940_v51 = vmin.f32 %v3291_v24, 20.0 }
 0x20b   : > { %v1766_v44 = vmax.f32 %v1558_v40, 1e-05  ;;  %v1561_v10 = vmul.f32 %v2247_v27, %v1560_v4  ;;  %v2249_v42 = vpop.eup %2248  ;;  %2254 = vpow2.f32 %v991_v8  ;;  %v1191_v57 = vmul.f32 %v2245_v1, %v1190_v9  ;;  %1900 = vst [vmem:[%s2755_s23 + $0x208] sm:$0xff] %v855_v28 }
 0x20c   : > { %v744_v12 = vpop.f32.mrf.mxu2  ;;  %v1572_v21 = vmul.f32 %v2249_v42, %v3265_v11  ;;  %vm1568_vm8 = vcmp.eq.f32.partialorder %v3239_v35, 0.0  ;;  %vm1193_vm9 = vcmp.lt.f32.partialorder %v1192_v47, 0.0004427343  ;;  %1837 = vst [vmem:[%s2755_s23 + $0x210] sm:$0xff] %v632_v31  ;;  %v1569_v46 = vand.u32 2147483648, %v3239_v35 }
 0x20d   : > { %v857_v55 = vpop.f32.mrf.mxu3  ;;  %v1798_v14 = vmin.f32 %v1766_v44, 100000.0  ;;  %v1562_v15 = vmul.f32 0.5, %v1561_v10  ;;  %v3297_v32 = vadd.f32 %v744_v12, %v2758_v25  ;;  %v2251_v37 = vpop.eup %2250  ;;  %v993_v45 = vmul.f32 1.442695, %v940_v51 }
 0x20e   : > { %v858_v13 = vadd.f32 %v857_v55, %v2760_v26  ;;  %v634_v33 = vpop.f32.mrf.mxu1  ;;  %v1573_v29 = vmul.f32 %v2249_v42, %v1572_v21  ;;  %v1188_v39 = vmul.f32 0.6931472, %v2251_v37  ;;  %vm1578_vm10 = vcmp.eq.f32.partialorder %v3265_v11, inf }
 0x20f   : > { %1862 = vst [vmem:[%s2755_s23 + $0x170] sm:$0xff] %v1798_v14  ;;  %v1563_v22 = vsub.f32 1.5, %v1562_v15  ;;  %v635_v38 = vadd.f32 %v634_v33, %v2751_v19  ;;  %v941_v53 = vmin.f32 %v3297_v32, 20.0  ;;  %vm1580_vm11 = vcmp.eq.f32.partialorder %v3265_v11, 0.0 }
 0x210   : > { %v2253_v36 = vpop.eup %2252  ;;  %v1574_v49 = vmul.f32 0.5, %v1573_v29  ;;  %v1194_v50 = vsel %vm1193_vm9, %v1191_v57, %v1188_v39  ;;  %1901 = vst [vmem:[%s2755_s23 + $0x220] sm:$0xff] %v858_v13  ;;  %v1581_v2 = vand.u32 2147483648, %v3265_v11  ;;  %vm1590_vm12 = vcmp.eq.f32.partialorder %v3282_v5, inf }
 0x211   : > { %v1564_v17 = vmul.f32 %v2247_v27, %v1563_v22  ;;  %v1584_v43 = vmul.f32 %v2253_v36, %v3282_v5  ;;  %v2255_v48 = vpop.eup %2254  ;;  %v1322_v59 = vsel %vm906_vm6, %v3207_v58, %v1194_v50  ;;  %1838 = vst [vmem:[%s2755_s23 + $0x228] sm:$0xff] %v635_v38  ;;  %v995_v0 = vmul.f32 1.442695, %v941_v53 }
 0x212   : > { %v1575_v52 = vsub.f32 1.5, %v1574_v49  ;;  %v1195_v60 = vadd.f32 1.0, %v2255_v48  ;;  %v3319_v62 = vadd.f32 1e-08, %v1322_v59  ;;  %v1198_v61 = vmul.f32 -0.5, %v2255_v48 }
 0x213   : > { %v1565_v6 = vmul.f32 %v1564_v17, %v3239_v35  ;;  %v1585_v41 = vmul.f32 %v2253_v36, %v1584_v43  ;;  %v1201_v40 = vand.u32 2147483647, %v2255_v48  ;;  %vm1592_vm13 = vcmp.eq.f32.partialorder %v3282_v5, 0.0 }
 0x214   : > { %v1576_v63 = vmul.f32 %v2249_v42, %v1575_v52  ;;  %2256 = vlog2.f32 %v1195_v60  ;;  %v747_v23 = vpop.f32.mrf.mxu2  ;;  %v1199_v3 = vadd.f32 1.0, %v1198_v61  ;;  %v1593_v15 = vand.u32 2147483648, %v3282_v5 }
 0x215   : > { %v1567_v30 = vsel %vm1566_vm7, %v3239_v35, %v1565_v6  ;;  %v1586_v1 = vmul.f32 0.5, %v1585_v41  ;;  %2258 = vrsqrt.f32 %v3319_v62  ;;  %v860_v58 = vpop.f32.mrf.mxu3  ;;  %v3329_v34 = vadd.f32 %v747_v23, %v2758_v25 }
 0x216   : > { %v1570_v54 = vsel %vm1568_vm8, %v1569_v46, %v1567_v30  ;;  %v1577_v20 = vmul.f32 %v1576_v63, %v3265_v11  ;;  %2260 = vpow2.f32 %v993_v45  ;;  %v637_v8 = vpop.f32.mrf.mxu1  ;;  %v861_v9 = vadd.f32 %v860_v58, %v2760_v26 }
 0x217   : > { %v1767_v27 = vmax.f32 %v1570_v54, 1e-05  ;;  %v1587_v16 = vsub.f32 1.5, %v1586_v1  ;;  %2262 = vpow2.f32 %v995_v0  ;;  %v942_v10 = vmin.f32 %v3329_v34, 20.0 }
 0x218   : > { %v1579_v4 = vsel %vm1578_vm10, %v3265_v11, %v1577_v20  ;;  %v638_v11 = vadd.f32 %v637_v8, %v2751_v19  ;;  %v1200_v21 = vmul.f32 %v2255_v48, %v1199_v3  ;;  %1902 = vst [vmem:[%s2755_s23 + $0x238] sm:$0xff] %v861_v9  ;;  %vm1202_vm14 = vcmp.lt.f32.partialorder %v1201_v40, 0.0004427343 }
 0x219   : > { %v1799_v35 = vmin.f32 %v1767_v27, 100000.0  ;;  %v1588_v7 = vmul.f32 %v2253_v36, %v1587_v16  ;;  %v1582_v44 = vsel %vm1580_vm11, %v1581_v2, %v1579_v4  ;;  %v997_v47 = vmul.f32 1.442695, %v942_v10 }
 0x21a   : > { %v2257_v12 = vpop.eup %2256  ;;  %v1768_v55 = vmax.f32 %v1582_v44, 1e-05  ;;  %1839 = vst [vmem:[%s2755_s23 + $0x240] sm:$0xff] %v638_v11  ;;  %vm907_vm15 = vcmp.gt.f32.partialorder %v3261_v56, 20.0  ;;  %vm908_vm0 = vcmp.gt.f32.partialorder %v3291_v24, 20.0  ;;  %vm909_vm1 = vcmp.gt.f32.partialorder %v3297_v32, 20.0 }
 0x21b   : > { %1863 = vst [vmem:[%s2755_s23 + $0x188] sm:$0xff] %v1799_v35  ;;  %v1589_v42 = vmul.f32 %v1588_v7, %v3282_v5  ;;  %v2259_v14 = vpop.eup %2258  ;;  %v1197_v18 = vmul.f32 0.6931472, %v2257_v12  ;;  %2264 = vpow2.f32 %v997_v47  ;;  %vm1602_vm2 = vcmp.eq.f32.partialorder %v3319_v62, inf }
 0x21c   : > { %v1800_v28 = vmin.f32 %v1768_v55, 100000.0  ;;  %v1596_v31 = vmul.f32 %v2259_v14, %v3319_v62  ;;  %v2261_v13 = vpop.eup %2260  ;;  %v750_v39 = vpop.f32.mrf.mxu2  ;;  %vm1604_vm3 = vcmp.eq.f32.partialorder %v3319_v62, 0.0  ;;  %v1605_v54 = vand.u32 2147483648, %v3319_v62 }
 0x21d   : > { %v1591_v22 = vsel %vm1590_vm12, %v3282_v5, %v1589_v42  ;;  %v1203_v37 = vsel %vm1202_vm14, %v1200_v21, %v1197_v18  ;;  %v2263_v29 = vpop.eup %2262  ;;  %v1204_v17 = vadd.f32 1.0, %v2261_v13  ;;  %v1207_v57 = vmul.f32 -0.5, %v2261_v13  ;;  %v863_v49 = vpop.f32.mrf.mxu3 }
 0x21e   : > { %v1594_v33 = vsel %vm1592_vm13, %v1593_v15, %v1591_v22  ;;  %1864 = vst [vmem:[%s2755_s23 + $0x1a0] sm:$0xff] %v1800_v28  ;;  %v1597_v38 = vmul.f32 %v2259_v14, %v1596_v31  ;;  %v1323_v36 = vsel %vm907_vm15, %v3261_v56, %v1203_v37  ;;  %v1213_v53 = vadd.f32 1.0, %v2263_v29  ;;  %v640_v46 = vpop.f32.mrf.mxu1 }
 0x21f   : > { %v1769_v51 = vmax.f32 %v1594_v33, 1e-05  ;;  %v3347_v5 = vadd.f32 1e-08, %v1323_v36  ;;  %2266 = vlog2.f32 %v1204_v17  ;;  %v1216_v6 = vmul.f32 -0.5, %v2263_v29 }
 0x220   : > { %v1598_v48 = vmul.f32 0.5, %v1597_v38  ;;  %v1210_v50 = vand.u32 2147483647, %v2261_v13  ;;  %v1208_v56 = vadd.f32 1.0, %v1207_v57  ;;  %v1219_v59 = vand.u32 2147483647, %v2263_v29 }
 0x221   : > { %v1801_v43 = vmin.f32 %v1769_v51, 100000.0  ;;  %2268 = vrsqrt.f32 %v3347_v5  ;;  %v3352_v52 = vpop.eup %2264  ;;  %v1217_v41 = vadd.f32 1.0, %v1216_v6  ;;  %v3356_v60 = vadd.f32 %v750_v39, %v2758_v25 }
 0x222   : > { %v1599_v45 = vsub.f32 1.5, %v1598_v48  ;;  %2270 = vlog2.f32 %v1213_v53  ;;  %v864_v30 = vadd.f32 %v863_v49, %v2760_v26  ;;  %v1222_v0 = vadd.f32 1.0, %v3352_v52 }
 0x223   : > { %1865 = vst [vmem:[%s2755_s23 + $0x1b8] sm:$0xff] %v1801_v43  ;;  %v1209_v63 = vmul.f32 %v2261_v13, %v1208_v56  ;;  %vm3363_vm4 = vcmp.lt.f32.partialorder %v1210_v50, 0.0004427343  ;;  %v1225_v23 = vmul.f32 -0.5, %v3352_v52  ;;  %v1218_v20 = vmul.f32 %v2263_v29, %v1217_v41 }
 0x224   : > { %v1600_v61 = vmul.f32 %v2259_v14, %v1599_v45  ;;  %1903 = vst [vmem:[%s2755_s23 + $0x250] sm:$0xff] %v864_v30  ;;  %2272 = vlog2.f32 %v1222_v0  ;;  %v943_v2 = vmin.f32 %v3356_v60, 20.0  ;;  %v753_v16 = vpop.f32.mrf.mxu2  ;;  %vm3371_vm5 = vcmp.lt.f32.partialorder %v1219_v59, 0.0004427343 }
 0x225   : > { %v2267_v27 = vpop.eup %2266  ;;  %v641_v7 = vadd.f32 %v640_v46, %v2751_v19  ;;  %v3377_v40 = vadd.f32 %v753_v16, %v2758_v25  ;;  %v866_v8 = vpop.f32.mrf.mxu3  ;;  %v1228_v12 = vand.u32 2147483647, %v3352_v52  ;;  %v1226_v18 = vadd.f32 1.0, %v1225_v23 }
 0x226   : > { %v1601_v58 = vmul.f32 %v1600_v61, %v3319_v62  ;;  %v1206_v3 = vmul.f32 0.6931472, %v2267_v27  ;;  %v999_v55 = vmul.f32 1.442695, %v943_v2  ;;  %v643_v42 = vpop.f32.mrf.mxu1  ;;  %v867_v13 = vadd.f32 %v866_v8, %v2760_v26 }
 0x227   : > { %v2269_v35 = vpop.eup %2268  ;;  %1840 = vst [vmem:[%s2755_s23 + $0x258] sm:$0xff] %v641_v7  ;;  %v944_v31 = vmin.f32 %v3377_v40, 20.0  ;;  %v1227_v57 = vmul.f32 %v3352_v52, %v1226_v18  ;;  %vm1229_vm6 = vcmp.lt.f32.partialorder %v1228_v12, 0.0004427343  ;;  %vm910_vm7 = vcmp.gt.f32.partialorder %v3329_v34, 20.0 }
 0x228   : > { %v2271_v44 = vpop.eup %2270  ;;  %v1603_v10 = vsel %vm1602_vm2, %v3319_v62, %v1601_v58  ;;  %v1608_v9 = vmul.f32 %v2269_v35, %v3347_v5  ;;  %v1212_v14 = vsel %vm3363_vm4, %v1209_v63, %v1206_v3  ;;  %2274 = vpow2.f32 %v999_v55  ;;  %1904 = vst [vmem:[%s2755_s23 + $0x268] sm:$0xff] %v867_v13 }
 0x229   : > { %v1606_v11 = vsel %vm1604_vm3, %v1605_v54, %v1603_v10  ;;  %v1215_v15 = vmul.f32 0.6931472, %v2271_v44  ;;  %v1324_v28 = vsel %vm908_vm0, %v3291_v24, %v1212_v14  ;;  %v644_v24 = vadd.f32 %v643_v42, %v2751_v19 }
 0x22a   : > { %v1770_v21 = vmax.f32 %v1606_v11, 1e-05  ;;  %v1609_v47 = vmul.f32 %v2269_v35, %v1608_v9  ;;  %v3392_v22 = vadd.f32 1e-08, %v1324_v28  ;;  %v2273_v33 = vpop.eup %2272  ;;  %v1001_v53 = vmul.f32 1.442695, %v944_v31 }
 0x22b   : > { %v1221_v62 = vsel %vm3371_vm5, %v1218_v20, %v1215_v15  ;;  %v1224_v17 = vmul.f32 0.6931472, %v2273_v33  ;;  %1841 = vst [vmem:[%s2755_s23 + $0x270] sm:$0xff] %v644_v24  ;;  %vm1614_vm8 = vcmp.eq.f32.partialorder %v3347_v5, inf  ;;  %v1617_v59 = vand.u32 2147483648, %v3347_v5 }
 0x22c   : > { %v1802_v37 = vmin.f32 %v1770_v21, 100000.0  ;;  %v1610_v29 = vmul.f32 0.5, %v1609_v47  ;;  %v1325_v51 = vsel %vm909_vm1, %v3297_v32, %v1221_v62  ;;  %2276 = vrsqrt.f32 %v3392_v22  ;;  %v756_v39 = vpop.f32.mrf.mxu2 }
 0x22d   : > { %v3405_v36 = vadd.f32 1e-08, %v1325_v51  ;;  %v869_v49 = vpop.f32.mrf.mxu3  ;;  %v3411_v32 = vadd.f32 %v756_v39, %v2758_v25  ;;  %v1230_v46 = vsel %vm1229_vm6, %v1227_v57, %v1224_v17  ;;  %vm1616_vm9 = vcmp.eq.f32.partialorder %v3347_v5, 0.0 }
 0x22e   : > { %1866 = vst [vmem:[%s2755_s23 + $0x1d0] sm:$0xff] %v1802_v37  ;;  %v1611_v38 = vsub.f32 1.5, %v1610_v29  ;;  %v2275_v43 = vpop.eup %2274  ;;  %v646_v6 = vpop.f32.mrf.mxu1  ;;  %v1326_v56 = vsel %vm910_vm7, %v3329_v34, %v1230_v46  ;;  %vm911_vm10 = vcmp.gt.f32.partialorder %v3356_v60, 20.0  ;;  %vm1626_vm11 = vcmp.eq.f32.partialorder %v3392_v22, inf }
 0x22f   : > { %2278 = vrsqrt.f32 %v3405_v36  ;;  %v1231_v50 = vadd.f32 1.0, %v2275_v43  ;;  %v1234_v52 = vmul.f32 -0.5, %v2275_v43  ;;  %v3418_v30 = vadd.f32 1e-08, %v1326_v56 }
 0x230   : > { %v1612_v48 = vmul.f32 %v2269_v35, %v1611_v38  ;;  %2280 = vpow2.f32 %v1001_v53  ;;  %v945_v54 = vmin.f32 %v3411_v32, 20.0  ;;  %v1237_v58 = vand.u32 2147483647, %v2275_v43 }
 0x231   : > { %2282 = vlog2.f32 %v1231_v50  ;;  %v1235_v27 = vadd.f32 1.0, %v1234_v52  ;;  %v870_v16 = vadd.f32 %v869_v49, %v2760_v26  ;;  %v647_v35 = vadd.f32 %v646_v6, %v2751_v19 }
 0x232   : > { %v1613_v45 = vmul.f32 %v1612_v48, %v3347_v5  ;;  %v2277_v41 = vpop.eup %2276  ;;  %2284 = vrsqrt.f32 %v3418_v30  ;;  %vm1628_vm12 = vcmp.eq.f32.partialorder %v3392_v22, 0.0  ;;  %vm1238_vm13 = vcmp.lt.f32.partialorder %v1237_v58, 0.0004427343 }
 0x233   : > { %v1620_v0 = vmul.f32 %v2277_v41, %v3392_v22  ;;  %1905 = vst [vmem:[%s2755_s23 + $0x280] sm:$0xff] %v870_v16  ;;  %v1236_v18 = vmul.f32 %v2275_v43, %v1235_v27  ;;  %vm912_vm14 = vcmp.gt.f32.partialorder %v3377_v40, 20.0  ;;  %v1629_v17 = vand.u32 2147483648, %v3392_v22 }
 0x234   : > { %v1615_v61 = vsel %vm1614_vm8, %v3347_v5, %v1613_v45  ;;  %v759_v20 = vpop.f32.mrf.mxu2  ;;  %v1003_v5 = vmul.f32 1.442695, %v945_v54  ;;  %1842 = vst [vmem:[%s2755_s23 + $0x288] sm:$0xff] %v647_v35  ;;  %vm1638_vm15 = vcmp.eq.f32.partialorder %v3405_v36, inf  ;;  %vm1640_vm0 = vcmp.eq.f32.partialorder %v3405_v36, 0.0 }
 0x235   : > { %v1618_v63 = vsel %vm1616_vm9, %v1617_v59, %v1615_v61  ;;  %v2279_v34 = vpop.eup %2278  ;;  %v1621_v23 = vmul.f32 %v2277_v41, %v1620_v0  ;;  %v872_v3 = vpop.f32.mrf.mxu3  ;;  %v3431_v44 = vadd.f32 %v759_v20, %v2758_v25  ;;  %v1641_v46 = vand.u32 2147483648, %v3405_v36 }
 0x236   : > { %v1771_v1 = vmax.f32 %v1618_v63, 1e-05  ;;  %v1632_v2 = vmul.f32 %v2279_v34, %v3405_v36  ;;  %v2281_v4 = vpop.eup %2280  ;;  %v873_v10 = vadd.f32 %v872_v3, %v2760_v26  ;;  %v649_v9 = vpop.f32.mrf.mxu1  ;;  %2286 = vpow2.f32 %v1003_v5 }
 0x237   : > { %v1622_v8 = vmul.f32 0.5, %v1621_v23  ;;  %v2283_v12 = vpop.eup %2282  ;;  %v1240_v42 = vadd.f32 1.0, %v2281_v4  ;;  %v1243_v11 = vmul.f32 -0.5, %v2281_v4  ;;  %v1246_v28 = vand.u32 2147483647, %v2281_v4 }
 0x238   : > { %v1803_v7 = vmin.f32 %v1771_v1, 100000.0  ;;  %v1633_v55 = vmul.f32 %v2279_v34, %v1632_v2  ;;  %v1233_v15 = vmul.f32 0.6931472, %v2283_v12  ;;  %v2285_v21 = vpop.eup %2284  ;;  %v946_v33 = vmin.f32 %v3431_v44, 20.0  ;;  %1906 = vst [vmem:[%s2755_s23 + $0x298] sm:$0xff] %v873_v10 }
 0x239   : > { %v1623_v14 = vsub.f32 1.5, %v1622_v8  ;;  %2288 = vlog2.f32 %v1240_v42  ;;  %v1644_v31 = vmul.f32 %v2285_v21, %v3418_v30  ;;  %v1244_v51 = vadd.f32 1.0, %v1243_v11 }
 0x23a   : > { %1867 = vst [vmem:[%s2755_s23 + $0x1e8] sm:$0xff] %v1803_v7  ;;  %v1634_v47 = vmul.f32 0.5, %v1633_v55  ;;  %v1239_v13 = vsel %vm1238_vm13, %v1236_v18, %v1233_v15  ;;  %v650_v24 = vadd.f32 %v649_v9, %v2751_v19  ;;  %v1005_v43 = vmul.f32 1.442695, %v946_v33 }
 0x23b   : > { %v1624_v62 = vmul.f32 %v2277_v41, %v1623_v14  ;;  %v1327_v29 = vsel %vm911_vm10, %v3356_v60, %v1239_v13  ;;  %v1645_v39 = vmul.f32 %v2285_v21, %v1644_v31  ;;  %v1245_v59 = vmul.f32 %v2281_v4, %v1244_v51 }
 0x23c   : > { %v1635_v37 = vsub.f32 1.5, %v1634_v47  ;;  %v3448_v57 = vadd.f32 1e-08, %v1327_v29  ;;  %v762_v53 = vpop.f32.mrf.mxu2  ;;  %1843 = vst [vmem:[%s2755_s23 + $0x2a0] sm:$0xff] %v650_v24  ;;  %v2287_v60 = vpop.eup %2286  ;;  %vm1247_vm1 = vcmp.lt.f32.partialorder %v1246_v28, 0.0004427343 }
 0x23d   : > { %v1625_v38 = vmul.f32 %v1624_v62, %v3392_v22  ;;  %v875_v48 = vpop.f32.mrf.mxu3  ;;  %v1646_v50 = vmul.f32 0.5, %v1645_v39  ;;  %v1249_v63 = vadd.f32 1.0, %v2287_v60  ;;  %v1252_v1 = vmul.f32 -0.5, %v2287_v60 }
 0x23e   : > { %v1636_v49 = vmul.f32 %v2279_v34, %v1635_v37  ;;  %2290 = vrsqrt.f32 %v3448_v57  ;;  %v652_v45 = vpop.f32.mrf.mxu1  ;;  %v3465_v23 = vadd.f32 %v762_v53, %v2758_v25  ;;  %vm1650_vm2 = vcmp.eq.f32.partialorder %v3418_v30, inf }
 0x23f   : > { %v1627_v6 = vsel %vm1626_vm11, %v3392_v22, %v1625_v38  ;;  %v2289_v56 = vpop.eup %2288  ;;  %v1647_v0 = vsub.f32 1.5, %v1646_v50  ;;  %2292 = vpow2.f32 %v1005_v43  ;;  %v1653_v7 = vand.u32 2147483648, %v3418_v30 }
 0x240   : > { %v1630_v52 = vsel %vm1628_vm12, %v1629_v17, %v1627_v6  ;;  %v1637_v41 = vmul.f32 %v1636_v49, %v3405_v36  ;;  %v1242_v54 = vmul.f32 0.6931472, %v2289_v56  ;;  %2294 = vlog2.f32 %v1249_v63 }
 0x241   : > { %v1772_v61 = vmax.f32 %v1630_v52, 1e-05  ;;  %v1648_v58 = vmul.f32 %v2285_v21, %v1647_v0  ;;  %v947_v10 = vmin.f32 %v3465_v23, 20.0  ;;  %vm1652_vm3 = vcmp.eq.f32.partialorder %v3418_v30, 0.0 }
 0x242   : > { %v1639_v34 = vsel %vm1638_vm15, %v3405_v36, %v1637_v41  ;;  %v1248_v20 = vsel %vm1247_vm1, %v1245_v59, %v1242_v54  ;;  %v1253_v12 = vadd.f32 1.0, %v1252_v1  ;;  %v1255_v15 = vand.u32 2147483647, %v2287_v60 }
 0x243   : > { %v1804_v22 = vmin.f32 %v1772_v61, 100000.0  ;;  %v1642_v27 = vsel %vm1640_vm0, %v1641_v46, %v1639_v34  ;;  %v1328_v5 = vsel %vm912_vm14, %v3377_v40, %v1248_v20  ;;  %v1649_v35 = vmul.f32 %v1648_v58, %v3418_v30 }
 0x244   : > { %v1773_v2 = vmax.f32 %v1642_v27, 1e-05  ;;  %v2291_v16 = vpop.eup %2290  ;;  %v3475_v3 = vadd.f32 1e-08, %v1328_v5  ;;  %v765_v4 = vpop.f32.mrf.mxu2  ;;  %v1007_v18 = vmul.f32 1.442695, %v947_v10  ;;  %v653_v13 = vadd.f32 %v652_v45, %v2751_v19 }
 0x245   : > { %1868 = vst [vmem:[%s2755_s23 + $0x200] sm:$0xff] %v1804_v22  ;;  %v1656_v8 = vmul.f32 %v2291_v16, %v3448_v57  ;;  %v878_v9 = vpop.f32.mrf.mxu3  ;;  %v1651_v40 = vsel %vm1650_vm2, %v3418_v30, %v1649_v35  ;;  %v2293_v42 = vpop.eup %2292  ;;  %vm913_vm4 = vcmp.gt.f32.partialorder %v3411_v32, 20.0  ;;  %v876_v30 = vadd.f32 %v875_v48, %v2760_v26 }
 0x246   : > { %v1805_v36 = vmin.f32 %v1773_v2, 100000.0  ;;  %2296 = vrsqrt.f32 %v3475_v3  ;;  %v655_v55 = vpop.f32.mrf.mxu1  ;;  %v1654_v11 = vsel %vm1652_vm3, %v1653_v7, %v1651_v40  ;;  %v1258_v47 = vadd.f32 1.0, %v2293_v42  ;;  %v2295_v62 = vpop.eup %2294  ;;  %1844 = vst [vmem:[%s2755_s23 + $0x2b8] sm:$0xff] %v653_v13 }
 0x247   : > { %v1657_v14 = vmul.f32 %v2291_v16, %v1656_v8  ;;  %v1774_v21 = vmax.f32 %v1654_v11, 1e-05  ;;  %v1261_v28 = vmul.f32 -0.5, %v2293_v42  ;;  %2298 = vpow2.f32 %v1007_v18  ;;  %1907 = vst [vmem:[%s2755_s23 + $0x2b0] sm:$0xff] %v876_v30 }
 0x248   : > { %1869 = vst [vmem:[%s2755_s23 + $0x218] sm:$0xff] %v1805_v36  ;;  %v1251_v37 = vmul.f32 0.6931472, %v2295_v62  ;;  %v1254_v29 = vmul.f32 %v2287_v60, %v1253_v12  ;;  %2300 = vlog2.f32 %v1258_v47  ;;  %vm1256_vm5 = vcmp.lt.f32.partialorder %v1255_v15, 0.0004427343 }
 0x249   : > { %v1658_v31 = vmul.f32 0.5, %v1657_v14  ;;  %v1806_v33 = vmin.f32 %v1774_v21, 100000.0  ;;  %v3489_v24 = vadd.f32 %v765_v4, %v2758_v25  ;;  %v879_v38 = vadd.f32 %v878_v9, %v2760_v26 }
 0x24a   : > { %v1257_v39 = vsel %vm1256_vm5, %v1254_v29, %v1251_v37  ;;  %v1262_v53 = vadd.f32 1.0, %v1261_v28  ;;  %v1264_v49 = vand.u32 2147483647, %v2293_v42  ;;  %v656_v43 = vadd.f32 %v655_v55, %v2751_v19 }
 0x24b   : > { %v1659_v51 = vsub.f32 1.5, %v1658_v31  ;;  %1870 = vst [vmem:[%s2755_s23 + $0x230] sm:$0xff] %v1806_v33  ;;  %v1329_v46 = vsel %vm913_vm4, %v3411_v32, %v1257_v39  ;;  %vm914_vm6 = vcmp.gt.f32.partialorder %v3431_v44, 20.0  ;;  %vm1662_vm7 = vcmp.eq.f32.partialorder %v3448_v57, inf }
 0x24c   : > { %v2297_v17 = vpop.eup %2296  ;;  %v768_v48 = vpop.f32.mrf.mxu2  ;;  %v3501_v45 = vadd.f32 1e-08, %v1329_v46  ;;  %v948_v56 = vmin.f32 %v3489_v24, 20.0  ;;  %1908 = vst [vmem:[%s2755_s23 + $0x2c8] sm:$0xff] %v879_v38  ;;  %vm1664_vm8 = vcmp.eq.f32.partialorder %v3448_v57, 0.0  ;;  %v1665_v63 = vand.u32 2147483648, %v3448_v57 }
 0x24d   : > { %v1660_v60 = vmul.f32 %v2291_v16, %v1659_v51  ;;  %v1668_v6 = vmul.f32 %v2297_v17, %v3475_v3  ;;  %v881_v50 = vpop.f32.mrf.mxu3  ;;  %v2299_v59 = vpop.eup %2298  ;;  %1845 = vst [vmem:[%s2755_s23 + $0x2d0] sm:$0xff] %v656_v43  ;;  %v1263_v34 = vmul.f32 %v2293_v42, %v1262_v53  ;;  %vm3512_vm9 = vcmp.lt.f32.partialorder %v1264_v49, 0.0004427343 }
 0x24e   : > { %v882_v52 = vadd.f32 %v881_v50, %v2760_v26  ;;  %v658_v41 = vpop.f32.mrf.mxu1  ;;  %v2301_v54 = vpop.eup %2300  ;;  %2302 = vrsqrt.f32 %v3501_v45  ;;  %v1267_v20 = vadd.f32 1.0, %v2299_v59  ;;  %v1270_v2 = vmul.f32 -0.5, %v2299_v59 }
 0x24f   : > { %v1661_v61 = vmul.f32 %v1660_v60, %v3448_v57  ;;  %v1669_v32 = vmul.f32 %v2297_v17, %v1668_v6  ;;  %v659_v0 = vadd.f32 %v658_v41, %v2751_v19  ;;  %v1260_v58 = vmul.f32 0.6931472, %v2301_v54 }
 0x250   : > { %1909 = vst [vmem:[%s2755_s23 + $0x2e0] sm:$0xff] %v882_v52  ;;  %v1009_v5 = vmul.f32 1.442695, %v948_v56  ;;  %v3522_v16 = vadd.f32 %v768_v48, %v2758_v25  ;;  %2304 = vlog2.f32 %v1267_v20  ;;  %v1271_v55 = vadd.f32 1.0, %v1270_v2 }
 0x251   : > { %v1663_v22 = vsel %vm1662_vm7, %v3448_v57, %v1661_v61  ;;  %v1670_v27 = vmul.f32 0.5, %v1669_v32  ;;  %1846 = vst [vmem:[%s2755_s23 + $0x2e8] sm:$0xff] %v659_v0  ;;  %v1266_v36 = vsel %vm3512_vm9, %v1263_v34, %v1260_v58  ;;  %v1273_v18 = vand.u32 2147483647, %v2299_v59 }
 0x252   : > { %v1666_v19 = vsel %vm1664_vm8, %v1665_v63, %v1663_v22  ;;  %v1330_v57 = vsel %vm914_vm6, %v3431_v44, %v1266_v36  ;;  %2306 = vpow2.f32 %v1009_v5  ;;  %v949_v42 = vmin.f32 %v3522_v16, 20.0 }
 0x253   : > { %v1775_v35 = vmax.f32 %v1666_v19, 1e-05  ;;  %v1671_v4 = vsub.f32 1.5, %v1670_v27  ;;  %v3529_v9 = vadd.f32 1e-08, %v1330_v57  ;;  %vm1674_vm10 = vcmp.eq.f32.partialorder %v3475_v3, inf }
 0x254   : > { %v771_v7 = vpop.f32.mrf.mxu2  ;;  %v2303_v12 = vpop.eup %2302  ;;  %v1677_v21 = vand.u32 2147483648, %v3475_v3  ;;  %v1011_v47 = vmul.f32 1.442695, %v949_v42  ;;  %vm1676_vm11 = vcmp.eq.f32.partialorder %v3475_v3, 0.0  ;;  %v1272_v33 = vmul.f32 %v2299_v59, %v1271_v55 }
 0x255   : > { %v1807_v8 = vmin.f32 %v1775_v35, 100000.0  ;;  %v1672_v10 = vmul.f32 %v2297_v17, %v1671_v4  ;;  %v884_v40 = vpop.f32.mrf.mxu3  ;;  %v3533_v11 = vadd.f32 %v771_v7, %v2758_v25  ;;  %v1680_v15 = vmul.f32 %v2303_v12, %v3501_v45 }
 0x256   : > { %v885_v14 = vadd.f32 %v884_v40, %v2760_v26  ;;  %2308 = vrsqrt.f32 %v3529_v9  ;;  %v2305_v28 = vpop.eup %2304  ;;  %vm1274_vm12 = vcmp.lt.f32.partialorder %v1273_v18, 0.0004427343  ;;  %vm915_vm13 = vcmp.gt.f32.partialorder %v3465_v23, 20.0 }
 0x257   : > { %1871 = vst [vmem:[%s2755_s23 + $0x248] sm:$0xff] %v1807_v8  ;;  %v1673_v44 = vmul.f32 %v1672_v10, %v3475_v3  ;;  %v1681_v26 = vmul.f32 %v2303_v12, %v1680_v15  ;;  %v950_v62 = vmin.f32 %v3533_v11, 20.0  ;;  %v1269_v13 = vmul.f32 0.6931472, %v2305_v28 }
 0x258   : > { %1910 = vst [vmem:[%s2755_s23 + $0x2f8] sm:$0xff] %v885_v14  ;;  %v2307_v31 = vpop.eup %2306  ;;  %2310 = vpow2.f32 %v1011_v47  ;;  %vm1686_vm14 = vcmp.eq.f32.partialorder %v3501_v45, inf  ;;  %vm1688_vm15 = vcmp.eq.f32.partialorder %v3501_v45, 0.0  ;;  %vm916_vm0 = vcmp.gt.f32.partialorder %v3489_v24, 20.0 }
 0x259   : > { %v1675_v25 = vsel %vm1674_vm10, %v3475_v3, %v1673_v44  ;;  %v1682_v29 = vmul.f32 0.5, %v1681_v26  ;;  %v1276_v51 = vadd.f32 1.0, %v2307_v31  ;;  %v1275_v38 = vsel %vm1274_vm12, %v1272_v33, %v1269_v13 }
 0x25a   : > { %v1678_v30 = vsel %vm1676_vm11, %v1677_v21, %v1675_v25  ;;  %v1279_v17 = vmul.f32 -0.5, %v2307_v31  ;;  %v1013_v39 = vmul.f32 1.442695, %v950_v62  ;;  %v1331_v43 = vsel %vm915_vm13, %v3465_v23, %v1275_v38 }
 0x25b   : > { %v1776_v37 = vmax.f32 %v1678_v30, 1e-05  ;;  %v1683_v49 = vsub.f32 1.5, %v1682_v29  ;;  %2312 = vlog2.f32 %v1276_v51  ;;  %v3549_v60 = vadd.f32 1e-08, %v1331_v43 }
 0x25c   : > { %v2309_v53 = vpop.eup %2308  ;;  %2314 = vpow2.f32 %v1013_v39  ;;  %v1280_v56 = vadd.f32 1.0, %v1279_v17  ;;  %v1282_v41 = vand.u32 2147483647, %v2307_v31  ;;  %v1689_v23 = vand.u32 2147483648, %v3501_v45 }
 0x25d   : > { %v1808_v3 = vmin.f32 %v1776_v37, 100000.0  ;;  %v1692_v48 = vmul.f32 %v2309_v53, %v3529_v9  ;;  %v1684_v6 = vmul.f32 %v2303_v12, %v1683_v49  ;;  %2316 = vrsqrt.f32 %v3549_v60 }
 0x25e   : > { %v2311_v46 = vpop.eup %2310  ;;  %v1281_v22 = vmul.f32 %v2307_v31, %v1280_v56  ;;  %vm1283_vm1 = vcmp.lt.f32.partialorder %v1282_v41, 0.0004427343  ;;  %vm1698_vm2 = vcmp.eq.f32.partialorder %v3529_v9, inf  ;;  %v1701_v12 = vand.u32 2147483648, %v3529_v9 }
 0x25f   : > { %1872 = vst [vmem:[%s2755_s23 + $0x260] sm:$0xff] %v1808_v3  ;;  %v1693_v50 = vmul.f32 %v2309_v53, %v1692_v48  ;;  %v1685_v52 = vmul.f32 %v1684_v6, %v3501_v45  ;;  %v1285_v59 = vadd.f32 1.0, %v2311_v46  ;;  %v1288_v54 = vmul.f32 -0.5, %v2311_v46 }
 0x260   : > { %v1291_v5 = vand.u32 2147483647, %v2311_v46  ;;  %vm1700_vm3 = vcmp.eq.f32.partialorder %v3529_v9, 0.0  ;;  %vm917_vm5 = vcmp.gt.f32.partialorder %v3522_v16, 20.0  ;;  %vm1710_vm7 = vcmp.eq.f32.partialorder %v3549_v60, inf }
 0x261   : > { %v1694_v61 = vmul.f32 0.5, %v1693_v50  ;;  %v2313_v32 = vpop.eup %2312  ;;  %v1687_v0 = vsel %vm1686_vm14, %v3501_v45, %v1685_v52  ;;  %2318 = vlog2.f32 %v1285_v59  ;;  %v1289_v57 = vadd.f32 1.0, %v1288_v54 }
 0x262   : > { %v1690_v63 = vsel %vm1688_vm15, %v1689_v23, %v1687_v0  ;;  %v1278_v1 = vmul.f32 0.6931472, %v2313_v32  ;;  %v2315_v27 = vpop.eup %2314  ;;  %vm1292_vm4 = vcmp.lt.f32.partialorder %v1291_v5, 0.0004427343  ;;  %v1713_v38 = vand.u32 2147483648, %v3549_v60 }
 0x263   : > { %v1695_v34 = vsub.f32 1.5, %v1694_v61  ;;  %v1777_v58 = vmax.f32 %v1690_v63, 1e-05  ;;  %v2317_v20 = vpop.eup %2316  ;;  %v1294_v35 = vadd.f32 1.0, %v2315_v27  ;;  %v1297_v10 = vmul.f32 -0.5, %v2315_v27 }
 0x264   : > { %v1284_v2 = vsel %vm1283_vm1, %v1281_v22, %v1278_v1  ;;  %v1704_v45 = vmul.f32 %v2317_v20, %v3549_v60  ;;  %v1290_v15 = vmul.f32 %v2311_v46, %v1289_v57  ;;  %v1300_v25 = vand.u32 2147483647, %v2315_v27 }
 0x265   : > { %v1696_v19 = vmul.f32 %v2309_v53, %v1695_v34  ;;  %v1809_v4 = vmin.f32 %v1777_v58, 100000.0  ;;  %v1332_v36 = vsel %vm916_vm0, %v3489_v24, %v1284_v2  ;;  %2320 = vlog2.f32 %v1294_v35 }
 0x266   : > { %v3562_v8 = vadd.f32 1e-08, %v1332_v36  ;;  %v1705_v55 = vmul.f32 %v2317_v20, %v1704_v45  ;;  %v1298_v21 = vadd.f32 1.0, %v1297_v10  ;;  %vm1301_vm6 = vcmp.lt.f32.partialorder %v1300_v25, 0.0004427343 }
 0x267   : > { %v1697_v7 = vmul.f32 %v1696_v19, %v3529_v9  ;;  %v2319_v40 = vpop.eup %2318  ;;  %1873 = vst [vmem:[%s2755_s23 + $0x278] sm:$0xff] %v1809_v4  ;;  %vm918_vm8 = vcmp.gt.f32.partialorder %v3533_v11, 20.0  ;;  %vm1712_vm9 = vcmp.eq.f32.partialorder %v3549_v60, 0.0 }
 0x268   : > { %2322 = vrsqrt.f32 %v3562_v8  ;;  %v1706_v14 = vmul.f32 0.5, %v1705_v55  ;;  %v1287_v44 = vmul.f32 0.6931472, %v2319_v40  ;;  %v1299_v37 = vmul.f32 %v2315_v27, %v1298_v21 }
 0x269   : > { %v1699_v42 = vsel %vm1698_vm2, %v3529_v9, %v1697_v7  ;;  %vm1722_vm10 = vcmp.eq.f32.partialorder %v3562_v8, inf  ;;  %vm1724_vm11 = vcmp.eq.f32.partialorder %v3562_v8, 0.0 }
 0x26a   : > { %v1702_v24 = vsel %vm1700_vm3, %v1701_v12, %v1699_v42  ;;  %v1707_v47 = vsub.f32 1.5, %v1706_v14  ;;  %v1293_v28 = vsel %vm1292_vm4, %v1290_v15, %v1287_v44 }
 0x26b   : > { %v1778_v18 = vmax.f32 %v1702_v24, 1e-05  ;;  %v2321_v26 = vpop.eup %2320  ;;  %v1333_v31 = vsel %vm917_vm5, %v3522_v16, %v1293_v28 }
 0x26c   : > { %v1708_v9 = vmul.f32 %v2317_v20, %v1707_v47  ;;  %v1365_v30 = vadd.f32 1e-08, %v1333_v31  ;;  %v1296_v13 = vmul.f32 0.6931472, %v2321_v26 }
 0x26d   : > { %v1810_v62 = vmin.f32 %v1778_v18, 100000.0 }
 0x26e   : > { %v2323_v33 = vpop.eup %2322  ;;  %v1709_v29 = vmul.f32 %v1708_v9, %v3549_v60  ;;  %2324 = vrsqrt.f32 %v1365_v30  ;;  %v1302_v16 = vsel %vm1301_vm6, %v1299_v37, %v1296_v13  ;;  %vm1734_vm12 = vcmp.eq.f32.partialorder %v1365_v30, inf }
 0x26f   : > { %1874 = vst [vmem:[%s2755_s23 + $0x290] sm:$0xff] %v1810_v62  ;;  %v1716_v51 = vmul.f32 %v2323_v33, %v3562_v8  ;;  %v1334_v53 = vsel %vm918_vm8, %v3533_v11, %v1302_v16  ;;  %v1725_v11 = vand.u32 2147483648, %v3562_v8  ;;  %v1737_v20 = vand.u32 2147483648, %v1365_v30 }
 0x270   : > { %v1711_v17 = vsel %vm1710_vm7, %v3549_v60, %v1709_v29  ;;  %v1366_v49 = vadd.f32 1e-08, %v1334_v53  ;;  %vm1736_vm13 = vcmp.eq.f32.partialorder %v1365_v30, 0.0 }
 0x271   : > { %v1717_v39 = vmul.f32 %v2323_v33, %v1716_v51  ;;  %v1714_v3 = vsel %vm1712_vm9, %v1713_v38, %v1711_v17 }
 0x272   : > { %v1779_v43 = vmax.f32 %v1714_v3, 1e-05  ;;  %2326 = vrsqrt.f32 %v1366_v49  ;;  %vm1746_vm14 = vcmp.eq.f32.partialorder %v1366_v49, inf  ;;  %v1749_v57 = vand.u32 2147483648, %v1366_v49 }
 0x273   : > { %v1718_v48 = vmul.f32 0.5, %v1717_v39  ;;  %vm1748_vm15 = vcmp.eq.f32.partialorder %v1366_v49, 0.0 }
 0x274   : > { %v2325_v6 = vpop.eup %2324  ;;  %v1811_v46 = vmin.f32 %v1779_v43, 100000.0 }
 0x275   : > { %v1719_v50 = vsub.f32 1.5, %v1718_v48  ;;  %v1728_v56 = vmul.f32 %v2325_v6, %v1365_v30 }
 0x276   : > { %1875 = vst [vmem:[%s2755_s23 + $0x2a8] sm:$0xff] %v1811_v46 }
 0x277   : > { %v1720_v52 = vmul.f32 %v2323_v33, %v1719_v50  ;;  %v1729_v41 = vmul.f32 %v2325_v6, %v1728_v56 }
 0x278   : > { %v2327_v23 = vpop.eup %2326 }
 0x279   : > { %v1721_v59 = vmul.f32 %v1720_v52, %v3562_v8  ;;  %v1730_v60 = vmul.f32 0.5, %v1729_v41  ;;  %v1740_v32 = vmul.f32 %v2327_v23, %v1366_v49 }
 0x27b   : > { %v1723_v61 = vsel %vm1722_vm10, %v3562_v8, %v1721_v59  ;;  %v1731_v54 = vsub.f32 1.5, %v1730_v60  ;;  %v1741_v34 = vmul.f32 %v2327_v23, %v1740_v32 }
 0x27c   : > { %v1726_v0 = vsel %vm1724_vm11, %v1725_v11, %v1723_v61 }
 0x27d   : > { %v1780_v63 = vmax.f32 %v1726_v0, 1e-05  ;;  %v1732_v1 = vmul.f32 %v2325_v6, %v1731_v54  ;;  %v1742_v27 = vmul.f32 0.5, %v1741_v34 }
 0x27f   : > { %v1812_v22 = vmin.f32 %v1780_v63, 100000.0  ;;  %v1733_v58 = vmul.f32 %v1732_v1, %v1365_v30  ;;  %v1743_v19 = vsub.f32 1.5, %v1742_v27 }
 0x281   : > { %1876 = vst [vmem:[%s2755_s23 + $0x2c0] sm:$0xff] %v1812_v22  ;;  %v1735_v2 = vsel %vm1734_vm12, %v1365_v30, %v1733_v58  ;;  %v1744_v35 = vmul.f32 %v2327_v23, %v1743_v19 }
 0x282   : > { %v1738_v5 = vsel %vm1736_vm13, %v1737_v20, %v1735_v2 }
 0x283   : > { %v1781_v4 = vmax.f32 %v1738_v5, 1e-05  ;;  %v1745_v45 = vmul.f32 %v1744_v35, %v1366_v49 }
 0x285   : > { %v1813_v36 = vmin.f32 %v1781_v4, 100000.0  ;;  %v1747_v7 = vsel %vm1746_vm14, %v1366_v49, %v1745_v45 }
 0x286   : > { %v1750_v8 = vsel %vm1748_vm15, %v1749_v57, %v1747_v7 }
 0x287   : > { %1877 = vst [vmem:[%s2755_s23 + $0x2d8] sm:$0xff] %v1813_v36  ;;  %v1782_v10 = vmax.f32 %v1750_v8, 1e-05 }
 0x289   : > { %v1814_v40 = vmin.f32 %v1782_v10, 100000.0 }
 0x28b   : > { %1878 = vst [vmem:[%s2755_s23 + $0x2f0] sm:$0xff] %v1814_v40 }
 0x28c   : > { %2476 = shalt.err (!%p2473_p10)
}
 0x28d   : > { %s2532_s26 = smov 384   ;;  %s2533_s12 = smov 24  }
 0x28e   : > { %2066 = dma.vmem_to_hbm [thread:$0]  (%p2649_p3), %s1926_s7, 12288, %s1928_s22, %s1912_s16, %s2532_s26, %s2532_s26, %s2533_s12  }
 0x28f PF: > { %s1942_s23 = sand.u32 1, %s2511_s18   ;;  %p3656_p12 = scmp.ge.s32.totalorder %s2523_s21, 2 }
 0x290   : > { %s1943_s27 = scalar_lea.sflag [#allocation4], %s1942_s23 }
 0x291   : > { %p2083_p13 = pnand %p3656_p12, %p2599_p6 }
 0x293   : > { %p2084_p0 = pneg %p2083_p13 }
 0x295   : > { %2506 = dma.done.wait (%p2084_p0), %s1943_s27, 12288  }
 0x296   : > { %2508 = vsyncadd (%p2084_p0), %s1943_s27, 4294955008  ;;  %p20_p5 = scmp.ge.s32.totalorder %s2636_s30, 4   ;;  %s3657_s18 = smov %s2515_s19 }
 0x297   : > { %s3658_s19 = smov %s2519_s20  ;;  %s3659_s20 = smov %s2645_s9 }
 0x298   : > { %s3660_s21 = smov %s2636_s30  ;;  %22 = sbr.rel (!%p20_p5) target bundleno = 7 (0x7), region = 97 }
 0x29d   :  { %1949 = vsyncpa [#allocation3], 1 }
 0x29e   :  { %1951 = vsyncpa [#allocation3 + $0x1], 1 }
 0x29f   :  { %1952 = vsyncpa [#allocation6], 1 }
 0x2a0   :  { %1953 = vsyncpa [#allocation9], 1 }
 0x2a1   :  { %1954 = vsyncpa [#allocation4], 1 }
 0x2a2   :  { %1956 = vsyncpa [#allocation4 + $0x1], 1 }

</bundles_post_ra>
